<compile_context>
chip_gen: v7x
topology: tpu7x:2x2x1
jax: 0.10.0
libtpu: 0.0.40
codegen_flags: <defaults>
</compile_context>

<pallas_src>
import functools

import jax
import jax.numpy as jnp
from jax.experimental import pallas as pl
from jax.experimental.pallas import tpu as pltpu

LEAK = 0.1
EPS = 1e-5


def _leaky(x):
    return jnp.where(x > 0, x, LEAK * x)


def basic_block_kernel(x_ref, top_ref, bot_ref, w1_ref, b1_ref, w2_ref, b2_ref,
                       o_ref, pad_ref, *, TH, W, base):
    """One grid step = TH image rows of one image.

    x_ref  : (1, TH*Wp, CP) bf16  width/channel-padded rows of this tile (row = h*Wp + w')
    top_ref: (1, Wp, CP)    bf16  image row just above the tile (zeros at image top)
    bot_ref: (1, Wp, CP)    bf16  image row just below the tile (zeros at image bottom)
    w1_ref : (CP, CP)       bf16  1x1 conv weight with BN1 scale folded in
    b1_ref : (1, CP)        f32   folded BN1 bias
    w2_ref : (9, CP, CP)    bf16  3x3 conv weight (tap-major) with BN2 scale folded in
    b2_ref : (1, CP)        f32   folded BN2 bias
    o_ref  : (1, TH*Wp, CP) bf16  output rows of this tile (same padded layout)
    pad_ref: (PADROWS, CP)  bf16  flat scratch holding the zero-padded conv1 output:
                                  P[i, j, :] lives at row base + i*Wp + j
    """
    Wp = W + 2
    rows = TH * Wp
    cp = x_ref.shape[-1]
    r = pl.program_id(1)
    R = pl.num_programs(1)

    w1 = w1_ref[...]
    b1 = b1_ref[...]

    # ---- conv1 (1x1) + folded BN1 + LeakyReLU on the tile interior: one MXU matmul ----
    t = jnp.dot(x_ref[0], w1, preferred_element_type=jnp.float32)
    t = _leaky(t + b1)                                           # (rows, CP) f32
    # Zero the width-pad columns (w' == 0 and w' == Wp-1): conv2's left/right padding.
    col = jax.lax.broadcasted_iota(jnp.int32, (rows, 1), 0) % Wp
    t = jnp.where(jnp.logical_and(col > 0, col < Wp - 1), t, 0.0)

    # ---- conv1 on the one-row top/bottom halos; zeroed at the image boundary, where
    #      they are conv2's top/bottom zero padding (must be zero, not conv1(0)). ----
    hcol = jax.lax.broadcasted_iota(jnp.int32, (Wp, 1), 0)
    h_in_w = jnp.logical_and(hcol > 0, hcol < Wp - 1)
    t_top = _leaky(jnp.dot(top_ref[0], w1, preferred_element_type=jnp.float32) + b1)
    t_top = jnp.where(jnp.logical_and(h_in_w, r > 0), t_top, 0.0)
    t_bot = _leaky(jnp.dot(bot_ref[0], w1, preferred_element_type=jnp.float32) + b1)
    t_bot = jnp.where(jnp.logical_and(h_in_w, r < R - 1), t_bot, 0.0)

    # ---- stage the zero-padded conv1 output into the flat VMEM scratch ----
    zrow = jnp.zeros((1, cp), jnp.bfloat16)
    pad_ref[pl.ds(base - 1, 1), :] = zrow                         # slack row (dy=0,dx=0 tap)
    pad_ref[pl.ds(base, Wp), :] = t_top.astype(jnp.bfloat16)      # padded row i = 0
    pad_ref[pl.ds(base + Wp, rows), :] = t.astype(jnp.bfloat16)   # interior rows 1..TH
    pad_ref[pl.ds(base + (TH + 1) * Wp, Wp), :] = t_bot.astype(jnp.bfloat16)  # row TH+1
    pad_ref[pl.ds(base + (TH + 2) * Wp, 1), :] = zrow             # slack row (dy=2,dx=2 tap)

    # ---- conv2 (3x3, pad=1) with folded BN2: 9 contiguous shifted matmuls ----
    # Output row rr = h_local*Wp + w' needs P[h_local+dy, w'-1+dx] which lives at
    # pad_ref[base - 1 + dy*Wp + dx + rr]; every tap is one contiguous (rows, CP) slice.
    # Rows landing in the width-pad columns accumulate garbage and are sliced off by
    # the wrapper.
    # TODO(synk): on v6e/v7x fold the dx taps into the matmul N dimension
    # (w2 packed as (CP, 3*CP) per dy) to fill the 256-wide MXU columns; needs
    # row-shifted recombination of the three column groups.
    acc = jnp.dot(pad_ref[pl.ds(base - 1, rows), :], w2_ref[0],
                  preferred_element_type=jnp.float32)
    for k in range(1, 9):
        dy, dx = divmod(k, 3)
        start = base - 1 + dy * Wp + dx
        acc = acc + jnp.dot(pad_ref[pl.ds(start, rows), :], w2_ref[k],
                            preferred_element_type=jnp.float32)

    # ---- folded BN2 bias + LeakyReLU + residual add (f32), lane-dense bf16 store ----
    out = _leaky(acc + b2_ref[...]) + x_ref[0].astype(jnp.float32)
    o_ref[0] = out.astype(o_ref.dtype)


def _vmem_limit_bytes():
    """Per-generation scoped-VMEM budget (~75% of physical: ~48 MiB v7x, ~96 MiB v5e/v6e)."""
    cap = 128 * 1024 * 1024
    try:
        info = pltpu.get_tpu_info()
        cap = int(getattr(info, "vmem_capacity_bytes", 0)) or cap
    except Exception:
        pass
    return min(cap * 3 // 4, 100 * 1024 * 1024)


def _pick_row_tile(H, Wp, CP, vmem_limit, max_rows):
    """Largest divisor of H whose per-step working set fits the VMEM budget and whose
    flat block height (TH*Wp) keeps the (8, 128) block constraint."""
    # Per image row: x + out double-buffered bf16, bf16 scratch, f32 conv1/acc temporaries.
    row_bytes = Wp * CP * 22
    fixed = 4 * 10 * CP * CP * 2          # double-buffered bf16 weights + slack
    target = max((int(vmem_limit * 0.6) - fixed) // row_bytes, 1)
    if max_rows is not None:
        target = min(target, max_rows)
    if target >= H:
        return H
    for th in range(target, 0, -1):
        if H % th == 0 and (th * Wp) % 8 == 0:
            return th
    # TODO(synk): pad H to a multiple of the desired tile instead of falling back to
    # whole-image blocks when H has no suitable divisor.
    return H


def basic_block_forward(x_nchw, w1, s1, b1, w2, s2, b2, *, max_rows_per_tile=None):
    """x_nchw: (N, Cin, H, W) float32; returns (N, Cin, H, W)."""
    N, Cin, H, W = x_nchw.shape
    Cmid = w1.shape[1]
    Cout = w2.shape[-1]
    assert Cout == Cin, "residual add requires planes[1] == inplanes"

    LANES = 128
    CP = ((max(Cin, Cmid, Cout) + LANES - 1) // LANES) * LANES
    Wp = W + 2
    flat = H * Wp

    vmem_limit = _vmem_limit_bytes()
    TH = _pick_row_tile(H, Wp, CP, vmem_limit, max_rows_per_tile)
    R = H // TH
    rows = TH * Wp

    # Lane-dense bf16 activation slab: NCHW -> NHWC, zero-pad width by 1 (conv2 halo)
    # and channels up to CP, flatten (H, Wp) into rows.
    act_dtype = jnp.bfloat16
    xh = jnp.transpose(x_nchw, (0, 2, 3, 1))
    xh = jnp.pad(xh, ((0, 0), (0, 0), (1, 1), (0, CP - Cin))).astype(act_dtype)
    x_slab = xh.reshape(N, flat, CP)

    # One-image-row halos above/below each row tile (zeros at the image boundary).
    zrow = jnp.zeros((N, 1, Wp, CP), act_dtype)
    if R > 1:
        tops = jnp.concatenate([zrow, xh[:, TH - 1:H - 1:TH]], axis=1)
        bots = jnp.concatenate([xh[:, TH:H:TH], zrow], axis=1)
    else:
        tops, bots = zrow, zrow
    tops = tops.reshape(N * R, Wp, CP)
    bots = bots.reshape(N * R, Wp, CP)

    # Fold BN scales into the conv weights (per output channel), zero-pad to CP, cast
    # the MXU operands to bf16.  Biases stay f32.
    w1f = w1 * s1[None, :]
    w2f = w2 * s2[None, None, None, :]
    w1p = jnp.zeros((CP, CP), jnp.float32).at[:Cin, :Cmid].set(w1f).astype(jnp.bfloat16)
    w2p = (jnp.zeros((3, 3, CP, CP), jnp.float32).at[:, :, :Cmid, :Cout].set(w2f)
           .reshape(9, CP, CP).astype(jnp.bfloat16))
    b1p = jnp.zeros((1, CP), jnp.float32).at[0, :Cmid].set(b1)
    b2p = jnp.zeros((1, CP), jnp.float32).at[0, :Cout].set(b2)

    # Flat padded-scratch geometry: P[i, j] lives at row base + i*Wp + j.  `base` keeps
    # the big interior store aligned to the 16-row bf16 vreg packing; the +1 slack row
    # on each side (zeroed in-kernel) covers the (dy=0,dx=0)/(dy=2,dx=2) tap slices.
    # TODO(synk): optionally pad Wp to a multiple of 16 inside the scratch so more of
    # the 9 tap slices start on a packed-vreg boundary (check vld slot pressure first).
    base = (-Wp) % 16 or 16
    pad_rows = ((base + (TH + 2) * Wp + 1 + 15) // 16) * 16

    slab_bytes = N * flat * CP * 2
    halo_bytes = 2 * N * R * Wp * CP * 2
    weight_bytes = 10 * CP * CP * 2 + 2 * CP * 4
    cost = pl.CostEstimate(
        flops=2 * N * CP * CP * (flat + 2 * R * Wp + 9 * flat),
        transcendentals=0,
        bytes_accessed=2 * slab_bytes + halo_bytes + weight_bytes,
    )

    kernel = functools.partial(basic_block_kernel, TH=TH, W=W, base=base)

    # TODO(synk): for tiny images with small N (grid nearly empty), pack several images
    # per grid step (Nb, rows, CP) to amortize per-step overhead and MXU weight loads.
    out = pl.pallas_call(
        kernel,
        out_shape=jax.ShapeDtypeStruct((N, flat, CP), act_dtype),
        grid_spec=pltpu.PrefetchScalarGridSpec(
            num_scalar_prefetch=0,
            grid=(N, R),
            in_specs=[
                pl.BlockSpec((1, rows, CP), lambda n, r: (n, r, 0)),        # x tile
                pl.BlockSpec((1, Wp, CP), lambda n, r: (n * R + r, 0, 0)),  # top halo
                pl.BlockSpec((1, Wp, CP), lambda n, r: (n * R + r, 0, 0)),  # bottom halo
                pl.BlockSpec((CP, CP), lambda n, r: (0, 0)),                # w1 (bf16)
                pl.BlockSpec((1, CP), lambda n, r: (0, 0)),                 # b1
                pl.BlockSpec((9, CP, CP), lambda n, r: (0, 0, 0)),          # w2 (bf16)
                pl.BlockSpec((1, CP), lambda n, r: (0, 0)),                 # b2
            ],
            out_specs=pl.BlockSpec((1, rows, CP), lambda n, r: (n, r, 0)),
            scratch_shapes=[pltpu.VMEM((pad_rows, CP), jnp.bfloat16)],
        ),
        compiler_params=pltpu.CompilerParams(
            dimension_semantics=("parallel", "parallel"),
            vmem_limit_bytes=vmem_limit,
        ),
        cost_estimate=cost,
    )(x_slab, tops, bots, w1p, b1p, w2p, b2p)

    # Drop the width halo and the channel padding, back to NCHW / input dtype.
    out = out.reshape(N, H, Wp, CP)[:, :, 1:W + 1, :Cout]
    return jnp.transpose(out, (0, 3, 1, 2)).astype(x_nchw.dtype)


def reference_forward(x_nchw, w1, s1, b1, w2, s2, b2):
    """Plain-JAX reference mirroring the kernel's numerics: bf16-rounded activations and
    BN-folded bf16 conv weights, f32 accumulation, f32 elementwise/residual math."""
    x = jnp.transpose(x_nchw, (0, 2, 3, 1)).astype(jnp.bfloat16)
    w1f = (w1 * s1[None, :]).astype(jnp.bfloat16)
    w2f = (w2 * s2[None, None, None, :]).astype(jnp.bfloat16)
    t = jnp.einsum("nhwc,cd->nhwd", x, w1f, preferred_element_type=jnp.float32)
    t = _leaky(t + b1).astype(jnp.bfloat16)
    tp = jnp.pad(t, ((0, 0), (1, 1), (1, 1), (0, 0)))
    H, W = x.shape[1], x.shape[2]
    acc = jnp.zeros(x.shape[:3] + (w2.shape[-1],), jnp.float32)
    for dy in range(3):
        for dx in range(3):
            acc = acc + jnp.einsum("nhwc,cd->nhwd",
                                   tp[:, dy:dy + H, dx:dx + W, :], w2f[dy, dx],
                                   preferred_element_type=jnp.float32)
    out = _leaky(acc + b2) + x.astype(jnp.float32)
    return jnp.transpose(out, (0, 3, 1, 2)).astype(x_nchw.dtype)


def make_params(key, inplanes, planes):
    """Deterministic synthetic parameters (conv weights + folded BN scale/bias)."""
    c0, c1 = planes
    k = jax.random.split(key, 8)
    w1 = jax.random.normal(k[0], (inplanes, c0), jnp.float32) * 0.2   # 1x1, (Cin, Cmid)
    w2 = jax.random.normal(k[1], (3, 3, c0, c1), jnp.float32) * 0.1   # 3x3, HWIO
    g1 = 1.0 + 0.1 * jax.random.normal(k[2], (c0,), jnp.float32)
    be1 = 0.1 * jax.random.normal(k[3], (c0,), jnp.float32)
    mu1 = 0.1 * jax.random.normal(k[4], (c0,), jnp.float32)
    var1 = jnp.abs(jax.random.normal(k[5], (c0,), jnp.float32)) + 0.5
    g2 = 1.0 + 0.1 * jax.random.normal(k[6], (c1,), jnp.float32)
    be2 = 0.1 * jax.random.normal(k[7], (c1,), jnp.float32)
    mu2 = jnp.zeros((c1,), jnp.float32)
    var2 = jnp.ones((c1,), jnp.float32)
    s1 = g1 / jnp.sqrt(var1 + EPS)
    b1 = be1 - mu1 * s1
    s2 = g2 / jnp.sqrt(var2 + EPS)
    b2 = be2 - mu2 * s2
    return w1, s1, b1, w2, s2, b2


if __name__ == "__main__":
    key = jax.random.PRNGKey(0)
    kx, kp = jax.random.split(key)

    # BasicBlock(inplanes=4, planes=[2, 4]) on a (2, 4, 16, 16) NCHW input.
    inplanes, planes = 4, (2, 4)
    x = jax.random.normal(kx, (2, inplanes, 16, 16), jnp.float32)
    params = make_params(kp, inplanes, planes)

    # max_rows_per_tile=8 forces two row tiles per image so the halo path is exercised
    # even at this toy size (production sizes derive the tile from the VMEM budget).
    out = basic_block_forward(x, *params, max_rows_per_tile=8)
    out = jax.block_until_ready(out)

    ref = reference_forward(x, *params)
    assert out.shape == x.shape and out.dtype == x.dtype
    # bf16 activation slabs round input/output to bf16 (~4e-3 relative); tolerance reflects it.
    assert jnp.allclose(out, ref, atol=2e-2, rtol=2e-2), "mismatch vs reference"

    print("KERNEL_OK")
</pallas_src>

<mosaic_0001>
module attributes {stable_mosaic.version = 11 : i64} {
  func.func @basic_block_kernel(%arg0: i32, %arg1: i32, %arg2: memref<1x144x128xbf16, #tpu.memory_space<vmem>>, %arg3: memref<1x18x128xbf16, #tpu.memory_space<vmem>>, %arg4: memref<1x18x128xbf16, #tpu.memory_space<vmem>>, %arg5: memref<128x128xbf16, #tpu.memory_space<vmem>>, %arg6: memref<1x128xf32, #tpu.memory_space<vmem>>, %arg7: memref<9x128x128xbf16, #tpu.memory_space<vmem>>, %arg8: memref<1x128xf32, #tpu.memory_space<vmem>>, %arg9: memref<1x144x128xbf16, #tpu.memory_space<vmem>>, %arg10: memref<208x128xbf16, #tpu.memory_space<vmem>>) attributes {dimension_semantics = [#tpu.dimension_semantics<parallel>, #tpu.dimension_semantics<parallel>], iteration_bounds = array<i64: 2, 2>, scalar_prefetch = 0 : i64, scratch_operands = 1 : i64, tpu.core_type = #tpu.core_type<tc>, window_params = [{transform_indices = @transform_0, window_bounds = array<i64: 1, 144, 128>}, {transform_indices = @transform_1, window_bounds = array<i64: 1, 18, 128>}, {transform_indices = @transform_2, window_bounds = array<i64: 1, 18, 128>}, {pipeline_mode = #tpu.pipeline_mode<synchronous>, transform_indices = @transform_3, window_bounds = array<i64: 128, 128>}, {pipeline_mode = #tpu.pipeline_mode<synchronous>, transform_indices = @transform_4, window_bounds = array<i64: 1, 128>}, {pipeline_mode = #tpu.pipeline_mode<synchronous>, transform_indices = @transform_5, window_bounds = array<i64: 9, 128, 128>}, {pipeline_mode = #tpu.pipeline_mode<synchronous>, transform_indices = @transform_6, window_bounds = array<i64: 1, 128>}, {transform_indices = @transform_7, window_bounds = array<i64: 1, 144, 128>}]} {
    %c0 = arith.constant 0 : index
    %c0_0 = arith.constant 0 : index
    %0 = vector.load %arg5[%c0, %c0_0] : memref<128x128xbf16, #tpu.memory_space<vmem>>, vector<128x128xbf16>
    %c0_1 = arith.constant 0 : index
    %c0_2 = arith.constant 0 : index
    %1 = vector.load %arg6[%c0_1, %c0_2] : memref<1x128xf32, #tpu.memory_space<vmem>>, vector<1x128xf32>
    %c0_3 = arith.constant 0 : index
    %c0_4 = arith.constant 0 : index
    %c0_5 = arith.constant 0 : index
    %2 = vector.load %arg2[%c0_3, %c0_4, %c0_5] : memref<1x144x128xbf16, #tpu.memory_space<vmem>>, vector<1x144x128xbf16>
    %3 = vector.shape_cast %2 : vector<1x144x128xbf16> to vector<144x128xbf16>
    %cst = arith.constant dense<0.000000e+00> : vector<144x128xf32>
    %4 = tpu.matmul %3, %0, %cst {dimension_numbers = #tpu.dot_dimension_numbers<[1], [0], [0], [1], [0, 0, 1, 1], [], []>} : vector<144x128xbf16>, vector<128x128xbf16>, vector<144x128xf32> -> vector<144x128xf32>
    %5 = vector.broadcast %1 : vector<1x128xf32> to vector<144x128xf32>
    %6 = arith.addf %4, %5 : vector<144x128xf32>
    %cst_6 = arith.constant 0.000000e+00 : f32
    %7 = vector.broadcast %cst_6 : f32 to vector<144x128xf32>
    %8 = arith.cmpf ogt, %6, %7 : vector<144x128xf32>
    %cst_7 = arith.constant 1.000000e-01 : f32
    %9 = vector.broadcast %cst_7 : f32 to vector<144x128xf32>
    %10 = arith.mulf %9, %6 : vector<144x128xf32>
    %11 = arith.select %8, %6, %10 : vector<144x128xi1>, vector<144x128xf32>
    %12 = tpu.iota {dimensions = array<i32: 0>} : vector<144x1xi32>
    %c18_i32 = arith.constant 18 : i32
    %c0_i32 = arith.constant 0 : i32
    %13 = arith.cmpi eq, %c18_i32, %c0_i32 : i32
    %c1_i32 = arith.constant 1 : i32
    %14 = arith.select %13, %c1_i32, %c18_i32 : i32
    %15 = vector.broadcast %14 : i32 to vector<144x1xi32>
    %16 = arith.remsi %12, %15 : vector<144x1xi32>
    %c0_i32_8 = arith.constant 0 : i32
    %17 = vector.broadcast %c0_i32_8 : i32 to vector<144x1xi32>
    %18 = arith.cmpi ne, %16, %17 : vector<144x1xi32>
    %c0_i32_9 = arith.constant 0 : i32
    %19 = vector.broadcast %c0_i32_9 : i32 to vector<144x1xi32>
    %20 = arith.cmpi slt, %16, %19 : vector<144x1xi32>
    %c0_i32_10 = arith.constant 0 : i32
    %21 = arith.cmpi slt, %14, %c0_i32_10 : i32
    %22 = vector.broadcast %21 : i1 to vector<144x1xi1>
    %23 = vector.broadcast %22 : vector<144x1xi1> to vector<144x1xi1>
    %24 = arith.xori %20, %23 : vector<144x1xi1>
    %25 = arith.andi %24, %18 : vector<144x1xi1>
    %26 = vector.broadcast %14 : i32 to vector<144x1xi32>
    %27 = arith.addi %16, %26 : vector<144x1xi32>
    %28 = arith.select %25, %27, %16 : vector<144x1xi1>, vector<144x1xi32>
    %c0_i32_11 = arith.constant 0 : i32
    %29 = vector.broadcast %c0_i32_11 : i32 to vector<144x1xi32>
    %30 = arith.cmpi sgt, %28, %29 : vector<144x1xi32>
    %c17_i32 = arith.constant 17 : i32
    %31 = vector.broadcast %c17_i32 : i32 to vector<144x1xi32>
    %32 = arith.cmpi slt, %28, %31 : vector<144x1xi32>
    %33 = arith.andi %30, %32 : vector<144x1xi1>
    %cst_12 = arith.constant 0.000000e+00 : f32
    %34 = vector.shape_cast %33 : vector<144x1xi1> to vector<144x1xi1>
    %35 = vector.broadcast %34 : vector<144x1xi1> to vector<144x128xi1>
    %36 = vector.broadcast %cst_12 : f32 to vector<144x128xf32>
    %37 = arith.select %35, %11, %36 : vector<144x128xi1>, vector<144x128xf32>
    %38 = tpu.iota {dimensions = array<i32: 0>} : vector<18x1xi32>
    %c0_i32_13 = arith.constant 0 : i32
    %39 = vector.broadcast %c0_i32_13 : i32 to vector<18x1xi32>
    %40 = arith.cmpi sgt, %38, %39 : vector<18x1xi32>
    %c17_i32_14 = arith.constant 17 : i32
    %41 = vector.broadcast %c17_i32_14 : i32 to vector<18x1xi32>
    %42 = arith.cmpi slt, %38, %41 : vector<18x1xi32>
    %43 = arith.andi %40, %42 : vector<18x1xi1>
    %c0_15 = arith.constant 0 : index
    %c0_16 = arith.constant 0 : index
    %c0_17 = arith.constant 0 : index
    %44 = vector.load %arg3[%c0_15, %c0_16, %c0_17] : memref<1x18x128xbf16, #tpu.memory_space<vmem>>, vector<1x18x128xbf16>
    %45 = vector.shape_cast %44 : vector<1x18x128xbf16> to vector<18x128xbf16>
    %cst_18 = arith.constant dense<0.000000e+00> : vector<18x128xf32>
    %46 = tpu.matmul %45, %0, %cst_18 {dimension_numbers = #tpu.dot_dimension_numbers<[1], [0], [0], [1], [0, 0, 1, 1], [], []>} : vector<18x128xbf16>, vector<128x128xbf16>, vector<18x128xf32> -> vector<18x128xf32>
    %47 = vector.broadcast %1 : vector<1x128xf32> to vector<18x128xf32>
    %48 = arith.addf %46, %47 : vector<18x128xf32>
    %cst_19 = arith.constant 0.000000e+00 : f32
    %49 = vector.broadcast %cst_19 : f32 to vector<18x128xf32>
    %50 = arith.cmpf ogt, %48, %49 : vector<18x128xf32>
    %cst_20 = arith.constant 1.000000e-01 : f32
    %51 = vector.broadcast %cst_20 : f32 to vector<18x128xf32>
    %52 = arith.mulf %51, %48 : vector<18x128xf32>
    %53 = arith.select %50, %48, %52 : vector<18x128xi1>, vector<18x128xf32>
    %c0_i32_21 = arith.constant 0 : i32
    %54 = arith.cmpi sgt, %arg1, %c0_i32_21 : i32
    %55 = vector.broadcast %54 : i1 to vector<18x1xi1>
    %56 = arith.andi %43, %55 : vector<18x1xi1>
    %cst_22 = arith.constant 0.000000e+00 : f32
    %57 = vector.shape_cast %56 : vector<18x1xi1> to vector<18x1xi1>
    %58 = vector.broadcast %57 : vector<18x1xi1> to vector<18x128xi1>
    %59 = vector.broadcast %cst_22 : f32 to vector<18x128xf32>
    %60 = arith.select %58, %53, %59 : vector<18x128xi1>, vector<18x128xf32>
    %c0_23 = arith.constant 0 : index
    %c0_24 = arith.constant 0 : index
    %c0_25 = arith.constant 0 : index
    %61 = vector.load %arg4[%c0_23, %c0_24, %c0_25] : memref<1x18x128xbf16, #tpu.memory_space<vmem>>, vector<1x18x128xbf16>
    %62 = vector.shape_cast %61 : vector<1x18x128xbf16> to vector<18x128xbf16>
    %cst_26 = arith.constant dense<0.000000e+00> : vector<18x128xf32>
    %63 = tpu.matmul %62, %0, %cst_26 {dimension_numbers = #tpu.dot_dimension_numbers<[1], [0], [0], [1], [0, 0, 1, 1], [], []>} : vector<18x128xbf16>, vector<128x128xbf16>, vector<18x128xf32> -> vector<18x128xf32>
    %64 = vector.broadcast %1 : vector<1x128xf32> to vector<18x128xf32>
    %65 = arith.addf %63, %64 : vector<18x128xf32>
    %cst_27 = arith.constant 0.000000e+00 : f32
    %66 = vector.broadcast %cst_27 : f32 to vector<18x128xf32>
    %67 = arith.cmpf ogt, %65, %66 : vector<18x128xf32>
    %cst_28 = arith.constant 1.000000e-01 : f32
    %68 = vector.broadcast %cst_28 : f32 to vector<18x128xf32>
    %69 = arith.mulf %68, %65 : vector<18x128xf32>
    %70 = arith.select %67, %65, %69 : vector<18x128xi1>, vector<18x128xf32>
    %c1_i32_29 = arith.constant 1 : i32
    %71 = arith.cmpi slt, %arg1, %c1_i32_29 : i32
    %72 = vector.broadcast %71 : i1 to vector<18x1xi1>
    %73 = arith.andi %43, %72 : vector<18x1xi1>
    %cst_30 = arith.constant 0.000000e+00 : f32
    %74 = vector.shape_cast %73 : vector<18x1xi1> to vector<18x1xi1>
    %75 = vector.broadcast %74 : vector<18x1xi1> to vector<18x128xi1>
    %76 = vector.broadcast %cst_30 : f32 to vector<18x128xf32>
    %77 = arith.select %75, %70, %76 : vector<18x128xi1>, vector<18x128xf32>
    %cst_31 = arith.constant 0.000000e+00 : bf16
    %78 = vector.broadcast %cst_31 : bf16 to vector<1x128xbf16>
    %c13 = arith.constant 13 : index
    %c0_32 = arith.constant 0 : index
    %79 = vector.load %arg10[%c13, %c0_32] : memref<208x128xbf16, #tpu.memory_space<vmem>>, vector<1x128xbf16>
    tpu.vector_store %arg10[%c13, %c0_32], %78 {strides = array<i32>} : memref<208x128xbf16, #tpu.memory_space<vmem>>, vector<1x128xbf16>,
    %80 = arith.truncf %60 : vector<18x128xf32> to vector<18x128xbf16>
    %c14 = arith.constant 14 : index
    %c0_33 = arith.constant 0 : index
    %81 = vector.load %arg10[%c14, %c0_33] : memref<208x128xbf16, #tpu.memory_space<vmem>>, vector<18x128xbf16>
    tpu.vector_store %arg10[%c14, %c0_33], %80 {strides = array<i32>} : memref<208x128xbf16, #tpu.memory_space<vmem>>, vector<18x128xbf16>,
    %82 = arith.truncf %37 : vector<144x128xf32> to vector<144x128xbf16>
    %c32 = arith.constant 32 : index
    %c0_34 = arith.constant 0 : index
    %83 = vector.load %arg10[%c32, %c0_34] : memref<208x128xbf16, #tpu.memory_space<vmem>>, vector<144x128xbf16>
    tpu.vector_store %arg10[%c32, %c0_34], %82 {strides = array<i32>} : memref<208x128xbf16, #tpu.memory_space<vmem>>, vector<144x128xbf16>,
    %84 = arith.truncf %77 : vector<18x128xf32> to vector<18x128xbf16>
    %c176 = arith.constant 176 : index
    %c0_35 = arith.constant 0 : index
    %85 = vector.load %arg10[%c176, %c0_35] : memref<208x128xbf16, #tpu.memory_space<vmem>>, vector<18x128xbf16>
    tpu.vector_store %arg10[%c176, %c0_35], %84 {strides = array<i32>} : memref<208x128xbf16, #tpu.memory_space<vmem>>, vector<18x128xbf16>,
    %c194 = arith.constant 194 : index
    %c0_36 = arith.constant 0 : index
    %86 = vector.load %arg10[%c194, %c0_36] : memref<208x128xbf16, #tpu.memory_space<vmem>>, vector<1x128xbf16>
    tpu.vector_store %arg10[%c194, %c0_36], %78 {strides = array<i32>} : memref<208x128xbf16, #tpu.memory_space<vmem>>, vector<1x128xbf16>,
    %c13_37 = arith.constant 13 : index
    %c0_38 = arith.constant 0 : index
    %87 = vector.load %arg10[%c13_37, %c0_38] : memref<208x128xbf16, #tpu.memory_space<vmem>>, vector<144x128xbf16>
    %c0_39 = arith.constant 0 : index
    %c0_40 = arith.constant 0 : index
    %c0_41 = arith.constant 0 : index
    %88 = vector.load %arg7[%c0_39, %c0_40, %c0_41] : memref<9x128x128xbf16, #tpu.memory_space<vmem>>, vector<1x128x128xbf16>
    %89 = vector.shape_cast %88 : vector<1x128x128xbf16> to vector<128x128xbf16>
    %cst_42 = arith.constant dense<0.000000e+00> : vector<144x128xf32>
    %90 = tpu.matmul %87, %89, %cst_42 {dimension_numbers = #tpu.dot_dimension_numbers<[1], [0], [0], [1], [0, 0, 1, 1], [], []>} : vector<144x128xbf16>, vector<128x128xbf16>, vector<144x128xf32> -> vector<144x128xf32>
    %c14_43 = arith.constant 14 : index
    %c0_44 = arith.constant 0 : index
    %91 = vector.load %arg10[%c14_43, %c0_44] : memref<208x128xbf16, #tpu.memory_space<vmem>>, vector<144x128xbf16>
    %c1 = arith.constant 1 : index
    %c0_45 = arith.constant 0 : index
    %c0_46 = arith.constant 0 : index
    %92 = vector.load %arg7[%c1, %c0_45, %c0_46] : memref<9x128x128xbf16, #tpu.memory_space<vmem>>, vector<1x128x128xbf16>
    %93 = vector.shape_cast %92 : vector<1x128x128xbf16> to vector<128x128xbf16>
    %cst_47 = arith.constant dense<0.000000e+00> : vector<144x128xf32>
    %94 = tpu.matmul %91, %93, %cst_47 {dimension_numbers = #tpu.dot_dimension_numbers<[1], [0], [0], [1], [0, 0, 1, 1], [], []>} : vector<144x128xbf16>, vector<128x128xbf16>, vector<144x128xf32> -> vector<144x128xf32>
    %95 = arith.addf %90, %94 : vector<144x128xf32>
    %c15 = arith.constant 15 : index
    %c0_48 = arith.constant 0 : index
    %96 = vector.load %arg10[%c15, %c0_48] : memref<208x128xbf16, #tpu.memory_space<vmem>>, vector<144x128xbf16>
    %c2 = arith.constant 2 : index
    %c0_49 = arith.constant 0 : index
    %c0_50 = arith.constant 0 : index
    %97 = vector.load %arg7[%c2, %c0_49, %c0_50] : memref<9x128x128xbf16, #tpu.memory_space<vmem>>, vector<1x128x128xbf16>
    %98 = vector.shape_cast %97 : vector<1x128x128xbf16> to vector<128x128xbf16>
    %cst_51 = arith.constant dense<0.000000e+00> : vector<144x128xf32>
    %99 = tpu.matmul %96, %98, %cst_51 {dimension_numbers = #tpu.dot_dimension_numbers<[1], [0], [0], [1], [0, 0, 1, 1], [], []>} : vector<144x128xbf16>, vector<128x128xbf16>, vector<144x128xf32> -> vector<144x128xf32>
    %100 = arith.addf %95, %99 : vector<144x128xf32>
    %c31 = arith.constant 31 : index
    %c0_52 = arith.constant 0 : index
    %101 = vector.load %arg10[%c31, %c0_52] : memref<208x128xbf16, #tpu.memory_space<vmem>>, vector<144x128xbf16>
    %c3 = arith.constant 3 : index
    %c0_53 = arith.constant 0 : index
    %c0_54 = arith.constant 0 : index
    %102 = vector.load %arg7[%c3, %c0_53, %c0_54] : memref<9x128x128xbf16, #tpu.memory_space<vmem>>, vector<1x128x128xbf16>
    %103 = vector.shape_cast %102 : vector<1x128x128xbf16> to vector<128x128xbf16>
    %cst_55 = arith.constant dense<0.000000e+00> : vector<144x128xf32>
    %104 = tpu.matmul %101, %103, %cst_55 {dimension_numbers = #tpu.dot_dimension_numbers<[1], [0], [0], [1], [0, 0, 1, 1], [], []>} : vector<144x128xbf16>, vector<128x128xbf16>, vector<144x128xf32> -> vector<144x128xf32>
    %105 = arith.addf %100, %104 : vector<144x128xf32>
    %c32_56 = arith.constant 32 : index
    %c0_57 = arith.constant 0 : index
    %106 = vector.load %arg10[%c32_56, %c0_57] : memref<208x128xbf16, #tpu.memory_space<vmem>>, vector<144x128xbf16>
    %c4 = arith.constant 4 : index
    %c0_58 = arith.constant 0 : index
    %c0_59 = arith.constant 0 : index
    %107 = vector.load %arg7[%c4, %c0_58, %c0_59] : memref<9x128x128xbf16, #tpu.memory_space<vmem>>, vector<1x128x128xbf16>
    %108 = vector.shape_cast %107 : vector<1x128x128xbf16> to vector<128x128xbf16>
    %cst_60 = arith.constant dense<0.000000e+00> : vector<144x128xf32>
    %109 = tpu.matmul %106, %108, %cst_60 {dimension_numbers = #tpu.dot_dimension_numbers<[1], [0], [0], [1], [0, 0, 1, 1], [], []>} : vector<144x128xbf16>, vector<128x128xbf16>, vector<144x128xf32> -> vector<144x128xf32>
    %110 = arith.addf %105, %109 : vector<144x128xf32>
    %c33 = arith.constant 33 : index
    %c0_61 = arith.constant 0 : index
    %111 = vector.load %arg10[%c33, %c0_61] : memref<208x128xbf16, #tpu.memory_space<vmem>>, vector<144x128xbf16>
    %c5 = arith.constant 5 : index
    %c0_62 = arith.constant 0 : index
    %c0_63 = arith.constant 0 : index
    %112 = vector.load %arg7[%c5, %c0_62, %c0_63] : memref<9x128x128xbf16, #tpu.memory_space<vmem>>, vector<1x128x128xbf16>
    %113 = vector.shape_cast %112 : vector<1x128x128xbf16> to vector<128x128xbf16>
    %cst_64 = arith.constant dense<0.000000e+00> : vector<144x128xf32>
    %114 = tpu.matmul %111, %113, %cst_64 {dimension_numbers = #tpu.dot_dimension_numbers<[1], [0], [0], [1], [0, 0, 1, 1], [], []>} : vector<144x128xbf16>, vector<128x128xbf16>, vector<144x128xf32> -> vector<144x128xf32>
    %115 = arith.addf %110, %114 : vector<144x128xf32>
    %c49 = arith.constant 49 : index
    %c0_65 = arith.constant 0 : index
    %116 = vector.load %arg10[%c49, %c0_65] : memref<208x128xbf16, #tpu.memory_space<vmem>>, vector<144x128xbf16>
    %c6 = arith.constant 6 : index
    %c0_66 = arith.constant 0 : index
    %c0_67 = arith.constant 0 : index
    %117 = vector.load %arg7[%c6, %c0_66, %c0_67] : memref<9x128x128xbf16, #tpu.memory_space<vmem>>, vector<1x128x128xbf16>
    %118 = vector.shape_cast %117 : vector<1x128x128xbf16> to vector<128x128xbf16>
    %cst_68 = arith.constant dense<0.000000e+00> : vector<144x128xf32>
    %119 = tpu.matmul %116, %118, %cst_68 {dimension_numbers = #tpu.dot_dimension_numbers<[1], [0], [0], [1], [0, 0, 1, 1], [], []>} : vector<144x128xbf16>, vector<128x128xbf16>, vector<144x128xf32> -> vector<144x128xf32>
    %120 = arith.addf %115, %119 : vector<144x128xf32>
    %c50 = arith.constant 50 : index
    %c0_69 = arith.constant 0 : index
    %121 = vector.load %arg10[%c50, %c0_69] : memref<208x128xbf16, #tpu.memory_space<vmem>>, vector<144x128xbf16>
    %c7 = arith.constant 7 : index
    %c0_70 = arith.constant 0 : index
    %c0_71 = arith.constant 0 : index
    %122 = vector.load %arg7[%c7, %c0_70, %c0_71] : memref<9x128x128xbf16, #tpu.memory_space<vmem>>, vector<1x128x128xbf16>
    %123 = vector.shape_cast %122 : vector<1x128x128xbf16> to vector<128x128xbf16>
    %cst_72 = arith.constant dense<0.000000e+00> : vector<144x128xf32>
    %124 = tpu.matmul %121, %123, %cst_72 {dimension_numbers = #tpu.dot_dimension_numbers<[1], [0], [0], [1], [0, 0, 1, 1], [], []>} : vector<144x128xbf16>, vector<128x128xbf16>, vector<144x128xf32> -> vector<144x128xf32>
    %125 = arith.addf %120, %124 : vector<144x128xf32>
    %c51 = arith.constant 51 : index
    %c0_73 = arith.constant 0 : index
    %126 = vector.load %arg10[%c51, %c0_73] : memref<208x128xbf16, #tpu.memory_space<vmem>>, vector<144x128xbf16>
    %c8 = arith.constant 8 : index
    %c0_74 = arith.constant 0 : index
    %c0_75 = arith.constant 0 : index
    %127 = vector.load %arg7[%c8, %c0_74, %c0_75] : memref<9x128x128xbf16, #tpu.memory_space<vmem>>, vector<1x128x128xbf16>
    %128 = vector.shape_cast %127 : vector<1x128x128xbf16> to vector<128x128xbf16>
    %cst_76 = arith.constant dense<0.000000e+00> : vector<144x128xf32>
    %129 = tpu.matmul %126, %128, %cst_76 {dimension_numbers = #tpu.dot_dimension_numbers<[1], [0], [0], [1], [0, 0, 1, 1], [], []>} : vector<144x128xbf16>, vector<128x128xbf16>, vector<144x128xf32> -> vector<144x128xf32>
    %130 = arith.addf %125, %129 : vector<144x128xf32>
    %c0_77 = arith.constant 0 : index
    %c0_78 = arith.constant 0 : index
    %131 = vector.load %arg8[%c0_77, %c0_78] : memref<1x128xf32, #tpu.memory_space<vmem>>, vector<1x128xf32>
    %132 = vector.broadcast %131 : vector<1x128xf32> to vector<144x128xf32>
    %133 = arith.addf %130, %132 : vector<144x128xf32>
    %cst_79 = arith.constant 0.000000e+00 : f32
    %134 = vector.broadcast %cst_79 : f32 to vector<144x128xf32>
    %135 = arith.cmpf ogt, %133, %134 : vector<144x128xf32>
    %cst_80 = arith.constant 1.000000e-01 : f32
    %136 = vector.broadcast %cst_80 : f32 to vector<144x128xf32>
    %137 = arith.mulf %136, %133 : vector<144x128xf32>
    %138 = arith.select %135, %133, %137 : vector<144x128xi1>, vector<144x128xf32>
    %c0_81 = arith.constant 0 : index
    %c0_82 = arith.constant 0 : index
    %c0_83 = arith.constant 0 : index
    %139 = vector.load %arg2[%c0_81, %c0_82, %c0_83] : memref<1x144x128xbf16, #tpu.memory_space<vmem>>, vector<1x144x128xbf16>
    %140 = vector.shape_cast %139 : vector<1x144x128xbf16> to vector<144x128xbf16>
    %141 = arith.extf %140 : vector<144x128xbf16> to vector<144x128xf32>
    %142 = arith.addf %138, %141 : vector<144x128xf32>
    %143 = arith.truncf %142 : vector<144x128xf32> to vector<144x128xbf16>
    %c0_84 = arith.constant 0 : index
    %c0_85 = arith.constant 0 : index
    %c0_86 = arith.constant 0 : index
    %144 = vector.load %arg9[%c0_84, %c0_85, %c0_86] : memref<1x144x128xbf16, #tpu.memory_space<vmem>>, vector<1x144x128xbf16>
    %145 = vector.shape_cast %144 : vector<1x144x128xbf16> to vector<144x128xbf16>
    %146 = vector.shape_cast %143 : vector<144x128xbf16> to vector<1x144x128xbf16>
    tpu.vector_store %arg9[%c0_84, %c0_85, %c0_86], %146 {strides = array<i32>} : memref<1x144x128xbf16, #tpu.memory_space<vmem>>, vector<1x144x128xbf16>,
    return
  }
  func.func @transform_0(%arg0: i32, %arg1: i32) -> (i32, i32, i32) {
    %c0_i32 = arith.constant 0 : i32
    %c0_i32_0 = arith.constant 0 : i32
    return %arg0, %arg1, %c0_i32 : i32, i32, i32
  }
  func.func @transform_1(%arg0: i32, %arg1: i32) -> (i32, i32, i32) {
    %c2_i32 = arith.constant 2 : i32
    %0 = arith.muli %arg0, %c2_i32 : i32
    %1 = arith.addi %0, %arg1 : i32
    %c0_i32 = arith.constant 0 : i32
    %c0_i32_0 = arith.constant 0 : i32
    %c0_i32_1 = arith.constant 0 : i32
    return %1, %c0_i32, %c0_i32_0 : i32, i32, i32
  }
  func.func @transform_2(%arg0: i32, %arg1: i32) -> (i32, i32, i32) {
    %c2_i32 = arith.constant 2 : i32
    %0 = arith.muli %arg0, %c2_i32 : i32
    %1 = arith.addi %0, %arg1 : i32
    %c0_i32 = arith.constant 0 : i32
    %c0_i32_0 = arith.constant 0 : i32
    %c0_i32_1 = arith.constant 0 : i32
    return %1, %c0_i32, %c0_i32_0 : i32, i32, i32
  }
  func.func @transform_3(%arg0: i32, %arg1: i32) -> (i32, i32) {
    %c0_i32 = arith.constant 0 : i32
    %c0_i32_0 = arith.constant 0 : i32
    %c0_i32_1 = arith.constant 0 : i32
    return %c0_i32, %c0_i32_0 : i32, i32
  }
  func.func @transform_4(%arg0: i32, %arg1: i32) -> (i32, i32) {
    %c0_i32 = arith.constant 0 : i32
    %c0_i32_0 = arith.constant 0 : i32
    %c0_i32_1 = arith.constant 0 : i32
    return %c0_i32, %c0_i32_0 : i32, i32
  }
  func.func @transform_5(%arg0: i32, %arg1: i32) -> (i32, i32, i32) {
    %c0_i32 = arith.constant 0 : i32
    %c0_i32_0 = arith.constant 0 : i32
    %c0_i32_1 = arith.constant 0 : i32
    %c0_i32_2 = arith.constant 0 : i32
    return %c0_i32, %c0_i32_0, %c0_i32_1 : i32, i32, i32
  }
  func.func @transform_6(%arg0: i32, %arg1: i32) -> (i32, i32) {
    %c0_i32 = arith.constant 0 : i32
    %c0_i32_0 = arith.constant 0 : i32
    %c0_i32_1 = arith.constant 0 : i32
    return %c0_i32, %c0_i32_0 : i32, i32
  }
  func.func @transform_7(%arg0: i32, %arg1: i32) -> (i32, i32, i32) {
    %c0_i32 = arith.constant 0 : i32
    %c0_i32_0 = arith.constant 0 : i32
    return %arg0, %arg1, %c0_i32 : i32, i32, i32
  }
}

</mosaic_0001>

<bundles_post_ra>
// kernel: tpu_custom_call.1
= control target key start
LH: loop header
LB: loop body
LE: loop exit
PB: predicated region body
PF: predicated region fallthrough
CT: control target
= control target key end

     0   :  { %s7926_s0 = inlined_call_operand.hbm [shape: bf16[2,288,128], index: 0, kind: input, shape index: {}]   ;;  %s7927_s1 = inlined_call_operand.hbm [shape: bf16[4,18,128], index: 1, kind: input, shape index: {}]   ;;  %s7928_s2 = inlined_call_operand.hbm [shape: bf16[4,18,128], index: 2, kind: input, shape index: {}]   ;;  %s7929_s3 = inlined_call_operand.hbm [shape: bf16[128,128], index: 3, kind: input, shape index: {}]   ;;  %s7930_s4 = inlined_call_operand.hbm [shape: f32[1,128], index: 4, kind: input, shape index: {}]   ;;  %s7931_s5 = inlined_call_operand.hbm [shape: bf16[9,128,128], index: 5, kind: input, shape index: {}]   ;;  %s7932_s6 = inlined_call_operand.hbm [shape: f32[1,128], index: 6, kind: input, shape index: {}]   ;;  %s7933_s7 = inlined_call_operand.hbm [shape: bf16[2,288,128], index: 7, kind: output, shape index: {}]  }
   0x1   :  { %7991 = sst [smem:[#allocation54_spill]] %s7926_s0 }
   0x2   :  { %7992 = sst [smem:[#allocation55_spill]] %s7927_s1 }
   0x3   :  { %7993 = sst [smem:[#allocation56_spill]] %s7929_s3 }
   0x4   :  { %7994 = sst [smem:[#allocation57_spill]] %s7930_s4 }
   0x5   :  { %7995 = sst [smem:[#allocation58_spill]] %s7931_s5 }
   0x6   :  { %7996 = sst [smem:[#allocation59_spill]] %s7932_s6 }
   0x7   :  { %7997 = sst [smem:[#allocation60_spill]] %s7933_s7 }
   0x8   :  { %12 = vsyncpa [#allocation4], 0 }
   0x9   :  { %14 = vsyncpa [#allocation4 + $0x1], 0 }
   0xa   :  { %15 = vsyncpa [#allocation7], 0 }
   0xb   :  { %17 = vsyncpa [#allocation7 + $0x1], 0 }
   0xc   :  { %18 = vsyncpa [#allocation10], 0 }
   0xd   :  { %19 = vsyncpa [#allocation13], 0 }
   0xe   :  { %20 = vsyncpa [#allocation5], 0 }
   0xf   :  { %22 = vsyncpa [#allocation5 + $0x1], 0  ;;  %s5759_s24 = smov 0   ;;  %s5761_s25 = smov 0  }
  0x10   :  { %s5763_s26 = smov 0   ;;  %s5765_s27 = smov 0  }
  0x11   :  { %s5767_s28 = smov 0   ;;  %s5769_s29 = smov 0  }
  0x12   :  { %s5771_s30 = smov 0   ;;  %s5773_s8 = smov 0  }
  0x13   :  { %s5775_s9 = smov 0   ;;  %s5777_s10 = smov 0  }
  0x14   :  { %s5779_s11 = smov 0  }
  0x15 LB: > { %7998 = sst [smem:[#allocation21_spill]] %s5667_s25  ;;  %s5815_s12 = sadd.s32 4294967295, %s5703_s11   ;;  %s5703_s11 = sphi %s5779_s11, %s28_s11   ;;  %s5699_s10 = sphi %s5777_s10, %s8214_s10   ;;  %s5695_s9 = sphi %s5775_s9, %s8213_s9   ;;  %s5691_s8 = sphi %s5773_s8, %s8212_s8   ;;  %s5687_s30 = sphi %s5771_s30, %s8211_s30   ;;  %s5683_s29 = sphi %s5769_s29, %s8206_s29   ;;  %s5679_s28 = sphi %s5767_s28, %s8210_s28   ;;  %s5675_s27 = sphi %s5765_s27, %s8209_s27   ;;  %s5671_s26 = sphi %s5763_s26, %s8204_s26   ;;  %s5667_s25 = sphi %s5761_s25, %s8203_s25   ;;  %s5663_s24 = sphi %s5759_s24, %s8202_s24  }
  0x16   : > { %7999 = sst [smem:[#allocation22_spill]] %s5671_s26  ;;  %p4064_p0 = scmp.ge.s32.totalorder %s5703_s11, 1 }
  0x17   : > { %8000 = sst [smem:[#allocation23_spill]] %s5675_s27  ;;  %p7935_p1 = scmp.eq.s32.totalorder %s5815_s12, 0 }
  0x18   : > { %8001 = sst [smem:[#allocation24_spill]] %s5683_s29  ;;  %p245_p3 = scmp.lt.s32.totalorder %s5703_s11, 5 }
  0x19   : > { %8002 = sst [smem:[#allocation25_spill]] %s5687_s30  ;;  %s5705_s14 = smov [#allocation9]  }
  0x1a   : > { %8003 = sst [smem:[#allocation26_spill]] %s5691_s8  ;;  %p5821_p4 = pnand %p4064_p0, %p245_p3 }
  0x1b   : > { %s257_s15 = sshll.u32 %s5705_s14, 4  ;;  %s5706_s17 = smov [#allocation12]   ;;  %s258_s15 = int_to_ptr.vmem [resolvable:$true] %s257_s15 }
  0x1c   : > { %s8004_s13 = scalar_select %p5821_p4, 1, 0 }
  0x1d   : > { %p5130_p5 = pneg %p5821_p4  ;;  %s281_s18 = sshll.u32 %s5706_s17, 4  ;;  %s5833_s18 = int_to_ptr.vmem [resolvable:$true] %s281_s18 }
  0x1e   : > { %8005 = sst [smem:[#allocation27_spill]] %s8004_s13  ;;  %s8007_s3 = sld [smem:[#allocation56_spill]] }
  0x1f   : > { %p5829_p6 = pnand %p5130_p5, %p7935_p1 }
  0x21   : > { %s8006_s16 = scalar_select %p5829_p6, 1, 0 }
  0x22   : > { %p5843_p8 = pneg %p5829_p6 }
  0x24   : > { %s5367_s21 = scalar_lea.hbm %s8007_s3, 1024 }
  0x25   : > { %p5368_p7 = scmp.ne.s32.totalorder %s8007_s3, %s5367_s21  ;;  %p5374_p11 = scmp.lt.u32.totalorder %s5367_s21, %s8007_s3 }
  0x27   : > { %p5370_p9 = pnand %p5843_p8, %p5368_p7 }
  0x29   : > { %p5371_p10 = pneg %p5370_p9 }
  0x2b   : > { %p5376_p12 = pnand %p5374_p11, %p5371_p10 }
  0x2d   : > { %5379 = shalt.err (!%p5376_p12)
}
  0x2e   : > { %s5380_s19 = scalar_lea.vmem %s258_s15, 1024  ;;  %p5388_p5 = scmp.lt.s32.totalorder %s258_s15, %s258_s15 }
  0x2f   : > { %p5381_p13 = scmp.ne.s32.totalorder %s258_s15, %s5380_s19  ;;  %p5389_p2 = scmp.lt.s32.totalorder %s5380_s19, %s5380_s19 }
  0x31   : > { %p5383_p0 = pnand %p5381_p13, %p5843_p8  ;;  %p5390_p1 = por %p5389_p2, %p5388_p5 }
  0x33   : > { %p5384_p3 = pneg %p5383_p0 }
  0x35   : > { %p5391_p4 = pnand %p5390_p1, %p5384_p3 }
  0x37   : > { %5394 = shalt.err (!%p5391_p4)
}
  0x38   : > { %s7940_s20 = smov 64   ;;  %s7942_s22 = smov 4  }
  0x39   : > { %5133 = dma.hbm_to_vmem [thread:$0]  (!%p5829_p6), %s8007_s3, 1024, %s258_s15, [#allocation10], %s7940_s20, %s7940_s20, %s7942_s22  }
  0x3a   : > { %s8009_s5 = sld [smem:[#allocation58_spill]] }
  0x40   : > { %s5395_s8 = scalar_lea.hbm %s8009_s5, 9216 }
  0x41   : > { %p5396_p1 = scmp.ne.s32.totalorder %s8009_s5, %s5395_s8  ;;  %p5402_p7 = scmp.lt.u32.totalorder %s5395_s8, %s8009_s5 }
  0x43   : > { %p5398_p2 = pnand %p5396_p1, %p5843_p8 }
  0x45   : > { %p5399_p4 = pneg %p5398_p2 }
  0x47   : > { %p5404_p9 = pnand %p5402_p7, %p5399_p4 }
  0x49   : > { %5407 = shalt.err (!%p5404_p9)
}
  0x4a   : > { %s5408_s15 = scalar_lea.vmem %s5833_s18, 9216  ;;  %p5416_p13 = scmp.lt.s32.totalorder %s5833_s18, %s5833_s18 }
  0x4b   : > { %p5409_p10 = scmp.ne.s32.totalorder %s5833_s18, %s5408_s15  ;;  %p5417_p0 = scmp.lt.s32.totalorder %s5408_s15, %s5408_s15 }
  0x4d   : > { %p5411_p11 = pnand %p5409_p10, %p5843_p8  ;;  %p5418_p3 = por %p5417_p0, %p5416_p13 }
  0x4f   : > { %p5412_p12 = pneg %p5411_p11 }
  0x51   : > { %p5419_p5 = pnand %p5418_p3, %p5412_p12 }
  0x53   : > { %5422 = shalt.err (!%p5419_p5)
}
  0x54   : > { %5139 = dma.hbm_to_vmem [thread:$0]  (!%p5829_p6), %s8009_s5, 9216, %s5833_s18, [#allocation13], %s7940_s20, %s7940_s20, %s7942_s22  }
  0x55   : > { %s37_s8 = sadd.s32 1, %s5695_s9  ;;  %s40_s13 = sadd.s32 1, %s5699_s10 }
  0x56   : > { %p38_p1 = scmp.ge.s32.totalorder %s37_s8, 2  ;;  %p7949_p2 = scmp.eq.s32.totalorder %s5703_s11, 0 }
  0x57   : > { %s4060_s7 = sshll.u32 %s5699_s10, 1  ;;  %s79_s18 = sadd.s32 1, %s5671_s26 }
  0x58   : > { %s8216_s8 = smov (%p38_p1, %s37_s8), 0  ;;  %s8218_s13 = smov (!%p38_p1, %s40_s13), %s5699_s10 }
  0x59   : > { %8010 = sst [smem:[#allocation28_spill]] %s8216_s8  ;;  %s45_s21 = ssub.s32 %s5695_s9, %s8216_s8 }
  0x5a   : > { %s5898_s23 = sadd.s32 %s5695_s9, %s4060_s7  ;;  %p42_p4 = scmp.ge.s32.totalorder %s8218_s13, 2 }
  0x5b   : > { %p86_p7 = scmp.ne.s32.totalorder %s5671_s26, %s5667_s25  ;;  %p92_p9 = scmp.ne.s32.totalorder %s5667_s25, %s5663_s24 }
  0x5c   : > { %s8220_s13 = smov (%p42_p4, %s8218_s13), 0  ;;  %p8013_p11 = scmp.eq.s32.totalorder %s5815_s12, 0 }
  0x5d   : > { %8011 = sst [smem:[#allocation29_spill]] %s8220_s13  ;;  %p5909_p10 = por %p86_p7, %p7949_p2 }
  0x5e   : > { %p5915_p12 = por %p92_p9, %p8013_p11  ;;  %s44_s15 = ssub.s32 %s5699_s10, %s8220_s13 }
  0x5f   : > { %s4061_s24 = sshll.u32 %s8220_s13, 1  ;;  %s5922_s0 = sor.u32 %s45_s21, %s44_s15 }
  0x60   : > { %s8014_s19 = scalar_select %p5915_p12, 1, 0 }
  0x61   : > { %s75_s30 = sadd.s32 %s4061_s24, %s8216_s8  ;;  %p7948_p3 = scmp.lt.s32.totalorder %s5703_s11, 4 }
  0x62   : > { %8015 = sst [smem:[#allocation30_spill]] %s8014_s19  ;;  %s76_s7 = ssub.s32 %s5898_s23, %s75_s30 }
  0x63   : > { %p77_p0 = scmp.eq.s32.totalorder %s76_s7, 0  ;;  %s329_s20 = sand.u32 1, %s5703_s11  }
  0x64   : > { %s331_s22 = sand.u32 1, %s5671_s26   ;;  %s7946_s25 = smul.u32 192, %s5898_s23 }
  0x65   : > { %s5931_s3 = scalar_select %p77_p0, %s5671_s26, %s79_s18  }
  0x66   : > { %s5933_s5 = smul.u32 12, %s331_s22  ;;  %p5940_p5 = pnand %p7948_p3, %p5909_p10 }
  0x67   : > { %8016 = sst [smem:[#allocation31_spill]] %s5931_s3  ;;  %s8019_s1 = sld [smem:[#allocation55_spill]] }
  0x68   : > { %s8017_s13 = scalar_select %p5940_p5, 1, 0 }
  0x69   : > { %s333_s22 = scalar_lea.vmem [#allocation6], %s5933_s5  ;;  %s5954_s17 = scalar_lea.sflag [#allocation7], %s329_s20 }
  0x6a   : > { %8018 = sst [smem:[#allocation32_spill]] %s8017_s13  ;;  %s342_s18 = sshll.u32 %s333_s22, 4  ;;  %s5952_s18 = int_to_ptr.vmem [resolvable:$true] %s342_s18 }
  0x6b   : > { %p7958_p4 = pneg %p5940_p5 }
  0x6d   : > { %s5949_s24 = scalar_lea.hbm %s8019_s1, %s7946_s25  ;;  %s5428_s15 = scalar_lea.hbm %s8019_s1, 768 }
  0x6e   : > { %s5423_s30 = scalar_lea.hbm %s5949_s24, 192  ;;  %p5429_p10 = scmp.lt.u32.totalorder %s5949_s24, %s8019_s1 }
  0x6f   : > { %p5424_p1 = scmp.ne.s32.totalorder %s5949_s24, %s5423_s30  ;;  %p5430_p11 = scmp.lt.u32.totalorder %s5428_s15, %s5423_s30 }
  0x70   : > { %p5432_p3 = scmp.lt.u32.totalorder %s5423_s30, %s5949_s24 }
  0x71   : > { %p5426_p7 = pnand %p7958_p4, %p5424_p1  ;;  %p5431_p0 = por %p5430_p11, %p5429_p10 }
  0x73   : > { %p5427_p9 = pneg %p5426_p7  ;;  %p5433_p2 = por %p5432_p3, %p5431_p0 }
  0x75   : > { %p5434_p13 = pnand %p5433_p2, %p5427_p9 }
  0x77   : > { %5437 = shalt.err (!%p5434_p13)
}
  0x78   : > { %s5438_s20 = scalar_lea.vmem %s5952_s18, 192  ;;  %s5709_s22 = smov [#allocation6]  }
  0x79   : > { %p5439_p1 = scmp.ne.s32.totalorder %s5952_s18, %s5438_s20  ;;  %s5443_s7 = sshll.u32 %s5709_s22, 4  ;;  %s5444_s7 = int_to_ptr.vmem [resolvable:$false] %s5443_s7 }
  0x7a   : > { %s5445_s25 = scalar_lea.vmem %s5444_s7, 384  ;;  %p5446_p6 = scmp.lt.s32.totalorder %s5952_s18, %s5444_s7 }
  0x7b   : > { %p5441_p7 = pnand %p5439_p1, %p7958_p4  ;;  %p5447_p10 = scmp.lt.s32.totalorder %s5445_s25, %s5438_s20 }
  0x7d   : > { %p5442_p12 = pneg %p5441_p7  ;;  %p5448_p11 = por %p5447_p10, %p5446_p6 }
  0x7f   : > { %p5449_p3 = pnand %p5448_p11, %p5442_p12 }
  0x81   : > { %5452 = shalt.err (!%p5449_p3)
}
  0x82   : > { %s8020_s8 = smov 4   ;;  %s8021_s30 = smov 64  }
  0x83   : > { %5149 = dma.hbm_to_vmem [thread:$0]  (!%p5940_p5), %s5949_s24, 192, %s5952_s18, %s5954_s17, %s8021_s30, %s8021_s30, %s8020_s8  }
  0x84   : > { %s5710_s21 = smov [#allocation11]   ;;  %s5711_s22 = smov [#allocation14]  }
  0x85   : > { %s271_s15 = sshll.u32 %s5710_s21, 4  ;;  %s295_s1 = sshll.u32 %s5711_s22, 4  ;;  %s272_s15 = int_to_ptr.vmem [resolvable:$true] %s271_s15  ;;  %s296_s1 = int_to_ptr.vmem [resolvable:$true] %s295_s1 }
  0x86   : > { %s8022_s4 = sld [smem:[#allocation57_spill]] }
  0x8c   : > { %s5453_s25 = scalar_lea.hbm %s8022_s4, 16 }
  0x8d   : > { %p5454_p6 = scmp.ne.s32.totalorder %s8022_s4, %s5453_s25  ;;  %p5460_p13 = scmp.lt.u32.totalorder %s5453_s25, %s8022_s4 }
  0x8f   : > { %p5456_p2 = pnand %p5454_p6, %p5843_p8 }
  0x91   : > { %p5457_p12 = pneg %p5456_p2 }
  0x93   : > { %p5462_p9 = pnand %p5460_p13, %p5457_p12 }
  0x95   : > { %5465 = shalt.err (!%p5462_p9)
}
  0x96   : > { %s5466_s24 = scalar_lea.vmem %s272_s15, 16  ;;  %s5473_s18 = scalar_lea.vmem %s272_s15, 32 }
  0x97   : > { %p5467_p0 = scmp.ne.s32.totalorder %s272_s15, %s5466_s24  ;;  %p5474_p10 = scmp.lt.s32.totalorder %s272_s15, %s272_s15 }
  0x98   : > { %p5475_p11 = scmp.lt.s32.totalorder %s5473_s18, %s5466_s24 }
  0x99   : > { %p5469_p1 = pnand %p5467_p0, %p5843_p8 }
  0x9a   : > { %p5476_p3 = por %p5475_p11, %p5474_p10 }
  0x9b   : > { %p5470_p7 = pneg %p5469_p1 }
  0x9d   : > { %p5477_p4 = pnand %p5476_p3, %p5470_p7 }
  0x9f   : > { %5480 = shalt.err (!%p5477_p4)
}
  0xa0   : > { %p8023_p6 = scmp.ne.s32.totalorder %s8006_s16, 0  ;;  %s8024_s6 = sld [smem:[#allocation59_spill]] }
  0xa2   : > { %5136 = dma.hbm_to_vmem [thread:$0]  (!%p8023_p6), %s8022_s4, 16, %s272_s15, [#allocation10]  }
  0xa6   : > { %s5481_s21 = scalar_lea.hbm %s8024_s6, 16 }
  0xa7   : > { %p5482_p2 = scmp.ne.s32.totalorder %s8024_s6, %s5481_s21  ;;  %p5488_p4 = scmp.lt.u32.totalorder %s5481_s21, %s8024_s6 }
  0xa9   : > { %p5484_p12 = pnand %p5482_p2, %p5843_p8 }
  0xab   : > { %p5485_p13 = pneg %p5484_p12 }
  0xad   : > { %p5490_p9 = pnand %p5488_p4, %p5485_p13 }
  0xaf   : > { %5493 = shalt.err (!%p5490_p9)
}
  0xb0   : > { %s5494_s24 = scalar_lea.vmem %s296_s1, 16  ;;  %s5501_s15 = scalar_lea.vmem %s296_s1, 32 }
  0xb1   : > { %p5495_p0 = scmp.ne.s32.totalorder %s296_s1, %s5494_s24  ;;  %p5502_p10 = scmp.lt.s32.totalorder %s296_s1, %s296_s1 }
  0xb2   : > { %p5503_p11 = scmp.lt.s32.totalorder %s5501_s15, %s5494_s24 }
  0xb3   : > { %p5497_p1 = pnand %p5495_p0, %p5843_p8 }
  0xb4   : > { %p5504_p3 = por %p5503_p11, %p5502_p10 }
  0xb5   : > { %p5498_p7 = pneg %p5497_p1 }
  0xb7   : > { %p5505_p5 = pnand %p5504_p3, %p5498_p7 }
  0xb9   : > { %5508 = shalt.err (!%p5505_p5)
}
  0xba   : > { %5142 = dma.hbm_to_vmem [thread:$0]  (!%p8023_p6), %s8024_s6, 16, %s296_s1, [#allocation13]  }
  0xbb   : > { %s4059_s16 = sadd.s32 4294967294, %s5703_s11   ;;  %s49_s14 = sadd.s32 1, %s5683_s29 }
  0xbc   : > { %p56_p8 = scmp.ne.s32.totalorder %s5683_s29, %s5679_s28  ;;  %p8025_p5 = scmp.eq.s32.totalorder %s5922_s0, 0 }
  0xbd   : > { %p8027_p2 = scmp.eq.s32.totalorder %s5703_s11, 0  ;;  %p62_p13 = scmp.ne.s32.totalorder %s5679_s28, %s5675_s27 }
  0xbe   : > { %s6028_s26 = scalar_select %p8025_p5, %s5683_s29, %s49_s14  }
  0xbf   : > { %p58_p12 = por %p8027_p2, %p56_p8  ;;  %p8028_p4 = scmp.eq.s32.totalorder %s5815_s12, 3 }
  0xc0   : > { %8026 = sst [smem:[#allocation33_spill]] %s6028_s26  ;;  %p238_p0 = scmp.eq.s32.totalorder %s4059_s16, 3 }
  0xc1   : > { %p6036_p9 = por %p8028_p4, %p56_p8  ;;  %p8030_p1 = scmp.eq.s32.totalorder %s5815_s12, 0 }
  0xc2   : > { %s306_s19 = sand.u32 1, %s5683_s29   ;;  %p6047_p6 = por %p238_p0, %p62_p13 }
  0xc3   : > { %s8029_s13 = scalar_select %p6036_p9, 1, 0 }
  0xc4   : > { %p6042_p7 = por %p8030_p1, %p62_p13  ;;  %s5061_s21 = smul.u32 72, %s306_s19 }
  0xc5   : > { %s8032_s0 = scalar_select %p6047_p6, 1, 0 }
  0xc6   : > { %p8034_p10 = scmp.lt.s32.totalorder %s5703_s11, 4  ;;  %s311_s7 = smul.u32 18, %s5695_s9 }
  0xc7   : > { %8033 = sst [smem:[#allocation34_spill]] %s8032_s0  ;;  %s5062_s20 = smul.u32 36, %s5699_s10 }
  0xc8   : > { %p6053_p11 = pnand %p8034_p10, %p58_p12  ;;  %s310_s25 = scalar_lea.vmem [#allocation3], %s5061_s21 }
  0xc9   : > { %s319_s24 = sshll.u32 %s310_s25, 4  ;;  %s316_s15 = sadd.s32 %s5062_s20, %s311_s7  ;;  %s6059_s24 = int_to_ptr.vmem [resolvable:$true] %s319_s24 }
  0xca   : > { %s4070_s18 = sshll.u32 %s316_s15, 6  ;;  %s8036_s3 = smul.u32 192, %s5898_s23 }
  0xcb   : > { %s8037_s29 = sld [smem:[#allocation54_spill]]  ;;  %s356_s21 = scalar_lea.vmem [#allocation8], %s5933_s5 }
  0xcc   : > { %s6066_s4 = scalar_lea.hbm %s7928_s2, %s8036_s3  ;;  %s6074_s7 = sshll.u32 %s356_s21, 4  ;;  %s6108_s7 = int_to_ptr.vmem [resolvable:$true] %s6074_s7 }
  0xcd   : > { %s6076_s20 = scalar_lea.sflag [#allocation4], %s306_s19  ;;  %p5511_p8 = pneg %p6053_p11 }
  0xd1   : > { %s8038_s0 = smov %s8037_s29  ;;  %s6071_s27 = scalar_lea.hbm %s8037_s29, %s4070_s18 }
  0xd2   : > { %s5509_s23 = scalar_lea.hbm %s6071_s27, 1152  ;;  %s5514_s26 = scalar_lea.hbm %s8038_s0, 4608 }
  0xd3   : > { %p5510_p3 = scmp.ne.s32.totalorder %s6071_s27, %s5509_s23  ;;  %p5515_p12 = scmp.lt.u32.totalorder %s6071_s27, %s8038_s0 }
  0xd4   : > { %p5516_p13 = scmp.lt.u32.totalorder %s5514_s26, %s5509_s23  ;;  %p5518_p0 = scmp.lt.u32.totalorder %s5509_s23, %s6071_s27 }
  0xd5   : > { %p5512_p5 = pnand %p5511_p8, %p5510_p3 }
  0xd6   : > { %p5517_p4 = por %p5516_p13, %p5515_p12 }
  0xd7   : > { %p5513_p2 = pneg %p5512_p5 }
  0xd8   : > { %p5519_p1 = por %p5518_p0, %p5517_p4 }
  0xda   : > { %p5520_p10 = pnand %p5519_p1, %p5513_p2 }
  0xdc   : > { %5523 = shalt.err (!%p5520_p10)
}
  0xdd   : > { %s5524_s5 = scalar_lea.vmem %s6059_s24, 1152  ;;  %s5712_s19 = smov [#allocation3]  }
  0xde   : > { %p5525_p3 = scmp.ne.s32.totalorder %s6059_s24, %s5524_s5  ;;  %s5529_s18 = sshll.u32 %s5712_s19, 4  ;;  %s5530_s18 = int_to_ptr.vmem [resolvable:$false] %s5529_s18 }
  0xdf   : > { %s5531_s3 = scalar_lea.vmem %s5530_s18, 2304  ;;  %p5532_p9 = scmp.lt.s32.totalorder %s6059_s24, %s5530_s18 }
  0xe0   : > { %p5527_p5 = pnand %p5525_p3, %p5511_p8  ;;  %p5533_p12 = scmp.lt.s32.totalorder %s5531_s3, %s5524_s5 }
  0xe2   : > { %p5528_p6 = pneg %p5527_p5  ;;  %p5534_p13 = por %p5533_p12, %p5532_p9 }
  0xe4   : > { %p5535_p4 = pnand %p5534_p13, %p5528_p6 }
  0xe6   : > { %5538 = shalt.err (!%p5535_p4)
}
  0xe7   : > { %s8039_s16 = sld [smem:[#allocation32_spill]]  ;;  %s5539_s14 = scalar_lea.hbm %s6066_s4, 192 }
  0xe8   : > { %5146 = dma.hbm_to_vmem [thread:$0]  (!%p6053_p11), %s6071_s27, 1152, %s6059_s24, %s6076_s20, %s8021_s30, %s8021_s30, %s8020_s8  }
  0xe9   : > { %p5540_p9 = scmp.ne.s32.totalorder %s6066_s4, %s5539_s14  ;;  %s5544_s23 = scalar_lea.hbm %s7928_s2, 768 }
  0xea   : > { %p5545_p1 = scmp.lt.u32.totalorder %s6066_s4, %s7928_s2  ;;  %p5546_p10 = scmp.lt.u32.totalorder %s5544_s23, %s5539_s14 }
  0xeb   : > { %p5548_p5 = scmp.lt.u32.totalorder %s5539_s14, %s6066_s4 }
  0xec   : > { %p5547_p3 = por %p5546_p10, %p5545_p1 }
  0xed   : > { %p8040_p6 = scmp.ne.s32.totalorder %s8039_s16, 0 }
  0xee   : > { %p5549_p11 = por %p5548_p5, %p5547_p3 }
  0xef   : > { %p8041_p8 = pneg %p8040_p6 }
  0xf1   : > { %p5542_p2 = pnand %p5540_p9, %p8041_p8 }
  0xf3   : > { %p5543_p0 = pneg %p5542_p2 }
  0xf5   : > { %p5550_p12 = pnand %p5549_p11, %p5543_p0 }
  0xf7   : > { %5553 = shalt.err (!%p5550_p12)
}
  0xf8   : > { %s5554_s27 = scalar_lea.vmem %s6108_s7, 192  ;;  %p8042_p4 = pmov %p8041_p8 }
  0xf9   : > { %p5555_p13 = scmp.ne.s32.totalorder %s6108_s7, %s5554_s27  ;;  %s5713_s24 = smov [#allocation8]  }
  0xfa   : > { %s5559_s20 = sshll.u32 %s5713_s24, 4  ;;  %s5560_s20 = int_to_ptr.vmem [resolvable:$false] %s5559_s20 }
  0xfb   : > { %p5557_p9 = pnand %p5555_p13, %p8042_p4  ;;  %s5561_s26 = scalar_lea.vmem %s5560_s20, 384 }
  0xfc   : > { %p5562_p2 = scmp.lt.s32.totalorder %s6108_s7, %s5560_s20  ;;  %p5563_p1 = scmp.lt.s32.totalorder %s5561_s26, %s5554_s27 }
  0xfd   : > { %p5558_p8 = pneg %p5557_p9 }
  0xfe   : > { %p5564_p10 = por %p5563_p1, %p5562_p2 }
 0x100   : > { %p5565_p3 = pnand %p5564_p10, %p5558_p8 }
 0x102   : > { %5568 = shalt.err (!%p5565_p3)
}
 0x103   : > { %5152 = dma.hbm_to_vmem [thread:$0]  (!%p8040_p6), %s6066_s4, 192, %s6108_s7, %s5954_s17, %s8021_s30, %s8021_s30, %s8020_s8  }
 0x104   : > { %s8043_s25 = sld [smem:[#allocation27_spill]] }
 0x10a   : > { %p8044_p0 = scmp.ne.s32.totalorder %s8043_s25, 0 }
 0x10c   : > { %377 = sbr.rel (%p8044_p0) target bundleno = 1235 (0x4d3), region = 48 }
 0x113   : > { %s6140_s15 = sand.u32 1, %s5679_s28  }
 0x114   : > { %s5067_s5 = smul.u32 72, %s6140_s15  ;;  %s380_s19 = scalar_lea.sflag [#allocation4], %s6140_s15 }
 0x116   : > { %s6146_s18 = scalar_lea.vmem [#allocation3], %s5067_s5 }
 0x117   : > { %5642 = dma.done.wait (%p6042_p7), %s380_s19, 1152  }
 0x118   : > { %5644 = vsyncadd (%p6042_p7), %s380_s19, 4294966144  ;;  %s8045_s4 = sld [smem:[#allocation21_spill]]  ;;  %s8046_s17 = sld [smem:[#allocation30_spill]] }
 0x119   : > { %s388_s8 = sand.u32 1, %s5815_s12  }
 0x11a   : > { %s389_s3 = scalar_lea.sflag [#allocation7], %s388_s8 }
 0x11e   : > { %s390_s30 = sand.u32 1, %s8045_s4   ;;  %p8047_p6 = scmp.ne.s32.totalorder %s8046_s17, 0 }
 0x11f   : > { %s6154_s7 = smul.u32 12, %s390_s30 }
 0x121   : > { %s392_s16 = scalar_lea.vmem [#allocation6], %s6154_s7 }
 0x122   : > { %5646 = dma.done.wait (%p8047_p6), %s389_s3, 384  }
 0x123   : > { %5648 = vsyncadd (%p8047_p6), %s389_s3, 4294966912  ;;  %s401_s14 = scalar_lea.vmem [#allocation8], %s6154_s7  ;;  %p8048_p5 = scmp.eq.s32.totalorder %s5815_s12, 0 }
 0x125   : > { %5650 = dma.done.wait (%p8048_p5), [#allocation10], 1040   ;;  %p8049_p7 = pmov %p8048_p5 }
 0x126   : > { %p8050_p11 = pmov %p8048_p5 }
 0x127   : > { %5652 = vsyncadd (%p8049_p7), [#allocation10], 4294966256 }
 0x128   : > { %5654 = dma.done.wait (%p8050_p11), [#allocation13], 9232   ;;  %p8051_p12 = pmov %p8048_p5 }
 0x129   : > { %v7972_v0 = vmov 0.0   ;;  %vm7965_vm0 = vmmov 0   ;;  %v5265_v1 = vld [vmem:[#allocation9] sm:$0xff]   ;;  %v5266_v2 = vld [vmem:[#allocation9 + $0x8] sm:$0xff]   ;;  %v5267_v3 = vld [vmem:[#allocation9 + $0x10] sm:$0xff]   ;;  %v767_v29 = vlaneseq  ;;  %vm1363_vm1 = vcmask 1046534  }
 0x12a   : > { %5656 = vsyncadd (%p8051_p12), [#allocation13], 4294958064  ;;  %4501 = vmatprep.subr.bf16.mxu0 %v7972_v0  ;;  %4517 = vmatprep.mubr.msk.bf16.mxu0 %vm7965_vm0, %v7972_v0  ;;  %v5268_v4 = vld [vmem:[#allocation9 + $0x18] sm:$0xff]   ;;  %v5269_v5 = vld [vmem:[#allocation9 + $0x20] sm:$0xff]   ;;  %vm1364_vm2 = vsmask.f32 7962 }
 0x12b   : > { %4502 = vmatpush3.bf16.msra.mxu0 %v5265_v1  ;;  %4573 = vmatprep.subr.bf16.mxu1 %v5265_v1  ;;  %v5281_v6 = vld [vmem:[%s401_s14] sm:$0xff]   ;;  %v5273_v10 = vld [vmem:[%s6146_s18] sm:$0xff]   ;;  %v5282_v11 = vld [vmem:[%s401_s14 + $0x8] ss:$0 sps:$4 sm:$0x11]   ;;  %v6226_v32 = vshrl.u32 %v767_v29, 7 }
 0x12c   : > { %4503 = vmatprep.subr.bf16.mxu0 %v7972_v0  ;;  %4574 = vmatpush3.bf16.msra.mxu1 %v5265_v1  ;;  %v5270_v7 = vld [vmem:[#allocation9 + $0x28] sm:$0xff]   ;;  %v5271_v8 = vld [vmem:[#allocation9 + $0x30] sm:$0xff]   ;;  %v5272_v9 = vld [vmem:[#allocation9 + $0x38] sm:$0xff]   ;;  %s8054_s12 = sld [smem:[#allocation25_spill]]  ;;  %s7809_s21 = scalar_lea.vmem [#allocation15], %s5067_s5 }
 0x12d   : > { %4575 = vmatprep.subr.bf16.mxu1 %v5266_v2  ;;  %4589 = vmatprep.mubr.bf16.mxu1 %v5281_v6  ;;  %v5274_v12 = vld [vmem:[%s6146_s18 + $0x8] sm:$0xff]   ;;  %v5275_v13 = vld [vmem:[%s6146_s18 + $0x10] sm:$0xff]   ;;  %v5276_v14 = vld [vmem:[%s6146_s18 + $0x18] sm:$0xff]   ;;  %v6231_v35 = vmul.u32.u64.low 3817748708, %v6226_v32  ;;  %v6232_v36 = vmul.u32.u64.high 3817748708, %v6226_v32, %v6231_v35  ;;  %v769_v41 = vadd.s32 8, %v6226_v32 }
 0x12e   : > { %v5277_v15 = vld [vmem:[%s6146_s18 + $0x20] sm:$0xff]   ;;  %v5278_v16 = vld [vmem:[%s6146_s18 + $0x28] sm:$0xff]   ;;  %v5279_v17 = vld [vmem:[%s6146_s18 + $0x30] sm:$0xff]   ;;  %v6238_v42 = vadd.s32 16, %v6226_v32  ;;  %v771_v50 = vadd.s32 24, %v6226_v32  ;;  %v772_v51 = vadd.s32 32, %v6226_v32 }
 0x12f   : > { %4504 = vmatpush3.bf16.msra.mxu0 %v5266_v2  ;;  %v5280_v18 = vld [vmem:[%s6146_s18 + $0x38] sm:$0xff]   ;;  %v5283_v19 = vld [vmem:[%s6146_s18 + $0x40] sm:$0xff]   ;;  %vm1365_vm3 = vmand %vm1363_vm1, %vm1364_vm2  ;;  %v792_v45 = vshrl.u32 %v6232_v36, 4  ;;  %v6243_v46 = vmul.u32.u64.low 3817748708, %v769_v41  ;;  %v6244_v47 = vmul.u32.u64.high 3817748708, %v769_v41, %v6243_v46  ;;  %v6253_v52 = vadd.s32 40, %v6226_v32 }
 0x130   : > { %4505 = vmatprep.subr.bf16.mxu0 %v7972_v0  ;;  %4576 = vmatpush3.bf16.msra.mxu1 %v5266_v2  ;;  %v5284_v20 = vld [vmem:[%s392_s16] sm:$0xff]   ;;  %v5285_v21 = vld [vmem:[%s392_s16 + $0x8] ss:$0 sps:$4 sm:$0x11]   ;;  %v6247_v48 = vmul.u32.u64.low 3817748708, %v6238_v42  ;;  %v6248_v49 = vmul.u32.u64.high 3817748708, %v6238_v42, %v6247_v48 }
 0x131   : > { %4577 = vmatprep.subr.bf16.mxu1 %v5267_v3  ;;  %v5286_v22 = vld [vmem:[#allocation12 + $0x40] sm:$0xff]   ;;  %v5287_v23 = vld [vmem:[#allocation12 + $0x48] sm:$0xff]   ;;  %v5289_v25 = vld [vmem:[#allocation12 + $0x50] sm:$0xff]   ;;  %v793_v54 = vmul.u32 18, %v792_v45  ;;  %v774_v55 = vadd.s32 48, %v6226_v32  ;;  %v803_v63 = vshrl.u32 %v6244_v47, 4 }
 0x132   : > { %v5288_v24 = vld [vmem:[#allocation12] sm:$0xff]   ;;  %v5290_v26 = vld [vmem:[#allocation12 + $0x8] sm:$0xff]   ;;  %v5291_v27 = vld [vmem:[#allocation12 + $0x58] sm:$0xff]   ;;  %v6258_v56 = vmul.u32.u64.low 3817748708, %v771_v50  ;;  %v6259_v57 = vmul.u32.u64.high 3817748708, %v771_v50, %v6258_v56  ;;  %v6282_v6 = vadd.s32 72, %v6226_v32 }
 0x133   : > { %4506 = vmatpush3.bf16.msra.mxu0 %v5267_v3  ;;  %v5292_v28 = vld [vmem:[#allocation12 + $0x10] sm:$0xff]   ;;  %v5293_v30 = vld [vmem:[#allocation12 + $0x60] sm:$0xff]   ;;  %v5294_v31 = vld [vmem:[#allocation12 + $0x18] sm:$0xff]   ;;  %v6261_v58 = vmul.u32.u64.low 3817748708, %v772_v51  ;;  %v6262_v59 = vmul.u32.u64.high 3817748708, %v772_v51, %v6261_v58  ;;  %v794_v62 = vsub.s32 %v6226_v32, %v793_v54  ;;  %p1347_p13 = scmp.lt.s32.totalorder %s8054_s12, 1 }
 0x134   : > { %4507 = vmatprep.subr.bf16.mxu0 %v7972_v0  ;;  %4578 = vmatpush3.bf16.msra.mxu1 %v5267_v3  ;;  %v5295_v33 = vld [vmem:[#allocation12 + $0x68] sm:$0xff]   ;;  %v5296_v34 = vld [vmem:[#allocation12 + $0x20] sm:$0xff]   ;;  %v1366_v37 = vld [vmem:[#allocation2] sm:$0x40]  ;;  %v6265_v60 = vmul.u32.u64.low 3817748708, %v6253_v52  ;;  %v6266_v61 = vmul.u32.u64.high 3817748708, %v6253_v52, %v6265_v60 }
 0x135   : > { %4579 = vmatprep.subr.bf16.mxu1 %v5268_v4  ;;  %v1367_v38 = vsel %vm1365_vm3, 0, %v1366_v37  ;;  %v5297_v39 = vld [vmem:[#allocation12 + $0x70] sm:$0xff]   ;;  %v5298_v40 = vld [vmem:[#allocation12 + $0x28] sm:$0xff]   ;;  %v5299_v43 = vld [vmem:[#allocation12 + $0x78] sm:$0xff]   ;;  %vm984_vm4 = vcmp.ne.s32.totalorder %v794_v62, 0  ;;  %vm1002_vm5 = vcmp.lt.s32.totalorder %v794_v62, 0 }
 0x136   : > { %1368 = vst [vmem:[#allocation2] sm:$0x40] %v1367_v38  ;;  %v5300_v44 = vld [vmem:[#allocation12 + $0x30] sm:$0xff]   ;;  %v5301_v53 = vld [vmem:[#allocation12 + $0x38] sm:$0xff]   ;;  %vm1020_vm6 = vmand %vm1002_vm5, %vm984_vm4  ;;  %s6410_s1 = scalar_select %p1347_p13, 1, 0 }
 0x137   : > { %4508 = vmatpush3.bf16.msra.mxu0 %v5268_v4  ;;  %p1261_p4 = scmp.gt.s32.totalorder %s8054_s12, 0  ;;  %s8196_s23 = sld [smem:[#allocation26_spill]] }
 0x138   : > { %4509 = vmatprep.subr.bf16.mxu0 %v7972_v0  ;;  %4580 = vmatpush3.bf16.msra.mxu1 %v5268_v4  ;;  %s3875_s6 = smul.u32 18, %s8054_s12  ;;  %s3883_s24 = sshll.u32 %s7809_s21, 4  ;;  %s7857_s24 = int_to_ptr.vmem [resolvable:$true] %s3883_s24 }
 0x139   : > { %4581 = vmatprep.subr.bf16.mxu1 %v5269_v5  ;;  %s7078_s22 = scalar_select %p1261_p4, 1, 0 }
 0x13a   : > { %s8197_s5 = sld [smem:[#allocation60_spill]]  ;;  %s5569_s4 = scalar_lea.vmem %s7857_s24, 1152 }
 0x13b   : > { %4510 = vmatpush3.bf16.msra.mxu0 %v5269_v5  ;;  %p5570_p9 = scmp.ne.s32.totalorder %s7857_s24, %s5569_s4  ;;  %p8198_p8 = scmp.ne.s32.totalorder %s8029_s13, 0 }
 0x13c   : > { %4511 = vmatprep.subr.bf16.mxu0 %v7972_v0  ;;  %4582 = vmatpush3.bf16.msra.mxu1 %v5269_v5  ;;  %s5716_s17 = smov [#allocation15]  }
 0x13d   : > { %4583 = vmatprep.subr.bf16.mxu1 %v5270_v7  ;;  %s5105_s29 = smul.u32 36, %s8196_s23  ;;  %p5571_p2 = pnand %p5570_p9, %p8198_p8 }
 0x13e   : > { %s5573_s8 = sshll.u32 %s5716_s17, 4  ;;  %s5574_s8 = int_to_ptr.vmem [resolvable:$false] %s5573_s8 }
 0x13f   : > { %4512 = vmatpush3.bf16.msra.mxu0 %v5270_v7  ;;  %s3880_s27 = sadd.s32 %s5105_s29, %s3875_s6  ;;  %p5572_p1 = pneg %p5571_p2 }
 0x140   : > { %4513 = vmatprep.subr.bf16.mxu0 %v7972_v0  ;;  %4584 = vmatpush3.bf16.msra.mxu1 %v5270_v7  ;;  %s4193_s20 = sshll.u32 %s3880_s27, 6  ;;  %s5575_s30 = scalar_lea.vmem %s5574_s8, 2304 }
 0x141   : > { %4585 = vmatprep.subr.bf16.mxu1 %v5271_v8  ;;  %s7862_s19 = scalar_lea.hbm %s8197_s5, %s4193_s20  ;;  %p5576_p10 = scmp.lt.s32.totalorder %s7857_s24, %s5574_s8 }
 0x142   : > { %p5577_p3 = scmp.lt.s32.totalorder %s5575_s30, %s5569_s4 }
 0x143   : > { %4514 = vmatpush3.bf16.msra.mxu0 %v5271_v8 }
 0x144   : > { %4515 = vmatprep.subr.bf16.mxu0 %v7972_v0  ;;  %4586 = vmatpush3.bf16.msra.mxu1 %v5271_v8  ;;  %p5578_p0 = por %p5577_p3, %p5576_p10 }
 0x145   : > { %4587 = vmatprep.subr.bf16.mxu1 %v5272_v9 }
 0x146   : > { %p5579_p6 = pnand %p5578_p0, %p5572_p1 }
 0x147   : > { %4516 = vmatpush3.bf16.msra.mxu0 %v5272_v9 }
 0x148   : > { %4553 = vmatprep.subr.bf16.mxu0 %v5265_v1  ;;  %4588 = vmatpush3.bf16.msra.mxu1 %v5272_v9 }
 0x149   : > { %4593 = vmatprep.subr.bf16.mxu1 %v7972_v0 }
 0x14a   : > { %4518 = vmatmul.mubr.bf16.vlgmr.msra.gmra.mrb[0].mxu0 %v5273_v10 }
 0x14b   : > { %4554 = vmatpush3.bf16.msra.mxu0 %v5265_v1  ;;  %4521 = vmatprep.mubr.msk.bf16.mxu0 %vm7965_vm0, %v7972_v0 }
 0x14c   : > { %4555 = vmatprep.subr.bf16.mxu0 %v5266_v2  ;;  %4590 = vmatmul.mubr.bf16.vlgmr.msra.gmra.mrb[0].mxu1 %v5282_v11  ;;  %v825_v11 = vshrl.u32 %v6259_v57, 4 }
 0x14d   : > { %4609 = vmatprep.mubr.msk.bf16.mxu1 %vm7965_vm0, %v7972_v0  ;;  %4594 = vmatpush3.bf16.msra.mxu1 %v5286_v22 }
 0x14e   : > { %4595 = vmatprep.subr.bf16.mxu1 %v7972_v0 }
 0x14f   : > { %4556 = vmatpush3.bf16.msra.mxu0 %v5266_v2  ;;  %v6271_v1 = vmul.u32.u64.low 3817748708, %v774_v55  ;;  %v6272_v2 = vmul.u32.u64.high 3817748708, %v774_v55, %v6271_v1 }
 0x150   : > { %4557 = vmatprep.subr.bf16.mxu0 %v5267_v3 }
 0x151   : > { %4596 = vmatpush3.bf16.msra.mxu1 %v5287_v23 }
 0x152   : > { %4522 = vmatmul.mubr.bf16.gmra.mrb[4].mxu0 %v5274_v12  ;;  %4597 = vmatprep.subr.bf16.mxu1 %v7972_v0  ;;  %v6289_v12 = vadd.s32 88, %v6226_v32 }
 0x153   : > { %4525 = vmatprep.mubr.msk.bf16.mxu0 %vm7965_vm0, %v7972_v0  ;;  %4558 = vmatpush3.bf16.msra.mxu0 %v5267_v3  ;;  %v814_v3 = vshrl.u32 %v6248_v49, 4 }
 0x154   : > { %4559 = vmatprep.subr.bf16.mxu0 %v5268_v4 }
 0x155   : > { %4598 = vmatpush3.bf16.msra.mxu1 %v5289_v25  ;;  %v815_v10 = vmul.u32 18, %v814_v3  ;;  %v826_v25 = vmul.u32 18, %v825_v11  ;;  %v6382_v11 = vadd.s32 112, %v6226_v32 }
 0x156   : > { %4599 = vmatprep.subr.bf16.mxu1 %v7972_v0 }
 0x157   : > { %4560 = vmatpush3.bf16.msra.mxu0 %v5268_v4  ;;  %v6276_v4 = vadd.s32 56, %v6226_v32  ;;  %v827_v38 = vsub.s32 %v771_v50, %v826_v25 }
 0x158   : > { %4561 = vmatprep.subr.bf16.mxu0 %v5269_v5 }
 0x159   : > { %4600 = vmatpush3.bf16.msra.mxu1 %v5291_v27  ;;  %vm987_vm11 = vcmp.ne.s32.totalorder %v827_v38, 0  ;;  %vm1005_vm12 = vcmp.lt.s32.totalorder %v827_v38, 0 }
 0x15a   : > { %4526 = vmatmul.mubr.bf16.gmra.mrb[8].mxu0 %v5275_v13  ;;  %4601 = vmatprep.subr.bf16.mxu1 %v7972_v0  ;;  %v836_v13 = vshrl.u32 %v6262_v59, 4 }
 0x15b   : > { %4529 = vmatprep.mubr.msk.bf16.mxu0 %vm7965_vm0, %v7972_v0  ;;  %4562 = vmatpush3.bf16.msra.mxu0 %v5269_v5  ;;  %v6279_v5 = vadd.s32 64, %v6226_v32 }
 0x15c   : > { %4563 = vmatprep.subr.bf16.mxu0 %v5270_v7 }
 0x15d   : > { %4602 = vmatpush3.bf16.msra.mxu1 %v5293_v30  ;;  %v837_v30 = vmul.u32 18, %v836_v13 }
 0x15e   : > { %4603 = vmatprep.subr.bf16.mxu1 %v7972_v0 }
 0x15f   : > { %4564 = vmatpush3.bf16.msra.mxu0 %v5270_v7  ;;  %v804_v7 = vmul.u32 18, %v803_v63 }
 0x160   : > { %4565 = vmatprep.subr.bf16.mxu0 %v5271_v8 }
 0x161   : > { %4604 = vmatpush3.bf16.msra.mxu1 %v5295_v33  ;;  %v805_v29 = vsub.s32 %v769_v41, %v804_v7  ;;  %v816_v33 = vsub.s32 %v6238_v42, %v815_v10 }
 0x162   : > { %4530 = vmatmul.mubr.bf16.gmra.mrb[12].mxu0 %v5276_v14  ;;  %4605 = vmatprep.subr.bf16.mxu1 %v7972_v0  ;;  %v847_v14 = vshrl.u32 %v6266_v61, 4 }
 0x163   : > { %4533 = vmatprep.mubr.msk.bf16.mxu0 %vm7965_vm0, %v7972_v0  ;;  %4566 = vmatpush3.bf16.msra.mxu0 %v5271_v8  ;;  %v6285_v8 = vadd.s32 80, %v6226_v32  ;;  %vm985_vm7 = vcmp.ne.s32.totalorder %v805_v29, 0  ;;  %vm1003_vm8 = vcmp.lt.s32.totalorder %v805_v29, 0  ;;  %vm986_vm9 = vcmp.ne.s32.totalorder %v816_v33, 0 }
 0x164   : > { %4567 = vmatprep.subr.bf16.mxu0 %v5272_v9  ;;  %vm1004_vm10 = vcmp.lt.s32.totalorder %v816_v33, 0  ;;  %v1040_v50 = vadd.s32 18, %v816_v33  ;;  %vm6341_vm13 = vmand %vm1003_vm8, %vm985_vm7 }
 0x165   : > { %4606 = vmatpush3.bf16.msra.mxu1 %v5297_v39  ;;  %v6307_v22 = vmul.u32.u64.low 3817748708, %v6285_v8  ;;  %v6308_v23 = vmul.u32.u64.high 3817748708, %v6285_v8, %v6307_v22  ;;  %vm6346_vm1 = vmand %vm1004_vm10, %vm986_vm9 }
 0x166   : > { %4607 = vmatprep.subr.bf16.mxu1 %v7972_v0  ;;  %v6373_v3 = vsel %vm6346_vm1, %v1040_v50, %v816_v33 }
 0x167   : > { %4568 = vmatpush3.bf16.msra.mxu0 %v5272_v9  ;;  %v1038_v9 = vadd.s32 18, %v794_v62  ;;  %v902_v49 = vshrl.u32 %v6308_v23, 4 }
 0x168   : > { %4645 = vmatprep.subr.bf16.mxu0 %v7972_v0 }
 0x169   : > { %4608 = vmatpush3.bf16.msra.mxu1 %v5299_v43  ;;  %v6327_v37 = vsel %vm1020_vm6, %v1038_v9, %v794_v62  ;;  %v838_v43 = vsub.s32 %v772_v51, %v837_v30  ;;  %vm6354_vm6 = vmand %vm1005_vm12, %vm987_vm11  ;;  %v903_v59 = vmul.u32 18, %v902_v49 }
 0x16a   : > { %4534 = vmatmul.mubr.bf16.gmra.mrb[16].mxu0 %v5277_v15  ;;  %4697 = vmatprep.subr.bf16.mxu1 %v7972_v0  ;;  %vm1074_vm4 = vcmp.gt.s32.totalorder %v6327_v37, 0  ;;  %vm1092_vm5 = vcmp.lt.s32.totalorder %v6327_v37, 17 }
 0x16b   : > { %4537 = vmatprep.mubr.msk.bf16.mxu0 %vm7965_vm0, %v7972_v0  ;;  %vm988_vm14 = vcmp.ne.s32.totalorder %v838_v43, 0  ;;  %vm1006_vm15 = vcmp.lt.s32.totalorder %v838_v43, 0  ;;  %v1042_v63 = vadd.s32 18, %v838_v43 }
 0x16c   : > { %vm6366_vm9 = vmand %vm1006_vm15, %vm988_vm14  ;;  %vm1076_vm14 = vcmp.gt.s32.totalorder %v6373_v3, 0  ;;  %vm1094_vm15 = vcmp.lt.s32.totalorder %v6373_v3, 17 }
 0x172   : > { %4538 = vmatmul.mubr.bf16.gmra.mrb[20].mxu0 %v5278_v16  ;;  %v6294_v15 = vmul.u32.u64.low 3817748708, %v6276_v4  ;;  %v6295_v16 = vmul.u32.u64.high 3817748708, %v6276_v4, %v6294_v15 }
 0x173   : > { %4541 = vmatprep.mubr.msk.bf16.mxu0 %vm7965_vm0, %v7972_v0 }
 0x174   : > { %v869_v41 = vshrl.u32 %v6295_v16, 4 }
 0x176   : > { %v870_v54 = vmul.u32 18, %v869_v41 }
 0x178   : > { %v6395_v15 = vsub.s32 %v6276_v4, %v870_v54  ;;  %v6418_v4 = vsel %vm6366_vm9, %v1042_v63, %v838_v43  ;;  %vm6481_vm9 = vmand %vm1074_vm4, %vm1092_vm5 }
 0x17a   : > { %4542 = vmatmul.mubr.bf16.gmra.mrb[24].mxu0 %v5279_v17 }
 0x17b   : > { %4545 = vmatprep.mubr.msk.bf16.mxu0 %vm7965_vm0, %v7972_v0 }
 0x182   : > { %4546 = vmatmul.mubr.bf16.gmra.mrb[28].mxu0 %v5280_v18  ;;  %v6298_v17 = vmul.u32.u64.low 3817748708, %v6279_v5  ;;  %v6299_v18 = vmul.u32.u64.high 3817748708, %v6279_v5, %v6298_v17 }
 0x183   : > { %4549 = vmatprep.mubr.msk.bf16.mxu0 %vm7965_vm0, %v7972_v0 }
 0x184   : > { %v880_v46 = vshrl.u32 %v6299_v18, 4  ;;  %v6406_v18 = vsub.s32 %v6285_v8, %v903_v59  ;;  %v6424_v8 = vadd.s32 120, %v6226_v32  ;;  %v6515_v59 = vadd.s32 128, %v6226_v32 }
 0x186   : > { %v881_v56 = vmul.u32 18, %v880_v46  ;;  %v6455_v33 = vadd.s32 18, %v6406_v18 }
 0x188   : > { %v6398_v16 = vsub.s32 %v6279_v5, %v881_v56 }
 0x18a   : > { %4550 = vmatmul.mubr.bf16.gmra.mrb[32].mxu0 %v5283_v19 }
 0x18b   : > { %4569 = vmatprep.mubr.bf16.mxu0 %v5284_v20  ;;  %v6302_v19 = vmul.u32.u64.low 3817748708, %v6282_v6  ;;  %v6303_v20 = vmul.u32.u64.high 3817748708, %v6282_v6, %v6302_v19 }
 0x18d   : > { %v891_v47 = vshrl.u32 %v6303_v20, 4  ;;  %v6412_v20 = vld [vmem:[#allocation11] ss:$0 sm:$0xff] }
 0x18f   : > { %v892_v57 = vmul.u32 18, %v891_v47 }
 0x191   : > { %v6401_v17 = vsub.s32 %v6282_v6, %v892_v57 }
 0x192   : > { %4570 = vmatmul.mubr.bf16.vlgmr.msra.gmra.mrb[36].mxu0 %v5285_v21  ;;  %v858_v21 = vshrl.u32 %v6272_v2, 4 }
 0x193   : > { %4661 = vmatprep.mubr.msk.bf16.mxu0 %vm7965_vm0, %v7972_v0  ;;  %4646 = vmatpush3.bf16.msra.mxu0 %v5288_v24  ;;  %v6311_v24 = vadd.s32 96, %v6226_v32 }
 0x194   : > { %4647 = vmatprep.subr.bf16.mxu0 %v7972_v0 }
 0x195   : > { %v6324_v35 = vmul.u32.u64.low 3817748708, %v6311_v24  ;;  %v6325_v36 = vmul.u32.u64.high 3817748708, %v6311_v24, %v6324_v35 }
 0x196   : > { %v1349_v35 = vstv %s6410_s1 }
 0x197   : > { %4648 = vmatpush3.bf16.msra.mxu0 %v5290_v26  ;;  %v6314_v26 = vmul.u32.u64.low 3817748708, %v6289_v12  ;;  %v6315_v27 = vmul.u32.u64.high 3817748708, %v6289_v12, %v6314_v26  ;;  %v924_v60 = vshrl.u32 %v6325_v36, 4  ;;  %vm6488_vm0 = vcmp.eq.s32.totalorder %v1349_v35, 1 }
 0x198   : > { %4649 = vmatprep.subr.bf16.mxu0 %v7972_v0  ;;  %v6443_v26 = vadd.s32 18, %v6395_v15 }
 0x199   : > { %v925_v19 = vmul.u32 18, %v924_v60 }
 0x19b   : > { %4650 = vmatpush3.bf16.msra.mxu0 %v5292_v28  ;;  %v6318_v28 = vadd.s32 104, %v6226_v32 }
 0x19c   : > { %4651 = vmatprep.subr.bf16.mxu0 %v7972_v0 }
 0x19f   : > { %4652 = vmatpush3.bf16.msra.mxu0 %v5294_v31  ;;  %v848_v31 = vmul.u32 18, %v847_v14 }
 0x1a0   : > { %4653 = vmatprep.subr.bf16.mxu0 %v7972_v0 }
 0x1a1   : > { %v849_v45 = vsub.s32 %v6253_v52, %v848_v31  ;;  %v1041_v52 = vadd.s32 18, %v827_v38 }
 0x1a3   : > { %4654 = vmatpush3.bf16.msra.mxu0 %v5296_v34  ;;  %v859_v34 = vmul.u32 18, %v858_v21  ;;  %vm989_vm2 = vcmp.ne.s32.totalorder %v849_v45, 0  ;;  %vm1007_vm3 = vcmp.lt.s32.totalorder %v849_v45, 0  ;;  %v1043_v9 = vadd.s32 18, %v849_v45 }
 0x1a4   : > { %4655 = vmatprep.subr.bf16.mxu0 %v7972_v0  ;;  %vm6377_vm10 = vmand %vm1007_vm3, %vm989_vm2  ;;  %v6386_v13 = vsel %vm6354_vm6, %v1041_v52, %v827_v38  ;;  %vm7968_vm6 = vcmp.lt.s32.totalorder %v6238_v42, 17 }
 0x1a5   : > { %v860_v48 = vsub.s32 %v774_v55, %v859_v34  ;;  %vm1077_vm1 = vcmp.gt.s32.totalorder %v6386_v13, 0  ;;  %vm1095_vm2 = vcmp.lt.s32.totalorder %v6386_v13, 17  ;;  %v6430_v21 = vsel %vm6377_vm10, %v1043_v9, %v849_v45 }
 0x1a6   : > { %v6458_v34 = vsub.s32 %v6311_v24, %v925_v19  ;;  %vm7967_vm10 = vcmp.gt.s32.totalorder %v6226_v32, 0 }
 0x1a7   : > { %4656 = vmatpush3.bf16.msra.mxu0 %v5298_v40  ;;  %v6330_v39 = vmul.u32.u64.low 3817748708, %v6318_v28  ;;  %v6331_v40 = vmul.u32.u64.high 3817748708, %v6318_v28, %v6330_v39  ;;  %vm990_vm7 = vcmp.ne.s32.totalorder %v860_v48, 0  ;;  %vm1008_vm8 = vcmp.lt.s32.totalorder %v860_v48, 0 }
 0x1a8   : > { %4657 = vmatprep.subr.bf16.mxu0 %v7972_v0  ;;  %v1044_v10 = vadd.s32 18, %v860_v48  ;;  %vm6390_vm11 = vmand %vm1008_vm8, %vm990_vm7  ;;  %vm996_vm7 = vcmp.ne.s32.totalorder %v6458_v34, 0  ;;  %vm1014_vm3 = vcmp.lt.s32.totalorder %v6458_v34, 0 }
 0x1a9   : > { %v935_v2 = vshrl.u32 %v6331_v40, 4  ;;  %v6470_v40 = vmul.u32.u64.low 3817748708, %v6424_v8  ;;  %v6471_v43 = vmul.u32.u64.high 3817748708, %v6424_v8, %v6470_v40 }
 0x1aa   : > { %v6434_v22 = vsel %vm6390_vm11, %v1044_v10, %v860_v48 }
 0x1ab   : > { %4658 = vmatpush3.bf16.msra.mxu0 %v5300_v44  ;;  %v1039_v44 = vadd.s32 18, %v805_v29  ;;  %v936_v6 = vmul.u32 18, %v935_v2 }
 0x1ac   : > { %4659 = vmatprep.subr.bf16.mxu0 %v7972_v0 }
 0x1ad   : > { %v6362_v61 = vsel %vm6341_vm13, %v1039_v44, %v805_v29  ;;  %v6449_v29 = vadd.s32 18, %v6401_v17  ;;  %v6467_v39 = vsub.s32 %v6318_v28, %v936_v6 }
 0x1ae   : > { %vm1075_vm12 = vcmp.gt.s32.totalorder %v6362_v61, 0  ;;  %vm1093_vm13 = vcmp.lt.s32.totalorder %v6362_v61, 17 }
 0x1af   : > { %4660 = vmatpush3.bf16.msra.mxu0 %v5301_v53  ;;  %v913_v53 = vshrl.u32 %v6315_v27, 4  ;;  %v6446_v27 = vadd.s32 18, %v6398_v16  ;;  %vm6499_vm4 = vmand %vm1075_vm12, %vm1093_vm13 }
 0x1b0   : > { %4749 = vmatprep.subr.bf16.mxu0 %v7972_v0  ;;  %vm6526_vm13 = vmand %vm7967_vm10, %vm6488_vm0 }
 0x1b1   : > { %v914_v1 = vmul.u32 18, %v913_v53  ;;  %v6598_v53 = vadd.s32 136, %v6226_v32 }
 0x1b3   : > { %v6421_v5 = vsub.s32 %v6289_v12, %v914_v1  ;;  %v6437_v12 = vmul.u32.u64.low 3817748708, %v6382_v11  ;;  %v6438_v23 = vmul.u32.u64.high 3817748708, %v6382_v11, %v6437_v12 }
 0x1b5   : > { %v6464_v38 = vadd.s32 18, %v6421_v5  ;;  %v946_v58 = vshrl.u32 %v6438_v23, 4  ;;  %v957_v23 = vshrl.u32 %v6471_v43, 4 }
 0x21d   : > { %v642_v25 = vpop.f32.mrb[0].mxu0 }
 0x21e   : > { %v643_v30 = vadd.f32 %v6412_v20, %v642_v25  ;;  %v4519_v31 = vpop.f32.mrb[1].mxu0 }
 0x21f   : > { %v645_v36 = vpop.f32.mrb[2].mxu0  ;;  %v4591_v41 = vpop.f32.mrb[0].mxu1 }
 0x220   : > { %vm713_vm11 = vcmp.gt.f32.partialorder %v643_v30, 0.0  ;;  %v731_v24 = vmul.f32 0.1, %v643_v30  ;;  %v646_v44 = vadd.f32 %v6412_v20, %v645_v36  ;;  %v4520_v45 = vpop.f32.mrb[3].mxu0  ;;  %v1333_v46 = vadd.f32 %v4591_v41, %v6412_v20  ;;  %v1324_v47 = vpop.f32.mrb[1].mxu1 }
 0x221   : > { %v1325_v49 = vadd.f32 %v6412_v20, %v1324_v47  ;;  %v4592_v50 = vpop.f32.mrb[2].mxu1  ;;  %v947_v41 = vmul.u32 18, %v946_v58 }
 0x222   : > { %v749_v37 = vsel %vm713_vm11, %v643_v30, %v731_v24  ;;  %vm714_vm5 = vcmp.gt.f32.partialorder %v646_v44, 0.0  ;;  %v732_v51 = vmul.f32 0.1, %v646_v44  ;;  %vm1340_vm8 = vcmp.gt.f32.partialorder %v1333_v46, 0.0  ;;  %v1327_v52 = vpop.f32.mrb[3].mxu1  ;;  %vm6509_vm11 = vmand %vm7968_vm6, %vm6488_vm0 }
 0x223   : > { %v1343_v54 = vmul.f32 0.1, %v1333_v46  ;;  %vm1338_vm12 = vcmp.gt.f32.partialorder %v1325_v49, 0.0  ;;  %v1341_v56 = vmul.f32 0.1, %v1325_v49  ;;  %v1328_v60 = vadd.f32 %v6412_v20, %v1327_v52 }
 0x224   : > { %v750_v57 = vsel %vm714_vm5, %v646_v44, %v732_v51  ;;  %v1164_v61 = vsel %vm6481_vm9, %v749_v37, 0.0  ;;  %vm6534_vm9 = vmand %vm1076_vm14, %vm1094_vm15  ;;  %vm8083_vm15 = vcmp.ne.s32.totalorder %v6398_v16, 0  ;;  %v958_v37 = vmul.u32 18, %v957_v23 }
 0x225   : > { %v1165_v62 = vsel %vm6499_vm4, %v750_v57, 0.0  ;;  %v650_v63 = vpop.f32.mrb[4].mxu0  ;;  %v1346_v1 = vsel %vm1340_vm8, %v1333_v46, %v1343_v54  ;;  %v1344_v2 = vsel %vm1338_vm12, %v1325_v49, %v1341_v56  ;;  %vm6548_vm14 = vmand %vm1077_vm1, %vm1095_vm2  ;;  %vm1339_vm10 = vcmp.gt.f32.partialorder %v1328_v60, 0.0 }
 0x226   : > { %v1381_v9 = vpack.c.bf16 %v1165_v62, %v1164_v61  ;;  %v651_v14 = vadd.f32 %v6412_v20, %v650_v63  ;;  %v4523_v19 = vpop.f32.mrb[5].mxu0  ;;  %v1362_v6 = vsel %vm6509_vm11, %v1346_v1, 0.0  ;;  %v1342_v30 = vmul.f32 0.1, %v1328_v60 }
 0x227   : > { %v653_v12 = vpop.f32.mrb[6].mxu0  ;;  %v1400_v25 = vpack.c.bf16 %v1362_v6, %v1362_v6  ;;  %vm8079_vm1 = vcmp.ne.s32.totalorder %v6395_v15, 0  ;;  %vm8080_vm2 = vcmp.lt.s32.totalorder %v6395_v15, 0  ;;  %v1360_v40 = vsel %vm6526_vm13, %v1344_v2, 0.0 }
 0x228   : > { %1390 = vst [vmem:[#allocation2 + $0x10] sm:$0xff] %v1381_v9  ;;  %vm715_vm11 = vcmp.gt.f32.partialorder %v651_v14, 0.0  ;;  %v733_v31 = vmul.f32 0.1, %v651_v14  ;;  %v654_v35 = vadd.f32 %v6412_v20, %v653_v12  ;;  %v4524_v36 = vpop.f32.mrb[7].mxu0  ;;  %vm6560_vm6 = vmand %vm8080_vm2, %vm8079_vm1  ;;  %vm8084_vm12 = vcmp.lt.s32.totalorder %v6398_v16, 0 }
 0x229   : > { %vm6570_vm8 = vmand %vm8084_vm12, %vm8083_vm15  ;;  %1402 = vst [vmem:[#allocation2 + $0x60] sm:$0x1] %v1400_v25  ;;  %v6575_v24 = vmul.u32.u64.low 3817748708, %v6515_v59  ;;  %v6576_v44 = vmul.u32.u64.high 3817748708, %v6515_v59, %v6575_v24  ;;  %v1345_v45 = vsel %vm1339_vm10, %v1328_v60, %v1342_v30  ;;  %vm8087_vm13 = vcmp.ne.s32.totalorder %v6401_v17, 0 }
 0x22a   : > { %v751_v46 = vsel %vm715_vm11, %v651_v14, %v733_v31  ;;  %vm716_vm1 = vcmp.gt.f32.partialorder %v654_v35, 0.0  ;;  %v734_v47 = vmul.f32 0.1, %v654_v35  ;;  %vm8088_vm2 = vcmp.lt.s32.totalorder %v6401_v17, 0 }
 0x22b   : > { %vm6582_vm4 = vmand %vm8088_vm2, %vm8087_vm13  ;;  %v1361_v49 = vsel %vm6488_vm0, %v1345_v45, 0.0  ;;  %vm8091_vm15 = vcmp.ne.s32.totalorder %v6406_v18, 0  ;;  %vm8092_vm12 = vcmp.lt.s32.totalorder %v6406_v18, 0  ;;  %vm1015_vm10 = vcmp.lt.s32.totalorder %v6467_v39, 0 }
 0x22c   : > { %vm6592_vm5 = vmand %vm8092_vm12, %vm8091_vm15  ;;  %v1399_v51 = vpack.c.bf16 %v1361_v49, %v1360_v40  ;;  %v752_v52 = vsel %vm716_vm1, %v654_v35, %v734_v47  ;;  %v6604_v48 = vsel %vm6560_vm6, %v6443_v26, %v6395_v15  ;;  %v6610_v54 = vsel %vm6570_vm8, %v6446_v27, %v6398_v16 }
 0x22d   : > { %vm8095_vm0 = vcmp.ne.s32.totalorder %v6421_v5, 0  ;;  %vm8096_vm11 = vcmp.lt.s32.totalorder %v6421_v5, 0  ;;  %v1050_v56 = vadd.s32 18, %v6458_v34  ;;  %v1166_v15 = vsel %vm6534_vm9, %v751_v46, 0.0  ;;  %v658_v57 = vpop.f32.mrb[8].mxu0  ;;  %vm6629_vm6 = vmand %vm1014_vm3, %vm996_vm7 }
 0x22e   : > { %vm6616_vm13 = vmand %vm8096_vm11, %vm8095_vm0  ;;  %v1167_v26 = vsel %vm6548_vm14, %v752_v52, 0.0  ;;  %v1051_v27 = vadd.s32 18, %v6467_v39  ;;  %v6635_v58 = vsub.s32 %v6382_v11, %v947_v41  ;;  %1401 = vst [vmem:[#allocation2 + $0x58] sm:$0xff] %v1399_v51  ;;  %v659_v61 = vadd.f32 %v6412_v20, %v658_v57  ;;  %v4527_v62 = vpop.f32.mrb[9].mxu0 }
 0x22f   : > { %v6637_v60 = vpack.c.bf16 %v1167_v26, %v1166_v15  ;;  %vm1080_vm9 = vcmp.gt.s32.totalorder %v6434_v22, 0  ;;  %vm1098_vm8 = vcmp.lt.s32.totalorder %v6434_v22, 17  ;;  %v6646_v63 = vsel %vm6582_vm4, %v6449_v29, %v6401_v17  ;;  %v661_v2 = vpop.f32.mrb[10].mxu0  ;;  %v6678_v7 = vld [vmem:[#allocation2 + $0x10] sm:$0xff] }
 0x230   : > { %v6652_v11 = vsel %vm6592_vm5, %v6455_v33, %v6406_v18  ;;  %vm8101_vm3 = vcmp.ne.s32.totalorder %v6467_v39, 0  ;;  %vm1081_vm14 = vcmp.gt.s32.totalorder %v6604_v48, 0  ;;  %vm1099_vm4 = vcmp.lt.s32.totalorder %v6604_v48, 17  ;;  %v4528_v14 = vpop.f32.mrb[11].mxu0 }
 0x231   : > { %vm6658_vm7 = vmand %vm1015_vm10, %vm8101_vm3  ;;  %v6668_v17 = vsel %vm6616_vm13, %v6464_v38, %v6421_v5  ;;  %v6671_v18 = vsub.s32 %v6424_v8, %v958_v37  ;;  %v6674_v29 = vmul.u32.u64.low 3817748708, %v6598_v53  ;;  %v6675_v33 = vmul.u32.u64.high 3817748708, %v6598_v53, %v6674_v29  ;;  %1391 = vst [vmem:[#allocation2 + $0x18] sm:$0xff] %v6637_v60 }
 0x232   : > { %vm717_vm5 = vcmp.gt.f32.partialorder %v659_v61, 0.0  ;;  %v735_v9 = vmul.f32 0.1, %v659_v61  ;;  %v662_v10 = vadd.f32 %v6412_v20, %v661_v2  ;;  %v6685_v5 = vsel %vm6629_vm6, %v1050_v56, %v6458_v34 }
 0x233   : > { %vm8104_vm1 = vcmp.lt.s32.totalorder %v6418_v4, 17  ;;  %vm8105_vm2 = vcmp.gt.s32.totalorder %v6418_v4, 0  ;;  %v6698_v38 = vsel %vm6658_vm7, %v1051_v27, %v6467_v39  ;;  %v6701_v19 = vadd.s32 18, %v6635_v58 }
 0x234   : > { %vm6691_vm15 = vmand %vm8105_vm2, %vm8104_vm1  ;;  %v6704_v6 = vshrl.u32 %v6678_v7, 16  ;;  %v1672_v34 = vshrl.u32 %v6637_v60, 16  ;;  %vm1914_vm12 = vsmask.f32 256  ;;  %v753_v12 = vsel %vm717_vm5, %v659_v61, %v735_v9 }
 0x235   : > { %vm8108_vm10 = vcmp.lt.s32.totalorder %v6430_v21, 17  ;;  %vm8109_vm0 = vcmp.gt.s32.totalorder %v6430_v21, 0  ;;  %vm718_vm13 = vcmp.gt.f32.partialorder %v662_v10, 0.0  ;;  %v736_v39 = vmul.f32 0.1, %v662_v10  ;;  %v666_v40 = vpop.f32.mrb[12].mxu0 }
 0x236   : > { %vm6711_vm11 = vmand %vm8109_vm0, %vm8108_vm10  ;;  %vm998_vm6 = vcmp.ne.s32.totalorder %v6635_v58, 0  ;;  %vm1016_vm3 = vcmp.lt.s32.totalorder %v6635_v58, 0  ;;  %vm1463_vm7 = vcmask 1040384   ;;  %v1675_v3 = vshll.u32 %v6637_v60, 16 }
 0x237   : > { %vm999_vm1 = vcmp.ne.s32.totalorder %v6671_v18, 0  ;;  %vm1017_vm5 = vcmp.lt.s32.totalorder %v6671_v18, 0  ;;  %v968_v23 = vshrl.u32 %v6576_v44, 4  ;;  %v6722_v21 = vshll.u32 %v6678_v7, 16  ;;  %v4531_v44 = vpop.f32.mrb[13].mxu0 }
 0x238   : > { %v754_v25 = vsel %vm718_vm13, %v662_v10, %v736_v39  ;;  %v1674_v30 = vrot.slane %v1672_v34, 6  ;;  %v1677_v31 = vrot.slane %v1675_v3, 7  ;;  %v6725_v35 = vrot.slane %v6704_v6, 7  ;;  %v669_v47 = vpop.f32.mrb[14].mxu0  ;;  %v6748_v50 = vld [vmem:[#allocation2 + $0x18] sm:$0xff] }
 0x239   : > { %vm2629_vm2 = vsmask.f32 7424  ;;  %v1168_v36 = vsel %vm6691_vm15, %v753_v12, 0.0  ;;  %v1169_v13 = vsel %vm6711_vm11, %v754_v25, 0.0  ;;  %v6731_v43 = vrot.slane %v1672_v34, 7  ;;  %v4532_v55 = vpop.f32.mrb[15].mxu0  ;;  %vm6759_vm15 = vmand %vm1080_vm9, %vm1098_vm8 }
 0x23a   : > { %v6733_v41 = vpack.c.bf16 %v1169_v13, %v1168_v36  ;;  %v667_v24 = vadd.f32 %v6412_v20, %v666_v40  ;;  %vm1100_vm0 = vcmp.lt.s32.totalorder %v6610_v54, 17  ;;  %v6739_v45 = vadd.s32 18, %v6671_v18  ;;  %vm6771_vm11 = vmand %vm1081_vm14, %vm1099_vm4 }
 0x23b   : > { %vm1404_vm13 = vsmask.f32 1280  ;;  %v6743_v46 = vor.u32 %v6725_v35, %v6722_v21  ;;  %v969_v28 = vmul.u32 18, %v968_v23  ;;  %v7971_v49 = vrot.slane %v6637_v60, 7  ;;  %vm6798_vm4 = vmand %vm1016_vm3, %vm998_vm6 }
 0x23c   : > { %v1926_v37 = vor.u32 %v6731_v43, %v1675_v3  ;;  %1392 = vst [vmem:[#allocation2 + $0x20] sm:$0xff] %v6733_v41  ;;  %vm719_vm10 = vcmp.gt.f32.partialorder %v667_v24, 0.0  ;;  %v737_v51 = vmul.f32 0.1, %v667_v24  ;;  %v670_v52 = vadd.f32 %v6412_v20, %v669_v47 }
 0x23d   : > { %v6753_v56 = vor.u32 %v1677_v31, %v1674_v30  ;;  %v1471_v26 = vrot.slane %v6733_v41, 7  ;;  %v1681_v57 = vshrl.u32 %v6733_v41, 16  ;;  %v1684_v16 = vshll.u32 %v6733_v41, 16  ;;  %v674_v4 = vpop.f32.mrb[16].mxu0 }
 0x23e   : > { %v2635_v27 = vrot.slane %v6722_v21, 1  ;;  %v755_v61 = vsel %vm719_vm10, %v667_v24, %v737_v51  ;;  %vm720_vm9 = vcmp.gt.f32.partialorder %v670_v52, 0.0  ;;  %v738_v22 = vmul.f32 0.1, %v670_v52  ;;  %v4535_v36 = vpop.f32.mrb[17].mxu0  ;;  %vm6812_vm10 = vmand %vm1017_vm5, %vm999_vm1 }
 0x23f   : > { %v7969_v1 = vshll.u32 %v6748_v50, 16  ;;  %v6779_v2 = vsel %vm1463_vm7, %v7971_v49, %v1471_v26  ;;  %v1683_v29 = vrot.slane %v1681_v57, 6  ;;  %v1686_v9 = vrot.slane %v1684_v16, 7  ;;  %v677_v24 = vpop.f32.mrb[18].mxu0 }
 0x240   : > { %v7970_v10 = vshrl.u32 %v6748_v50, 16  ;;  %v1170_v48 = vsel %vm6759_vm15, %v755_v61, 0.0  ;;  %v756_v14 = vsel %vm720_vm9, %v670_v52, %v738_v22  ;;  %v6786_v8 = vsel %vm1914_vm12, %v6725_v35, %v1926_v37  ;;  %v4536_v55 = vpop.f32.mrb[19].mxu0 }
 0x241   : > { %v6788_v34 = vrot.slane %v1681_v57, 7  ;;  %v1171_v12 = vsel %vm6771_vm11, %v756_v14, 0.0  ;;  %vm1084_vm8 = vcmp.gt.s32.totalorder %v6652_v11, 0  ;;  %vm1102_vm14 = vcmp.lt.s32.totalorder %v6652_v11, 17 }
 0x242   : > { %v1687_v3 = vor.u32 %v1686_v9, %v1683_v29  ;;  %v2636_v23 = vor.u32 %v2635_v27, %v6704_v6  ;;  %v2640_v25 = vrot.slane %v7969_v1, 1  ;;  %v6805_v30 = vpack.c.bf16 %v1171_v12, %v1170_v48 }
 0x243   : > { %v675_v31 = vadd.f32 %v6412_v20, %v674_v4  ;;  %v979_v40 = vshrl.u32 %v6675_v33, 4  ;;  %v1929_v41 = vor.u32 %v6788_v34, %v1684_v16  ;;  %vm1085_vm6 = vcmp.gt.s32.totalorder %v6668_v17, 0 }
 0x244   : > { %vm1103_vm3 = vcmp.lt.s32.totalorder %v6668_v17, 17  ;;  %v6821_v44 = vsub.s32 %v6515_v59, %v969_v28  ;;  %v6825_v47 = vsel %vm1404_vm13, %v6753_v56, %v1687_v3  ;;  %v6828_v37 = vsel %vm2629_vm2, %v2636_v23, %v2640_v25  ;;  %1393 = vst [vmem:[#allocation2 + $0x28] sm:$0xff] %v6805_v30 }
 0x245   : > { %8120 = vst [vmem:[#allocation35_spill] sm:$0xff] %v6828_v37  ;;  %v6832_v33 = vor.u32 %v2640_v25, %v7970_v10  ;;  %vm721_vm1 = vcmp.gt.f32.partialorder %v675_v31, 0.0  ;;  %v739_v51 = vmul.f32 0.1, %v675_v31  ;;  %v678_v52 = vadd.f32 %v6412_v20, %v677_v24  ;;  %v682_v14 = vpop.f32.mrb[20].mxu0 }
 0x246   : > { %v1473_v59 = vrot.slane %v6805_v30, 7  ;;  %vm8121_vm5 = vcmp.gt.s32.totalorder %v6610_v54, 0  ;;  %v6849_v15 = vsel %vm6798_vm4, %v6701_v19, %v6635_v58  ;;  %v6855_v57 = vsel %vm6812_vm10, %v6739_v45, %v6671_v18  ;;  %v2134_v18 = vld [vmem:[#allocation2 + $0x20] sm:$0xff]  ;;  %v4539_v25 = vpop.f32.mrb[21].mxu0 }
 0x247   : > { %vm6841_vm15 = vmand %vm8121_vm5, %vm1100_vm0  ;;  %v1690_v16 = vshrl.u32 %v6805_v30, 16  ;;  %v1693_v54 = vshll.u32 %v6805_v30, 16  ;;  %v757_v27 = vsel %vm721_vm1, %v675_v31, %v739_v51  ;;  %vm8124_vm0 = vcmp.lt.s32.totalorder %v6646_v63, 17  ;;  %v685_v30 = vpop.f32.mrb[22].mxu0 }
 0x248   : > { %vm8125_vm11 = vcmp.gt.s32.totalorder %v6646_v63, 0  ;;  %vm722_vm4 = vcmp.gt.f32.partialorder %v678_v52, 0.0  ;;  %v740_v58 = vmul.f32 0.1, %v678_v52  ;;  %v6868_v19 = vsel %vm1463_vm7, %v1471_v26, %v1473_v59  ;;  %v4540_v51 = vpop.f32.mrb[23].mxu0 }
 0x249   : > { %vm6863_vm9 = vmand %vm8125_vm11, %vm8124_vm0  ;;  %vm1000_vm10 = vcmp.ne.s32.totalorder %v6821_v44, 0  ;;  %v980_v45 = vmul.u32 18, %v979_v40  ;;  %v1692_v62 = vrot.slane %v1690_v16, 6  ;;  %v1695_v22 = vrot.slane %v1693_v54, 7 }
 0x24a   : > { %v1172_v29 = vsel %vm6841_vm15, %v757_v27, 0.0  ;;  %v758_v9 = vsel %vm722_vm4, %v678_v52, %v740_v58  ;;  %v6875_v63 = vsel %vm1914_vm12, %v6731_v43, %v1929_v41  ;;  %v6877_v48 = vrot.slane %v1690_v16, 7 }
 0x24b   : > { %v1173_v26 = vsel %vm6863_vm9, %v758_v9, 0.0  ;;  %vm1086_vm1 = vcmp.gt.s32.totalorder %v6685_v5, 0  ;;  %vm1104_vm5 = vcmp.lt.s32.totalorder %v6685_v5, 17  ;;  %v1696_v12 = vor.u32 %v1695_v22, %v1692_v62  ;;  %vm6904_vm9 = vmand %vm1084_vm8, %vm1102_vm14  ;;  %v2135_v28 = vld [vmem:[#allocation2 + $0x28] sm:$0xff] }
 0x24c   : > { %v6883_v4 = vshll.u32 %v2134_v18, 16  ;;  %v6885_v39 = vpack.c.bf16 %v1173_v26, %v1172_v29  ;;  %v683_v23 = vadd.f32 %v6412_v20, %v682_v14  ;;  %vm1018_vm15 = vcmp.lt.s32.totalorder %v6821_v44, 0  ;;  %vm6919_vm8 = vmand %vm1085_vm6, %vm1103_vm3 }
 0x24d   : > { %v1932_v43 = vor.u32 %v6877_v48, %v1693_v54  ;;  %vm1087_vm0 = vcmp.gt.s32.totalorder %v6698_v38, 0  ;;  %vm1105_vm11 = vcmp.lt.s32.totalorder %v6698_v38, 17  ;;  %v1054_v31 = vadd.s32 18, %v6821_v44  ;;  %v690_v26 = vpop.f32.mrb[24].mxu0 }
 0x24e   : > { %v6894_v36 = vsub.s32 %v6598_v53, %v980_v45  ;;  %v6897_v13 = vsel %vm1404_vm13, %v1687_v3, %v1696_v12  ;;  %1394 = vst [vmem:[#allocation2 + $0x30] sm:$0xff] %v6885_v39  ;;  %vm723_vm4 = vcmp.gt.f32.partialorder %v683_v23, 0.0  ;;  %v741_v41 = vmul.f32 0.1, %v683_v23 }
 0x24f   : > { %v686_v24 = vadd.f32 %v6412_v20, %v685_v30  ;;  %v1475_v53 = vrot.slane %v6885_v39, 7  ;;  %v1699_v3 = vshrl.u32 %v6885_v39, 16  ;;  %v1702_v52 = vshll.u32 %v6885_v39, 16 }
 0x250   : > { %v6912_v55 = vshrl.u32 %v2134_v18, 16  ;;  %v2648_v11 = vrot.slane %v6883_v4, 1  ;;  %v759_v16 = vsel %vm723_vm4, %v683_v23, %v741_v41  ;;  %vm6932_vm4 = vmand %vm1018_vm15, %vm1000_vm10  ;;  %v6936_v22 = vshll.u32 %v2135_v28, 16 }
 0x251   : > { %vm724_vm14 = vcmp.gt.f32.partialorder %v686_v24, 0.0  ;;  %v742_v27 = vmul.f32 0.1, %v686_v24  ;;  %v6924_v61 = vsel %vm1463_vm7, %v1473_v59, %v1475_v53  ;;  %v1174_v58 = vsel %vm6904_vm9, %v759_v16, 0.0 }
 0x252   : > { %v1701_v17 = vrot.slane %v1699_v3, 6  ;;  %v1704_v45 = vrot.slane %v1702_v52, 7  ;;  %v6940_v59 = vsel %vm1914_vm12, %v6788_v34, %v1932_v43  ;;  %v6942_v29 = vrot.slane %v1699_v3, 7  ;;  %v4543_v43 = vpop.f32.mrb[25].mxu0 }
 0x253   : > { %v760_v62 = vsel %vm724_vm14, %v686_v24, %v742_v27  ;;  %vm1088_vm6 = vcmp.gt.s32.totalorder %v6849_v15, 0  ;;  %vm1106_vm3 = vcmp.lt.s32.totalorder %v6849_v15, 17  ;;  %v6950_v39 = vsel %vm2629_vm2, %v6832_v33, %v2648_v11  ;;  %v693_v41 = vpop.f32.mrb[26].mxu0 }
 0x254   : > { %v1175_v9 = vsel %vm6919_vm8, %v760_v62, 0.0  ;;  %v1705_v14 = vor.u32 %v1704_v45, %v1701_v17  ;;  %8134 = vst [vmem:[#allocation36_spill] sm:$0xff] %v6950_v39  ;;  %v2652_v23 = vor.u32 %v2648_v11, %v6912_v55  ;;  %v691_v34 = vadd.f32 %v6412_v20, %v690_v26  ;;  %vm6973_vm8 = vmand %vm1086_vm1, %vm1104_vm5  ;;  %v4544_v51 = vpop.f32.mrb[27].mxu0 }
 0x255   : > { %v6953_v25 = vpack.c.bf16 %v1175_v9, %v1174_v58  ;;  %v6959_v30 = vsel %vm6932_vm4, %v1054_v31, %v6821_v44  ;;  %v1935_v40 = vor.u32 %v6942_v29, %v1702_v52  ;;  %vm1089_vm10 = vcmp.gt.s32.totalorder %v6855_v57, 0  ;;  %v6982_v16 = vld [vmem:[#allocation2 + $0x30] sm:$0xff]  ;;  %vm6989_vm1 = vmand %vm1087_vm0, %vm1105_vm11  ;;  %v698_v43 = vpop.f32.mrb[28].mxu0 }
 0x256   : > { %vm1001_vm15 = vcmp.ne.s32.totalorder %v6894_v36, 0  ;;  %vm1019_vm9 = vcmp.lt.s32.totalorder %v6894_v36, 0  ;;  %v6966_v33 = vsel %vm1404_vm13, %v1696_v12, %v1705_v14  ;;  %vm725_vm14 = vcmp.gt.f32.partialorder %v691_v34, 0.0  ;;  %8137 = vst [vmem:[#allocation37_spill] sm:$0xff] %v6982_v16  ;;  %v4547_v51 = vpop.f32.mrb[29].mxu0 }
 0x257   : > { %1395 = vst [vmem:[#allocation2 + $0x38] sm:$0xff] %v6953_v25  ;;  %v743_v31 = vmul.f32 0.1, %v691_v34  ;;  %v694_v24 = vadd.f32 %v6412_v20, %v693_v41  ;;  %v1477_v3 = vrot.slane %v6953_v25, 7  ;;  %v1055_v12 = vadd.s32 18, %v6894_v36  ;;  %vm1037_vm11 = vmand %vm1019_vm9, %vm1001_vm15 }
 0x258   : > { %v1708_v52 = vshrl.u32 %v6953_v25, 16  ;;  %v1711_v11 = vshll.u32 %v6953_v25, 16  ;;  %v2656_v5 = vrot.slane %v6936_v22, 1  ;;  %v6998_v9 = vshrl.u32 %v2135_v28, 16 }
 0x259   : > { %v761_v54 = vsel %vm725_vm14, %v691_v34, %v743_v31  ;;  %vm726_vm5 = vcmp.gt.f32.partialorder %v694_v24, 0.0  ;;  %v744_v58 = vmul.f32 0.1, %v694_v24  ;;  %v6994_v18 = vsel %vm1463_vm7, %v1475_v53, %v1477_v3  ;;  %vm7034_vm14 = vmand %vm1088_vm6, %vm1106_vm3 }
 0x25a   : > { %v1176_v17 = vsel %vm6973_vm8, %v761_v54, 0.0  ;;  %v1710_v45 = vrot.slane %v1708_v52, 6  ;;  %v1713_v62 = vrot.slane %v1711_v11, 7  ;;  %v7001_v25 = vshll.u32 %v6982_v16, 16 }
 0x25b   : > { %v762_v26 = vsel %vm726_vm5, %v694_v24, %v744_v58  ;;  %v7005_v38 = vsel %vm1914_vm12, %v6877_v48, %v1935_v40  ;;  %v7007_v34 = vrot.slane %v1708_v52, 7  ;;  %v7012_v44 = vsel %vm2629_vm2, %v2652_v23, %v2656_v5  ;;  %v701_v40 = vpop.f32.mrb[30].mxu0 }
 0x25c   : > { %v1177_v53 = vsel %vm6989_vm1, %v762_v26, 0.0  ;;  %v1714_v41 = vor.u32 %v1713_v62, %v1710_v45  ;;  %8140 = vst [vmem:[#allocation38_spill] sm:$0xff] %v7012_v44  ;;  %v2660_v28 = vor.u32 %v2656_v5, %v6998_v9  ;;  %v699_v24 = vadd.f32 %v6412_v20, %v698_v43  ;;  %v4548_v54 = vpop.f32.mrb[31].mxu0 }
 0x25d   : > { %v7015_v31 = vpack.c.bf16 %v1177_v53, %v1176_v17  ;;  %vm1107_vm0 = vcmp.lt.s32.totalorder %v6855_v57, 17  ;;  %v1938_v48 = vor.u32 %v7007_v34, %v1711_v11  ;;  %vm1090_vm4 = vcmp.gt.s32.totalorder %v6959_v30, 0  ;;  %v706_v52 = vpop.f32.mrb[32].mxu0 }
 0x25e   : > { %vm1108_vm8 = vcmp.lt.s32.totalorder %v6959_v30, 17  ;;  %v7027_v23 = vsel %vm1404_vm13, %v1705_v14, %v1714_v41  ;;  %vm727_vm15 = vcmp.gt.f32.partialorder %v699_v24, 0.0  ;;  %v745_v11 = vmul.f32 0.1, %v699_v24  ;;  %v7044_v45 = vld [vmem:[#allocation2 + $0x38] sm:$0xff]  ;;  %vm7051_vm6 = vmand %vm1089_vm10, %vm1107_vm0 }
 0x25f   : > { %1396 = vst [vmem:[#allocation2 + $0x40] sm:$0xff] %v7015_v31  ;;  %v702_v5 = vadd.f32 %v6412_v20, %v701_v40  ;;  %v7974_v27 = vrot.slane %v7015_v31, 7  ;;  %v1073_v14 = vsel %vm1037_vm11, %v1055_v12, %v6894_v36  ;;  %v1717_v58 = vshrl.u32 %v7015_v31, 16  ;;  %8143 = vst [vmem:[#allocation39_spill] sm:$0xff] %v7044_v45 }
 0x260   : > { %v1720_v17 = vshll.u32 %v7015_v31, 16  ;;  %v2664_v15 = vrot.slane %v7001_v25, 1  ;;  %v763_v62 = vsel %vm727_vm15, %v699_v24, %v745_v11  ;;  %v7063_v51 = vshrl.u32 %v6982_v16, 16  ;;  %vm7099_vm1 = vmand %vm1090_vm4, %vm1108_vm8 }
 0x261   : > { %vm728_vm3 = vcmp.gt.f32.partialorder %v702_v5, 0.0  ;;  %v746_v36 = vmul.f32 0.1, %v702_v5  ;;  %v7058_v12 = vsel %vm1463_vm7, %v1477_v3, %v7974_v27  ;;  %v1178_v53 = vsel %vm7034_vm14, %v763_v62, 0.0 }
 0x262   : > { %v1719_v43 = vrot.slane %v1717_v58, 6  ;;  %v1722_v24 = vrot.slane %v1720_v17, 7  ;;  %v7066_v40 = vshll.u32 %v7044_v45, 16  ;;  %v7070_v11 = vsel %vm1914_vm12, %v6942_v29, %v1938_v48  ;;  %v4551_v48 = vpop.f32.mrb[33].mxu0 }
 0x263   : > { %v764_v57 = vsel %vm728_vm3, %v702_v5, %v746_v36  ;;  %8146 = vst [vmem:[#allocation40_spill] sm:$0xff] %v7070_v11  ;;  %v7072_v54 = vrot.slane %v1717_v58, 7  ;;  %v7083_v5 = vsel %vm2629_vm2, %v2660_v28, %v2664_v15  ;;  %v2668_v36 = vor.u32 %v2664_v15, %v7063_v51  ;;  %v709_v26 = vpop.f32.mrb[34].mxu0 }
 0x264   : > { %v1179_v3 = vsel %vm7051_vm6, %v764_v57, 0.0  ;;  %v7080_v62 = vor.u32 %v1722_v24, %v1719_v43  ;;  %8148 = vst [vmem:[#allocation42_spill] sm:$0xff] %v7083_v5  ;;  %v707_v29 = vadd.f32 %v6412_v20, %v706_v52  ;;  %vm1091_vm10 = vcmp.gt.s32.totalorder %v1073_v14, 0  ;;  %v4552_v24 = vpop.f32.mrb[35].mxu0  ;;  %v7191_v5 = vld [vmem:[#allocation2 + $0x18] sm:$0xfe] }
 0x265   : > { %8147 = vst [vmem:[#allocation41_spill] sm:$0xff] %v7072_v54  ;;  %v1388_v1 = vpack.c.bf16 %v1179_v3, %v1178_v53  ;;  %v1941_v58 = vor.u32 %v7072_v54, %v1720_v17  ;;  %vm1109_vm9 = vcmp.lt.s32.totalorder %v1073_v14, 17  ;;  %v2672_v28 = vrot.slane %v7066_v40, 1  ;;  %8165 = vst [vmem:[#allocation52_spill] sm:$0xff] %v7191_v5 }
 0x266   : > { %v7090_v57 = vsel %vm1404_vm13, %v1714_v41, %v7080_v62  ;;  %v7092_v43 = vld [vmem:[#allocation2 + $0x40] sm:$0xff]  ;;  %vm729_vm5 = vcmp.gt.f32.partialorder %v707_v29, 0.0  ;;  %v747_v17 = vmul.f32 0.1, %v707_v29  ;;  %v710_v53 = vadd.f32 %v6412_v20, %v709_v26  ;;  %vm1127_vm0 = vmand %vm1091_vm10, %vm1109_vm9 }
 0x267   : > { %8149 = vst [vmem:[#allocation43_spill] sm:$0xff] %v7092_v43  ;;  %1397 = vst [vmem:[#allocation2 + $0x48] sm:$0xff] %v1388_v1  ;;  %v7105_v41 = vshrl.u32 %v7044_v45, 16  ;;  %v1263_v3 = vstv %s7078_s22  ;;  %v7109_v52 = vshll.u32 %v7092_v43, 16  ;;  %v7113_v1 = vsel %vm1914_vm12, %v7007_v34, %v1941_v58 }
 0x268   : > { %8152 = vst [vmem:[#allocation44_spill] sm:$0xff] %v7113_v1  ;;  %v7116_v30 = vsel %vm2629_vm2, %v2668_v36, %v2672_v28  ;;  %v765_v48 = vsel %vm729_vm5, %v707_v29, %v747_v17  ;;  %vm730_vm11 = vcmp.gt.f32.partialorder %v710_v53, 0.0  ;;  %v748_v26 = vmul.f32 0.1, %v710_v53  ;;  %v4571_v36 = vpop.f32.mrb[36].mxu0 }
 0x269   : > { %8153 = vst [vmem:[#allocation45_spill] sm:$0xff] %v7116_v30  ;;  %v2676_v24 = vor.u32 %v2672_v28, %v7105_v41  ;;  %v1180_v10 = vsel %vm7099_vm1, %v765_v48, 0.0  ;;  %v7124_v49 = vshrl.u32 %v7092_v43, 16  ;;  %v2680_v34 = vrot.slane %v7109_v52, 1  ;;  %v1238_v48 = vpop.f32.mrb[37].mxu0 }
 0x26a   : > { %v766_v58 = vsel %vm730_vm11, %v710_v53, %v748_v26  ;;  %vm7127_vm4 = vcmp.eq.s32.totalorder %v1263_v3, 1  ;;  %v1247_v15 = vadd.f32 %v4571_v36, %v6412_v20  ;;  %v1239_v27 = vadd.f32 %v6412_v20, %v1238_v48  ;;  %v4572_v43 = vpop.f32.mrb[38].mxu0 }
 0x26b   : > { %v1181_v0 = vsel %vm1127_vm0, %v766_v58, 0.0  ;;  %v7132_v14 = vsel %vm2629_vm2, %v2676_v24, %v2680_v34  ;;  %v2684_v28 = vor.u32 %v2680_v34, %v7124_v49  ;;  %vm8157_vm14 = vcmp.lt.s32.totalorder %v6238_v42, 17  ;;  %v1241_v3 = vpop.f32.mrb[39].mxu0 }
 0x26c   : > { %8156 = vst [vmem:[#allocation46_spill] sm:$0xff] %v7132_v14  ;;  %v1389_v17 = vpack.c.bf16 %v1181_v0, %v1180_v10  ;;  %vm1254_vm8 = vcmp.gt.f32.partialorder %v1247_v15, 0.0  ;;  %v1257_v53 = vmul.f32 0.1, %v1247_v15  ;;  %vm1267_vm15 = vmand %vm8157_vm14, %vm7127_vm4  ;;  %vm1252_vm6 = vcmp.gt.f32.partialorder %v1239_v27, 0.0 }
 0x26d   : > { %v1255_v0 = vmul.f32 0.1, %v1239_v27  ;;  %vm8158_vm3 = vcmp.gt.s32.totalorder %v6226_v32, 0  ;;  %v1242_v10 = vadd.f32 %v6412_v20, %v1241_v3  ;;  %v8159_v24 = vrot.slane %v7015_v31, 7 }
 0x26e   : > { %v7137_v45 = vld [vmem:[#allocation2 + $0x48] sm:$0x7f]  ;;  %1398 = vst [vmem:[#allocation2 + $0x50] sm:$0xff] %v1389_v17  ;;  %vm1265_vm10 = vmand %vm8158_vm3, %vm7127_vm4  ;;  %v1260_v43 = vsel %vm1254_vm8, %v1247_v15, %v1257_v53  ;;  %vm1373_vm1 = vcmask 1046528   ;;  %vm3414_vm5 = vsmask.f32 6400 }
 0x26f   : > { %v1481_v26 = vrot.slane %v7137_v45, 7  ;;  %v7154_v42 = vld [vmem:[#allocation2 + $0x48] sm:$0xff]  ;;  %v1276_v58 = vsel %vm1267_vm15, %v1260_v43, 0.0  ;;  %v1258_v36 = vsel %vm1252_vm6, %v1239_v27, %v1255_v0  ;;  %vm1253_vm9 = vcmp.gt.f32.partialorder %v1242_v10, 0.0 }
 0x270   : > { %8160 = vst [vmem:[#allocation47_spill] sm:$0xff] %v7154_v42  ;;  %v1256_v17 = vmul.f32 0.1, %v1242_v10  ;;  %v1274_v48 = vsel %vm1265_vm10, %v1258_v36, 0.0  ;;  %v1370_v14 = vpack.c.bf16 %v1276_v58, %v1276_v58  ;;  %v7157_v32 = vshll.u32 %v7154_v42, 16 }
 0x271   : > { %v7152_v34 = vsel %vm1463_vm7, %v8159_v24, %v1481_v26  ;;  %v7165_v3 = vshrl.u32 %v7154_v42, 16  ;;  %v8166_v37 = vmov 0.0   ;;  %vm8167_vm0 = vmmov 0  }
 0x272   : > { %v1259_v30 = vsel %vm1253_vm9, %v1242_v10, %v1256_v17  ;;  %v2688_v53 = vrot.slane %v7157_v32, 1  ;;  %v1375_v26 = vrot.slane %v1370_v14, 1  ;;  %v3440_v54 = vrot.slane %v7109_v52, 2 }
 0x273   : > { %v1275_v20 = vsel %vm7127_vm4, %v1259_v30, 0.0  ;;  %v3444_v1 = vrot.slane %v7157_v32, 2 }
 0x274   : > { %v1369_v15 = vpack.c.bf16 %v1275_v20, %v1274_v48  ;;  %v7171_v10 = vsel %vm2629_vm2, %v2684_v28, %v2688_v53  ;;  %v2692_v29 = vor.u32 %v2688_v53, %v7165_v3  ;;  %v1665_v48 = vrot.slane %v6704_v6, 6 }
 0x275   : > { %v7161_v31 = vld [vmem:[#allocation2 + $0x50] sm:$0xff]  ;;  %8162 = vst [vmem:[#allocation49_spill] sm:$0xff] %v7171_v10 }
 0x276   : > { %8161 = vst [vmem:[#allocation48_spill] sm:$0xff] %v7161_v31  ;;  %v7168_v27 = vshll.u32 %v7161_v31, 16  ;;  %v1374_v0 = vrot.slane %v1369_v15, 1  ;;  %v7177_v24 = vshrl.u32 %v7161_v31, 16 }
 0x278   : > { %v2696_v30 = vrot.slane %v7168_v27, 1  ;;  %v1376_v43 = vsel %vm1373_vm1, %v1374_v0, %v1375_v26  ;;  %1379 = vst [vmem:[#allocation2] sm:$0x80] %v1374_v0  ;;  %v1668_v26 = vrot.slane %v6722_v21, 7  ;;  %v3447_v11 = vrot.slane %v7177_v24, 1 }
 0x279   : > { %1380 = vst [vmem:[#allocation2 + $0x8] sm:$0xff] %v1376_v43  ;;  %v1654_v58 = vshrl.u32 %v1376_v43, 16  ;;  %v1657_v28 = vshll.u32 %v1376_v43, 16  ;;  %v1465_v53 = vrot.slane %v1376_v43, 7  ;;  %v7194_v43 = vld [vmem:[#allocation2 + $0x58] sm:$0xff] }
 0x27a   : > { %v7180_v36 = vsel %vm2629_vm2, %v2692_v29, %v2696_v30  ;;  %v7183_v14 = vor.u32 %v2696_v30, %v7177_v24  ;;  %v5302_v30 = vld [vmem:[#allocation12 + $0x80] sm:$0xff]  }
 0x27b   : > { %8163 = vst [vmem:[#allocation50_spill] sm:$0xff] %v7180_v36  ;;  %v1919_v17 = vrot.slane %v1654_v58, 7  ;;  %v1656_v42 = vrot.slane %v1654_v58, 6  ;;  %v1659_v29 = vrot.slane %v1657_v28, 7  ;;  %v7988_v58 = vrot.slane %v6678_v7, 7 }
 0x27c   : > { %8164 = vst [vmem:[#allocation51_spill] sm:$0xff] %v7183_v14 }
 0x27d   : > { %v1920_v20 = vor.u32 %v1919_v17, %v1657_v28  ;;  %v7188_v15 = vsel %vm1914_vm12, %v1919_v17, %v6743_v46  ;;  %v7196_v21 = vor.u32 %v1659_v29, %v1656_v42  ;;  %v7199_v28 = vor.u32 %v1668_v26, %v1665_v48  ;;  %v5307_v48 = vld [vmem:[#allocation12 + $0xc0] sm:$0xff]  }
 0x27e   : > { %v3419_v42 = vshll.u32 %v7191_v5, 16  ;;  %v3424_v29 = vrot.slane %v6883_v4, 2 }
 0x27f   : > { %v1435_v0 = vld [vmem:[#allocation2] sm:$0x80] }
 0x280   : > { %v1409_v31 = vld [vmem:[#allocation2] sm:$0xc0]  ;;  %v1464_v36 = vrot.slane %v1435_v0, 7  ;;  %v1916_v10 = vshrl.u32 %v1435_v0, 16  ;;  %v3423_v0 = vrot.slane %v6912_v55, 1 }
 0x281   : > { %v1646_v14 = vshrl.u32 %v1409_v31, 16  ;;  %v1649_v16 = vshll.u32 %v1409_v31, 16 }
 0x282   : > { %v1466_v6 = vsel %vm1463_vm7, %v1464_v36, %v1465_v53  ;;  %v1918_v39 = vrot.slane %v1916_v10, 7  ;;  %v5303_v36 = vld [vmem:[#allocation12 + $0x88] sm:$0xff]   ;;  %v3416_v10 = vshrl.u32 %v7191_v5, 16  ;;  %v3432_v5 = vrot.slane %v7001_v25, 2 }
 0x283   : > { %v1648_v44 = vrot.slane %v1646_v14, 6  ;;  %v1651_v17 = vrot.slane %v1649_v16, 7  ;;  %4610 = vmatmul.mubr.bf16.vlgmr.msra.gmra.mrb[4].mxu1 %v1466_v6  ;;  %v1468_v14 = vsel %vm1463_vm7, %v1465_v53, %v7988_v58  ;;  %v3427_v6 = vrot.slane %v6998_v9, 1 }
 0x284   : > { %4698 = vmatpush3.bf16.msra.mxu1 %v5302_v30  ;;  %4613 = vmatprep.mubr.msk.bf16.mxu1 %vm8167_vm0, %v8166_v37  ;;  %v7205_v16 = vsel %vm1914_vm12, %v1918_v39, %v1920_v20  ;;  %v3418_v20 = vrot.slane %v3416_v10, 1  ;;  %v3421_v30 = vrot.slane %v3419_v42, 2  ;;  %v3428_v53 = vrot.slane %v6936_v22, 2 }
 0x285   : > { %v1652_v31 = vor.u32 %v1651_v17, %v1648_v44  ;;  %4699 = vmatprep.subr.bf16.mxu1 %v8166_v37  ;;  %v3425_v17 = vor.u32 %v3424_v29, %v3423_v0  ;;  %v3431_v58 = vrot.slane %v7063_v51, 1  ;;  %v5304_v44 = vld [vmem:[#allocation12 + $0x90] sm:$0xff]   ;;  %v3436_v10 = vrot.slane %v7066_v40, 2  ;;  %v5309_v0 = vld [vmem:[#allocation12 + $0xc8] sm:$0xff]  }
 0x286   : > { %v3422_v26 = vor.u32 %v3421_v30, %v3418_v20  ;;  %v3439_v42 = vrot.slane %v7124_v49, 1  ;;  %v3429_v29 = vor.u32 %v3428_v53, %v3427_v6  ;;  %v3448_v6 = vrot.slane %v7168_v27, 2 }
 0x287   : > { %v1661_v39 = vsel %vm1404_vm13, %v1652_v31, %v7196_v21  ;;  %v3435_v31 = vrot.slane %v7105_v41, 1 }
 0x288   : > { %4662 = vmatmul.mubr.bf16.vlgmr.msra.gmra.mrb[40].mxu0 %v1661_v39  ;;  %4700 = vmatpush3.bf16.msra.mxu1 %v5303_v36  ;;  %v3433_v39 = vor.u32 %v3432_v5, %v3431_v58  ;;  %v3443_v36 = vrot.slane %v7165_v3, 1  ;;  %v7232_v20 = vsel %vm3414_vm5, %v3422_v26, %v3425_v17  ;;  %v3441_v58 = vor.u32 %v3440_v54, %v3439_v42  ;;  %v5305_v26 = vld [vmem:[#allocation12 + $0x98] sm:$0xff]   ;;  %v5310_v54 = vld [vmem:[#allocation12 + $0xd0] sm:$0xff]  }
 0x289   : > { %4665 = vmatprep.mubr.msk.bf16.mxu0 %vm8167_vm0, %v8166_v37  ;;  %4701 = vmatprep.subr.bf16.mxu1 %v8166_v37  ;;  %v3437_v30 = vor.u32 %v3436_v10, %v3435_v31 }
 0x28a   : > { %4750 = vmatpush3.bf16.msra.mxu0 %v5307_v48  ;;  %v7237_v48 = vsel %vm3414_vm5, %v3425_v17, %v3429_v29  ;;  %v7240_v5 = vsel %vm3414_vm5, %v3429_v29, %v3433_v39  ;;  %v3445_v31 = vor.u32 %v3444_v1, %v3443_v36  ;;  %v8170_v17 = vshll.u32 %v7194_v43, 16 }
 0x28b   : > { %4751 = vmatprep.subr.bf16.mxu0 %v8166_v37  ;;  %4614 = vmatmul.mubr.bf16.gmra.mrb[8].mxu1 %v1468_v14  ;;  %8168 = vst [vmem:[#allocation53_spill] sm:$0xff] %v7237_v48  ;;  %v7246_v53 = vsel %vm3414_vm5, %v3433_v39, %v3437_v30  ;;  %v8169_v14 = vshrl.u32 %v7194_v43, 16  ;;  %v7254_v42 = vsel %vm3414_vm5, %v3437_v30, %v3441_v58  ;;  %v8171_v30 = vrot.slane %v6637_v60, 7 }
 0x28c   : > { %4617 = vmatprep.mubr.msk.bf16.mxu1 %vm8167_vm0, %v8166_v37  ;;  %4702 = vmatpush3.bf16.msra.mxu1 %v5304_v44  ;;  %v3452_v48 = vrot.slane %v8170_v17, 2  ;;  %v3449_v29 = vor.u32 %v3448_v6, %v3447_v11  ;;  %v1670_v44 = vsel %vm1404_vm13, %v7196_v21, %v7199_v28  ;;  %v7261_v1 = vsel %vm3414_vm5, %v3441_v58, %v3445_v31  ;;  %v5306_v11 = vld [vmem:[#allocation12 + $0xa0] sm:$0xff]   ;;  %v5312_v21 = vld [vmem:[#allocation12 + $0xd8] sm:$0xff]   ;;  %v5308_v6 = vld [vmem:[#allocation12 + $0xa8] sm:$0xff]  }
 0x28d   : > { %v3451_v10 = vrot.slane %v8169_v14, 1  ;;  %4703 = vmatprep.subr.bf16.mxu1 %v8166_v37  ;;  %v1679_v60 = vsel %vm1404_vm13, %v7199_v28, %v6753_v56  ;;  %v5314_v56 = vld [vmem:[#allocation12 + $0xb8] sm:$0xff]   ;;  %v5316_v28 = vld [vmem:[#allocation12 + $0xf0] sm:$0xff]   ;;  %v5323_v14 = vld [vmem:[#allocation12 + $0x140] sm:$0xff]  }
 0x28e   : > { %4752 = vmatpush3.bf16.msra.mxu0 %v5309_v0  ;;  %v7266_v36 = vsel %vm3414_vm5, %v3445_v31, %v3449_v29  ;;  %v5315_v31 = vld [vmem:[#allocation12 + $0xe8] sm:$0xff]  }
 0x28f   : > { %4753 = vmatprep.subr.bf16.mxu0 %v8166_v37  ;;  %v7263_v39 = vor.u32 %v3452_v48, %v3451_v10  ;;  %v8172_v48 = vrot.slane %v6678_v7, 7  ;;  %v5311_v7 = vld [vmem:[#allocation12 + $0xb0] sm:$0xff]   ;;  %v8173_v10 = vshrl.u32 %v6748_v50, 16 }
 0x290   : > { %4666 = vmatmul.mubr.bf16.gmra.mrb[44].mxu0 %v1670_v44  ;;  %4704 = vmatpush3.bf16.msra.mxu1 %v5305_v26  ;;  %v5313_v26 = vld [vmem:[#allocation12 + $0xe0] sm:$0xff]  }
 0x291   : > { %4669 = vmatprep.mubr.msk.bf16.mxu0 %vm8167_vm0, %v8166_v37  ;;  %v7272_v0 = vsel %vm3414_vm5, %v3449_v29, %v7263_v39  ;;  %4705 = vmatprep.subr.bf16.mxu1 %v8166_v37  ;;  %v1470_v58 = vsel %vm1463_vm7, %v8172_v48, %v8171_v30  ;;  %v2173_v17 = vrot.slane %v8173_v10, 7  ;;  %v8174_v29 = vshll.u32 %v6748_v50, 16  ;;  %v5322_v50 = vld [vmem:[#allocation12 + $0x120] sm:$0xff]   ;;  %v5335_v10 = vld [vmem:[#allocation12 + $0x188] sm:$0xff]  }
 0x292   : > { %4754 = vmatpush3.bf16.msra.mxu0 %v5310_v54  ;;  %v5325_v54 = vld [vmem:[#allocation12 + $0x148] sm:$0xff]   ;;  %v2181_v30 = vrot.slane %v6912_v55, 7  ;;  %v5329_v55 = vld [vmem:[#allocation12 + $0x160] sm:$0xff]   ;;  %vm1403_vm7 = vcmask 1041409  }
 0x293   : > { %4755 = vmatprep.subr.bf16.mxu0 %v8166_v37  ;;  %4618 = vmatmul.mubr.bf16.gmra.mrb[12].mxu1 %v1470_v58  ;;  %v2176_v44 = vor.u32 %v8174_v29, %v2173_v17  ;;  %vm1405_vm11 = vmand %vm1403_vm7, %vm1404_vm13  ;;  %v5359_v29 = vld [vmem:[#allocation2 + $0x18] sm:$0xff] }
 0x294   : > { %4621 = vmatprep.mubr.msk.bf16.mxu1 %vm8167_vm0, %v8166_v37  ;;  %4706 = vmatpush3.bf16.msra.mxu1 %v5306_v11  ;;  %v5326_v11 = vld [vmem:[#allocation12 + $0x150] sm:$0xff]   ;;  %v2184_v48 = vor.u32 %v6883_v4, %v2181_v30  ;;  %v5331_v4 = vld [vmem:[#allocation12 + $0x168] sm:$0xff]  }
 0x295   : > { %4707 = vmatprep.subr.bf16.mxu1 %v8166_v37 }
 0x296   : > { %4756 = vmatpush3.bf16.msra.mxu0 %v5312_v21  ;;  %v2177_v21 = vsel %vm1914_vm12, %v6725_v35, %v2176_v44  ;;  %v5324_v35 = vld [vmem:[#allocation12 + $0x128] sm:$0xff]   ;;  %v2185_v58 = vsel %vm1914_vm12, %v2173_v17, %v2184_v48  ;;  %v5339_v17 = vld [vmem:[#allocation12 + $0x1c0] sm:$0xff]   ;;  %v5337_v44 = vld [vmem:[#allocation12 + $0x198] sm:$0xff]  }
 0x297   : > { %4757 = vmatprep.subr.bf16.mxu0 %v8166_v37  ;;  %v5345_v48 = vld [vmem:[#allocation12 + $0x1e0] sm:$0xff]  }
 0x298   : > { %4670 = vmatmul.mubr.bf16.gmra.mrb[48].mxu0 %v1679_v60  ;;  %4708 = vmatpush3.bf16.msra.mxu1 %v5308_v6  ;;  %v2189_v6 = vrot.slane %v6998_v9, 7  ;;  %v5330_v9 = vld [vmem:[#allocation12 + $0x138] sm:$0xff]   ;;  %v5332_v60 = vld [vmem:[#allocation12 + $0x170] sm:$0xff]  }
 0x299   : > { %4673 = vmatprep.mubr.msk.bf16.mxu0 %vm8167_vm0, %v8166_v37  ;;  %4709 = vmatprep.subr.bf16.mxu1 %v8166_v37 }
 0x29a   : > { %4758 = vmatpush3.bf16.msra.mxu0 %v5313_v26  ;;  %v2192_v26 = vor.u32 %v6936_v22, %v2189_v6 }
 0x29b   : > { %4759 = vmatprep.subr.bf16.mxu0 %v8166_v37  ;;  %4622 = vmatmul.mubr.bf16.gmra.mrb[16].mxu1 %v6779_v2  ;;  %v5317_v2 = vld [vmem:[#allocation12 + $0xf8] sm:$0xff]  }
 0x29c   : > { %4625 = vmatprep.mubr.msk.bf16.mxu1 %vm8167_vm0, %v8166_v37  ;;  %4710 = vmatpush3.bf16.msra.mxu1 %v5311_v7  ;;  %v2193_v7 = vsel %vm1914_vm12, %v2181_v30, %v2192_v26  ;;  %v5344_v30 = vld [vmem:[#allocation12 + $0x1d8] sm:$0xff]   ;;  %v8181_v26 = vld [vmem:[#allocation42_spill] sm:$0xff] }
 0x29d   : > { %4711 = vmatprep.subr.bf16.mxu1 %v8166_v37 }
 0x29e   : > { %4760 = vmatpush3.bf16.msra.mxu0 %v5315_v31  ;;  %v2197_v31 = vrot.slane %v7063_v51, 7 }
 0x29f   : > { %4761 = vmatprep.subr.bf16.mxu0 %v8166_v37 }
 0x2a0   : > { %4674 = vmatmul.mubr.bf16.gmra.mrb[52].mxu0 %v6825_v47  ;;  %4712 = vmatpush3.bf16.msra.mxu1 %v5314_v56  ;;  %v1726_v47 = vshrl.u32 %v7137_v45, 16  ;;  %v2200_v22 = vor.u32 %v7001_v25, %v2197_v31  ;;  %v2205_v56 = vrot.slane %v7105_v41, 7 }
 0x2a1   : > { %4677 = vmatprep.mubr.msk.bf16.mxu0 %vm8167_vm0, %v8166_v37  ;;  %4801 = vmatprep.subr.bf16.mxu1 %v8166_v37 }
 0x2a2   : > { %4762 = vmatpush3.bf16.msra.mxu0 %v5316_v28  ;;  %v2201_v51 = vsel %vm1914_vm12, %v2189_v6, %v2200_v22  ;;  %v2208_v25 = vor.u32 %v7066_v40, %v2205_v56  ;;  %v2213_v28 = vrot.slane %v7124_v49, 7  ;;  %v2221_v40 = vrot.slane %v7165_v3, 7  ;;  %v7461_v6 = vld [vmem:[#allocation2 + $0x28] sm:$0xff]  ;;  %v8186_v22 = vld [vmem:[#allocation43_spill] sm:$0xff] }
 0x2a3   : > { %4763 = vmatprep.subr.bf16.mxu0 %v8166_v37  ;;  %4626 = vmatmul.mubr.bf16.gmra.mrb[20].mxu1 %v6868_v19  ;;  %v1729_v19 = vshll.u32 %v7137_v45, 16  ;;  %v2229_v3 = vrot.slane %v7177_v24, 7 }
 0x2a4   : > { %4629 = vmatprep.mubr.msk.bf16.mxu1 %vm8167_vm0, %v8166_v37  ;;  %v2216_v41 = vor.u32 %v7109_v52, %v2213_v28  ;;  %v2224_v49 = vor.u32 %v7157_v32, %v2221_v40  ;;  %v1406_v52 = vld [vmem:[#allocation2 + $0x60] sm:$0x2]  ;;  %v8177_v32 = vld [vmem:[#allocation41_spill] sm:$0xff] }
 0x2a6   : > { %4764 = vmatpush3.bf16.msra.mxu0 %v5317_v2  ;;  %v8175_v2 = vld [vmem:[#allocation40_spill] sm:$0xff] }
 0x2a7   : > { %4853 = vmatprep.subr.bf16.mxu0 %v8166_v37 }
 0x2a8   : > { %4678 = vmatmul.mubr.bf16.gmra.mrb[56].mxu0 %v6897_v13  ;;  %v1728_v13 = vrot.slane %v1726_v47, 6  ;;  %v8176_v47 = vld [vmem:[#allocation44_spill] sm:$0xff] }
 0x2a9   : > { %4681 = vmatprep.mubr.msk.bf16.mxu0 %vm8167_vm0, %v8166_v37 }
 0x2ab   : > { %4630 = vmatmul.mubr.bf16.gmra.mrb[24].mxu1 %v6924_v61  ;;  %v1731_v61 = vrot.slane %v1729_v19, 7  ;;  %v1407_v19 = vsel %vm1405_vm11, 0, %v1406_v52 }
 0x2ac   : > { %4633 = vmatprep.mubr.msk.bf16.mxu1 %vm8167_vm0, %v8166_v37  ;;  %1408 = vst [vmem:[#allocation2 + $0x60] sm:$0x2] %v1407_v19  ;;  %v5350_v19 = vld [vmem:[#allocation12 + $0x200] sm:$0xff]  }
 0x2b0   : > { %4682 = vmatmul.mubr.bf16.gmra.mrb[60].mxu0 %v6966_v33  ;;  %v1732_v33 = vor.u32 %v1731_v61, %v1728_v13  ;;  %v2225_v13 = vsel %vm1914_vm12, %v2213_v28, %v2224_v49  ;;  %v1950_v61 = vsel %vm1914_vm12, %v8177_v32, %v2224_v49  ;;  %v8189_v28 = vld [vmem:[#allocation50_spill] sm:$0xff] }
 0x2b1   : > { %4685 = vmatprep.mubr.msk.bf16.mxu0 %vm8167_vm0, %v8166_v37 }
 0x2b3   : > { %4634 = vmatmul.mubr.bf16.gmra.mrb[28].mxu1 %v6994_v18  ;;  %v2131_v18 = vld [vmem:[#allocation2 + $0x8] sm:$0x80] }
 0x2b4   : > { %4637 = vmatprep.mubr.msk.bf16.mxu1 %vm8167_vm0, %v8166_v37  ;;  %v2159_v45 = vshrl.u32 %v2131_v18, 16  ;;  %v3396_v18 = vld [vmem:[#allocation2 + $0x60] sm:$0x3] }
 0x2b8   : > { %4686 = vmatmul.mubr.bf16.gmra.mrb[64].mxu0 %v7027_v23  ;;  %v1733_v23 = vsel %vm1404_vm13, %v7080_v62, %v1732_v33  ;;  %v2232_v33 = vor.u32 %v7168_v27, %v2229_v3 }
 0x2b9   : > { %4689 = vmatprep.mubr.msk.bf16.mxu0 %vm8167_vm0, %v8166_v37 }
 0x2bb   : > { %4638 = vmatmul.mubr.bf16.gmra.mrb[32].mxu1 %v7058_v12  ;;  %v5318_v12 = vld [vmem:[#allocation12 + $0x100] sm:$0xff]  }
 0x2bc   : > { %4641 = vmatprep.mubr.msk.bf16.mxu1 %vm8167_vm0, %v8166_v37 }
 0x2c0   : > { %4690 = vmatmul.mubr.bf16.gmra.mrb[68].mxu0 %v7090_v57  ;;  %v2161_v57 = vrot.slane %v2159_v45, 7  ;;  %v3459_v45 = vshll.u32 %v3396_v18, 16 }
 0x2c1   : > { %4693 = vmatprep.mubr.msk.bf16.mxu0 %vm8167_vm0, %v8166_v37 }
 0x2c2   : > { %v2169_v62 = vsel %vm1914_vm12, %v2161_v57, %v6743_v46  ;;  %v5321_v46 = vld [vmem:[#allocation12 + $0x118] sm:$0xff]   ;;  %v3461_v57 = vrot.slane %v3459_v45, 2 }
 0x2c3   : > { %4642 = vmatmul.mubr.bf16.gmra.mrb[36].mxu1 %v7152_v34  ;;  %v5319_v34 = vld [vmem:[#allocation12 + $0x108] sm:$0xff]  }
 0x2c4   : > { %4713 = vmatprep.mubr.msk.bf16.mxu1 %vm8167_vm0, %v8166_v37 }
 0x2c8   : > { %4694 = vmatmul.mubr.bf16.gmra.mrb[72].mxu0 %v1733_v23  ;;  %v3456_v23 = vshrl.u32 %v3396_v18, 16 }
 0x2c9   : > { %4765 = vmatprep.mubr.msk.bf16.mxu0 %vm8167_vm0, %v8166_v37 }
 0x2ca   : > { %v3458_v24 = vrot.slane %v3456_v23, 1  ;;  %v8192_v23 = vld [vmem:[#allocation52_spill] sm:$0xff] }
 0x2cb   : > { %4714 = vmatmul.mubr.bf16.vlgmr.msra.gmra.mrb[40].mxu1 %v7205_v16  ;;  %v5320_v16 = vld [vmem:[#allocation12 + $0x110] sm:$0xff]   ;;  %v3197_v45 = vrot.slane %v8192_v23, 1 }
 0x2cc   : > { %4802 = vmatpush3.bf16.msra.mxu1 %v5318_v12  ;;  %4717 = vmatprep.mubr.msk.bf16.mxu1 %vm8167_vm0, %v8166_v37  ;;  %v2233_v12 = vsel %vm1914_vm12, %v2221_v40, %v2232_v33  ;;  %v8191_v40 = vld [vmem:[#allocation51_spill] sm:$0xff] }
 0x2cd   : > { %4803 = vmatprep.subr.bf16.mxu1 %v8166_v37 }
 0x2d0   : > { %4766 = vmatmul.mubr.bf16.vlgmr.msra.gmra.mrb[76].mxu0 %v2169_v62  ;;  %4804 = vmatpush3.bf16.msra.mxu1 %v5319_v34  ;;  %v5334_v34 = vld [vmem:[#allocation12 + $0x180] sm:$0xff]  }
 0x2d1   : > { %4769 = vmatprep.mubr.msk.bf16.mxu0 %vm8167_vm0, %v8166_v37  ;;  %4805 = vmatprep.subr.bf16.mxu1 %v8166_v37  ;;  %v5358_v62 = vld [vmem:[#allocation2 + $0x10] sm:$0xff] }
 0x2d2   : > { %4854 = vmatpush3.bf16.msra.mxu0 %v5323_v14  ;;  %v3462_v14 = vor.u32 %v3461_v57, %v3458_v24 }
 0x2d3   : > { %4855 = vmatprep.subr.bf16.mxu0 %v8166_v37  ;;  %4718 = vmatmul.mubr.bf16.gmra.mrb[44].mxu1 %v7188_v15  ;;  %v5328_v15 = vld [vmem:[#allocation12 + $0x158] sm:$0xff]  }
 0x2d4   : > { %4721 = vmatprep.mubr.msk.bf16.mxu1 %vm8167_vm0, %v8166_v37  ;;  %4806 = vmatpush3.bf16.msra.mxu1 %v5320_v16  ;;  %v7430_v27 = vsel %vm3414_vm5, %v7263_v39, %v3462_v14  ;;  %v8178_v16 = vld [vmem:[#allocation35_spill] sm:$0xff]  ;;  %v5341_v39 = vld [vmem:[#allocation12 + $0x1c8] sm:$0xff]  }
 0x2d5   : > { %4807 = vmatprep.subr.bf16.mxu1 %v8166_v37 }
 0x2d6   : > { %4856 = vmatpush3.bf16.msra.mxu0 %v5325_v54  ;;  %v5336_v54 = vld [vmem:[#allocation12 + $0x190] sm:$0xff]  }
 0x2d7   : > { %4857 = vmatprep.subr.bf16.mxu0 %v8166_v37 }
 0x2d8   : > { %4770 = vmatmul.mubr.bf16.gmra.mrb[80].mxu0 %v2177_v21  ;;  %4808 = vmatpush3.bf16.msra.mxu1 %v5321_v46  ;;  %v5342_v46 = vld [vmem:[#allocation12 + $0x1d0] sm:$0xff]   ;;  %v5338_v21 = vld [vmem:[#allocation12 + $0x1a0] sm:$0xff]  }
 0x2d9   : > { %4773 = vmatprep.mubr.msk.bf16.mxu0 %vm8167_vm0, %v8166_v37  ;;  %4809 = vmatprep.subr.bf16.mxu1 %v8166_v37 }
 0x2da   : > { %4858 = vmatpush3.bf16.msra.mxu0 %v5326_v11  ;;  %v8179_v11 = vld [vmem:[#allocation36_spill] sm:$0xff] }
 0x2db   : > { %4859 = vmatprep.subr.bf16.mxu0 %v8166_v37  ;;  %4722 = vmatmul.mubr.bf16.gmra.mrb[48].mxu1 %v6786_v8  ;;  %v5327_v8 = vld [vmem:[#allocation12 + $0x130] sm:$0xff]  }
 0x2dc   : > { %4725 = vmatprep.mubr.msk.bf16.mxu1 %vm8167_vm0, %v8166_v37  ;;  %4810 = vmatpush3.bf16.msra.mxu1 %v5322_v50  ;;  %v7449_v50 = vld [vmem:[#allocation2 + $0x20] sm:$0xff] }
 0x2dd   : > { %4811 = vmatprep.subr.bf16.mxu1 %v8166_v37  ;;  %v3198_v32 = vrot.slane %v7449_v50, 1 }
 0x2de   : > { %4860 = vmatpush3.bf16.msra.mxu0 %v5328_v15  ;;  %v5340_v15 = vld [vmem:[#allocation12 + $0x1a8] sm:$0xff]  }
 0x2df   : > { %4861 = vmatprep.subr.bf16.mxu0 %v8166_v37  ;;  %v3199_v14 = vsel %vm1373_vm1, %v3197_v45, %v3198_v32 }
 0x2e0   : > { %4774 = vmatmul.mubr.bf16.gmra.mrb[84].mxu0 %v2185_v58  ;;  %4812 = vmatpush3.bf16.msra.mxu1 %v5324_v35  ;;  %v8180_v35 = vld [vmem:[#allocation38_spill] sm:$0xff] }
 0x2e1   : > { %4777 = vmatprep.mubr.msk.bf16.mxu0 %vm8167_vm0, %v8166_v37  ;;  %4813 = vmatprep.subr.bf16.mxu1 %v8166_v37  ;;  %v5347_v58 = vld [vmem:[#allocation12 + $0x1e8] sm:$0xff]  }
 0x2e2   : > { %4862 = vmatpush3.bf16.msra.mxu0 %v5329_v55  ;;  %v5343_v55 = vld [vmem:[#allocation12 + $0x1b0] sm:$0xff]  }
 0x2e3   : > { %4863 = vmatprep.subr.bf16.mxu0 %v8166_v37  ;;  %4726 = vmatmul.mubr.bf16.gmra.mrb[52].mxu1 %v6875_v63  ;;  %v5333_v63 = vld [vmem:[#allocation12 + $0x178] sm:$0xff]  }
 0x2e4   : > { %4729 = vmatprep.mubr.msk.bf16.mxu1 %vm8167_vm0, %v8166_v37  ;;  %4814 = vmatpush3.bf16.msra.mxu1 %v5327_v8  ;;  %v5346_v8 = vld [vmem:[#allocation12 + $0x1b8] sm:$0xff]  }
 0x2e5   : > { %4815 = vmatprep.subr.bf16.mxu1 %v8166_v37 }
 0x2e6   : > { %4864 = vmatpush3.bf16.msra.mxu0 %v5331_v4  ;;  %v5348_v4 = vld [vmem:[#allocation12 + $0x1f0] sm:$0xff]  }
 0x2e7   : > { %4865 = vmatprep.subr.bf16.mxu0 %v8166_v37 }
 0x2e8   : > { %4778 = vmatmul.mubr.bf16.gmra.mrb[88].mxu0 %v2193_v7  ;;  %4816 = vmatpush3.bf16.msra.mxu1 %v5330_v9  ;;  %v5349_v9 = vld [vmem:[#allocation12 + $0x1f8] sm:$0xff]   ;;  %v8183_v7 = vld [vmem:[#allocation45_spill] sm:$0xff] }
 0x2e9   : > { %4781 = vmatprep.mubr.msk.bf16.mxu0 %vm8167_vm0, %v8166_v37  ;;  %4905 = vmatprep.subr.bf16.mxu1 %v8166_v37 }
 0x2ea   : > { %4866 = vmatpush3.bf16.msra.mxu0 %v5332_v60  ;;  %v8182_v60 = vld [vmem:[#allocation37_spill] sm:$0xff] }
 0x2eb   : > { %4867 = vmatprep.subr.bf16.mxu0 %v8166_v37  ;;  %4730 = vmatmul.mubr.bf16.gmra.mrb[56].mxu1 %v6940_v59  ;;  %v2209_v59 = vsel %vm1914_vm12, %v2197_v31, %v2208_v25  ;;  %v8184_v31 = vld [vmem:[#allocation39_spill] sm:$0xff]  ;;  %v2611_v25 = vld [vmem:[#allocation2 + $0x58] sm:$0x1] }
 0x2ec   : > { %4733 = vmatprep.mubr.msk.bf16.mxu1 %vm8167_vm0, %v8166_v37 }
 0x2ee   : > { %4868 = vmatpush3.bf16.msra.mxu0 %v5333_v63  ;;  %v8185_v63 = vld [vmem:[#allocation46_spill] sm:$0xff] }
 0x2ef   : > { %4957 = vmatprep.subr.bf16.mxu0 %v8166_v37 }
 0x2f0   : > { %4782 = vmatmul.mubr.bf16.gmra.mrb[92].mxu0 %v2201_v51  ;;  %v8187_v51 = vld [vmem:[#allocation49_spill] sm:$0xff] }
 0x2f1   : > { %4785 = vmatprep.mubr.msk.bf16.mxu0 %vm8167_vm0, %v8166_v37 }
 0x2f3   : > { %4734 = vmatmul.mubr.bf16.gmra.mrb[60].mxu1 %v7005_v38  ;;  %v2217_v38 = vsel %vm1914_vm12, %v2205_v56, %v2216_v41  ;;  %v8188_v56 = vld [vmem:[#allocation47_spill] sm:$0xff] }
 0x2f4   : > { %4737 = vmatprep.mubr.msk.bf16.mxu1 %vm8167_vm0, %v8166_v37 }
 0x2f8   : > { %4786 = vmatmul.mubr.bf16.gmra.mrb[96].mxu0 %v2209_v59  ;;  %v2702_v59 = vshll.u32 %v2611_v25, 16 }
 0x2f9   : > { %4789 = vmatprep.mubr.msk.bf16.mxu0 %vm8167_vm0, %v8166_v37 }
 0x2fa   : > { %v2704_v41 = vrot.slane %v2702_v59, 1 }
 0x2fb   : > { %4738 = vmatmul.mubr.bf16.gmra.mrb[64].mxu1 %v8175_v2  ;;  %v8190_v2 = vld [vmem:[#allocation48_spill] sm:$0xff] }
 0x2fc   : > { %4741 = vmatprep.mubr.msk.bf16.mxu1 %vm8167_vm0, %v8166_v37  ;;  %v2705_v49 = vsel %vm2629_vm2, %v8191_v40, %v2704_v41 }
 0x300   : > { %4790 = vmatmul.mubr.bf16.gmra.mrb[100].mxu0 %v2217_v38 }
 0x301   : > { %4793 = vmatprep.mubr.msk.bf16.mxu0 %vm8167_vm0, %v8166_v37 }
 0x303   : > { %4742 = vmatmul.mubr.bf16.gmra.mrb[68].mxu1 %v8176_v47 }
 0x304   : > { %4745 = vmatprep.mubr.msk.bf16.mxu1 %vm8167_vm0, %v8166_v37 }
 0x308   : > { %4794 = vmatmul.mubr.bf16.gmra.mrb[104].mxu0 %v2225_v13 }
 0x309   : > { %4797 = vmatprep.mubr.msk.bf16.mxu0 %vm8167_vm0, %v8166_v37 }
 0x30b   : > { %4746 = vmatmul.mubr.bf16.gmra.mrb[72].mxu1 %v1950_v61 }
 0x30c   : > { %4817 = vmatprep.mubr.msk.bf16.mxu1 %vm8167_vm0, %v8166_v37 }
 0x310   : > { %4798 = vmatmul.mubr.bf16.gmra.mrb[108].mxu0 %v2233_v12  ;;  %v5351_v12 = vld [vmem:[#allocation12 + $0x208] sm:$0xff]  }
 0x311   : > { %4869 = vmatprep.mubr.msk.bf16.mxu0 %vm8167_vm0, %v8166_v37 }
 0x313   : > { %4818 = vmatmul.mubr.bf16.vlgmr.msra.gmra.mrb[76].mxu1 %v5358_v62 }
 0x314   : > { %4906 = vmatpush3.bf16.msra.mxu1 %v5334_v34  ;;  %4821 = vmatprep.mubr.msk.bf16.mxu1 %vm8167_vm0, %v8166_v37 }
 0x315   : > { %4907 = vmatprep.subr.bf16.mxu1 %v8166_v37 }
 0x318   : > { %4870 = vmatmul.mubr.bf16.vlgmr.msra.gmra.mrb[112].mxu0 %v8178_v16  ;;  %4908 = vmatpush3.bf16.msra.mxu1 %v5335_v10 }
 0x319   : > { %4873 = vmatprep.mubr.msk.bf16.mxu0 %vm8167_vm0, %v8166_v37  ;;  %4909 = vmatprep.subr.bf16.mxu1 %v8166_v37 }
 0x31a   : > { %4958 = vmatpush3.bf16.msra.mxu0 %v5339_v17  ;;  %v5352_v17 = vld [vmem:[#allocation12 + $0x210] sm:$0xff]  }
 0x31b   : > { %4959 = vmatprep.subr.bf16.mxu0 %v8166_v37  ;;  %4822 = vmatmul.mubr.bf16.gmra.mrb[80].mxu1 %v5359_v29 }
 0x31c   : > { %4825 = vmatprep.mubr.msk.bf16.mxu1 %vm8167_vm0, %v8166_v37  ;;  %4910 = vmatpush3.bf16.msra.mxu1 %v5336_v54 }
 0x31d   : > { %4911 = vmatprep.subr.bf16.mxu1 %v8166_v37 }
 0x31e   : > { %4960 = vmatpush3.bf16.msra.mxu0 %v5341_v39  ;;  %v3200_v39 = vrot.slane %v7461_v6, 1 }
 0x31f   : > { %4961 = vmatprep.subr.bf16.mxu0 %v8166_v37 }
 0x320   : > { %4874 = vmatmul.mubr.bf16.gmra.mrb[116].mxu0 %v8179_v11  ;;  %4912 = vmatpush3.bf16.msra.mxu1 %v5337_v44 }
 0x321   : > { %4877 = vmatprep.mubr.msk.bf16.mxu0 %vm8167_vm0, %v8166_v37  ;;  %4913 = vmatprep.subr.bf16.mxu1 %v8166_v37 }
 0x322   : > { %4962 = vmatpush3.bf16.msra.mxu0 %v5342_v46 }
 0x323   : > { %4963 = vmatprep.subr.bf16.mxu0 %v8166_v37  ;;  %4826 = vmatmul.mubr.bf16.gmra.mrb[84].mxu1 %v7449_v50 }
 0x324   : > { %4829 = vmatprep.mubr.msk.bf16.mxu1 %vm8167_vm0, %v8166_v37  ;;  %4914 = vmatpush3.bf16.msra.mxu1 %v5338_v21 }
 0x325   : > { %4915 = vmatprep.subr.bf16.mxu1 %v8166_v37 }
 0x326   : > { %4964 = vmatpush3.bf16.msra.mxu0 %v5344_v30 }
 0x327   : > { %4965 = vmatprep.subr.bf16.mxu0 %v8166_v37 }
 0x328   : > { %4878 = vmatmul.mubr.bf16.gmra.mrb[120].mxu0 %v8180_v35  ;;  %4916 = vmatpush3.bf16.msra.mxu1 %v5340_v15  ;;  %v3201_v15 = vsel %vm1373_vm1, %v3198_v32, %v3200_v39 }
 0x329   : > { %4881 = vmatprep.mubr.msk.bf16.mxu0 %vm8167_vm0, %v8166_v37  ;;  %4917 = vmatprep.subr.bf16.mxu1 %v8166_v37 }
 0x32a   : > { %4966 = vmatpush3.bf16.msra.mxu0 %v5345_v48 }
 0x32b   : > { %4967 = vmatprep.subr.bf16.mxu0 %v8166_v37  ;;  %4830 = vmatmul.mubr.bf16.gmra.mrb[88].mxu1 %v7461_v6 }
 0x32c   : > { %4833 = vmatprep.mubr.msk.bf16.mxu1 %vm8167_vm0, %v8166_v37  ;;  %4918 = vmatpush3.bf16.msra.mxu1 %v5343_v55 }
 0x32d   : > { %4919 = vmatprep.subr.bf16.mxu1 %v8166_v37 }
 0x32e   : > { %4968 = vmatpush3.bf16.msra.mxu0 %v5347_v58 }
 0x32f   : > { %4969 = vmatprep.subr.bf16.mxu0 %v8166_v37 }
 0x330   : > { %4882 = vmatmul.mubr.bf16.gmra.mrb[124].mxu0 %v8181_v26  ;;  %4920 = vmatpush3.bf16.msra.mxu1 %v5346_v8  ;;  %v5362_v8 = vld [vmem:[#allocation2 + $0x30] sm:$0xff] }
 0x331   : > { %4885 = vmatprep.mubr.msk.bf16.mxu0 %vm8167_vm0, %v8166_v37  ;;  %5009 = vmatprep.subr.bf16.mxu1 %v8166_v37 }
 0x332   : > { %4970 = vmatpush3.bf16.msra.mxu0 %v5348_v4  ;;  %v3202_v4 = vrot.slane %v5362_v8, 1 }
 0x333   : > { %4971 = vmatprep.subr.bf16.mxu0 %v8166_v37  ;;  %4834 = vmatmul.mubr.bf16.gmra.mrb[92].mxu1 %v8182_v60 }
 0x334   : > { %4837 = vmatprep.mubr.msk.bf16.mxu1 %vm8167_vm0, %v8166_v37  ;;  %v3203_v41 = vsel %vm1373_vm1, %v3200_v39, %v3202_v4 }
 0x336   : > { %4972 = vmatpush3.bf16.msra.mxu0 %v5349_v9 }
 0x338   : > { %4886 = vmatmul.mubr.bf16.gmra.mrb[128].mxu0 %v8183_v7 }
 0x339   : > { %4889 = vmatprep.mubr.msk.bf16.mxu0 %vm8167_vm0, %v8166_v37 }
 0x33b   : > { %4838 = vmatmul.mubr.bf16.gmra.mrb[96].mxu1 %v8184_v31 }
 0x33c   : > { %4841 = vmatprep.mubr.msk.bf16.mxu1 %vm8167_vm0, %v8166_v37 }
 0x340   : > { %4890 = vmatmul.mubr.bf16.gmra.mrb[132].mxu0 %v8185_v63 }
 0x341   : > { %4893 = vmatprep.mubr.msk.bf16.mxu0 %vm8167_vm0, %v8166_v37 }
 0x343   : > { %4842 = vmatmul.mubr.bf16.gmra.mrb[100].mxu1 %v8186_v22  ;;  %v5355_v22 = vld [vmem:[#allocation12 + $0x228] sm:$0xff]  }
 0x344   : > { %4845 = vmatprep.mubr.msk.bf16.mxu1 %vm8167_vm0, %v8166_v37 }
 0x348   : > { %4894 = vmatmul.mubr.bf16.gmra.mrb[136].mxu0 %v8187_v51 }
 0x349   : > { %4897 = vmatprep.mubr.msk.bf16.mxu0 %vm8167_vm0, %v8166_v37 }
 0x34b   : > { %4846 = vmatmul.mubr.bf16.gmra.mrb[104].mxu1 %v8188_v56 }
 0x34c   : > { %4849 = vmatprep.mubr.msk.bf16.mxu1 %vm8167_vm0, %v8166_v37 }
 0x350   : > { %4898 = vmatmul.mubr.bf16.gmra.mrb[140].mxu0 %v8189_v28 }
 0x351   : > { %4901 = vmatprep.mubr.msk.bf16.mxu0 %vm8167_vm0, %v8166_v37 }
 0x353   : > { %4850 = vmatmul.mubr.bf16.gmra.mrb[108].mxu1 %v8190_v2 }
 0x354   : > { %4921 = vmatprep.mubr.msk.bf16.mxu1 %vm8167_vm0, %v8166_v37 }
 0x356   : > { %v1574_v38 = vpop.f32.mrb[4].mxu1 }
 0x357   : > { %v4611_v47 = vpop.f32.mrb[5].mxu1 }
 0x358   : > { %4902 = vmatmul.mubr.bf16.gmra.mrb[144].mxu0 %v2705_v49  ;;  %v1577_v52 = vpop.f32.mrb[6].mxu1 }
 0x359   : > { %4973 = vmatprep.mubr.msk.bf16.mxu0 %vm8167_vm0, %v8166_v37  ;;  %v4612_v13 = vpop.f32.mrb[7].mxu1 }
 0x35b   : > { %v1825_v3 = vpop.f32.mrb[40].mxu0  ;;  %4922 = vmatmul.mubr.bf16.vlgmr.msra.gmra.mrb[112].mxu1 %v8179_v11  ;;  %v5353_v11 = vld [vmem:[#allocation12 + $0x218] sm:$0xff]  }
 0x35c   : > { %v7505_v61 = vadd.f32 %v1825_v3, %v1574_v38  ;;  %v4663_v33 = vpop.f32.mrb[41].mxu0  ;;  %5010 = vmatpush3.bf16.msra.mxu1 %v5350_v19  ;;  %4925 = vmatprep.mubr.msk.bf16.mxu1 %vm8167_vm0, %v8166_v37 }
 0x35d   : > { %v1828_v18 = vpop.f32.mrb[42].mxu0  ;;  %5011 = vmatprep.subr.bf16.mxu1 %v8166_v37  ;;  %v5357_v33 = vld [vmem:[#allocation12 + $0x238] sm:$0xff]  }
 0x35e   : > { %v7511_v24 = vadd.f32 %v1828_v18, %v1577_v52  ;;  %v4664_v57 = vpop.f32.mrb[43].mxu0  ;;  %v1582_v34 = vpop.f32.mrb[8].mxu1  ;;  %v5363_v52 = vld [vmem:[#allocation2 + $0x38] sm:$0xff] }
 0x35f   : > { %v4615_v62 = vpop.f32.mrb[9].mxu1  ;;  %v3204_v19 = vrot.slane %v5363_v52, 1 }
 0x360   : > { %4974 = vmatmul.mubr.bf16.vlgmr.msra.gmra.mrb[148].mxu0 %v3199_v14  ;;  %v1585_v10 = vpop.f32.mrb[10].mxu1  ;;  %5012 = vmatpush3.bf16.msra.mxu1 %v5351_v12  ;;  %v5364_v62 = vld [vmem:[#allocation2 + $0x40] sm:$0xff] }
 0x361   : > { %4977 = vmatprep.mubr.msk.bf16.mxu0 %vm8167_vm0, %v8166_v37  ;;  %v4616_v16 = vpop.f32.mrb[11].mxu1  ;;  %5013 = vmatprep.subr.bf16.mxu1 %v8166_v37  ;;  %v3205_v12 = vsel %vm1373_vm1, %v3202_v4, %v3204_v19 }
 0x363   : > { %v1833_v54 = vpop.f32.mrb[44].mxu0  ;;  %4926 = vmatmul.mubr.bf16.gmra.mrb[116].mxu1 %v8180_v35  ;;  %v5354_v35 = vld [vmem:[#allocation12 + $0x220] sm:$0xff]  }
 0x364   : > { %v7519_v29 = vadd.f32 %v1833_v54, %v1582_v34  ;;  %v4667_v44 = vpop.f32.mrb[45].mxu0  ;;  %4929 = vmatprep.mubr.msk.bf16.mxu1 %vm8167_vm0, %v8166_v37  ;;  %5014 = vmatpush3.bf16.msra.mxu1 %v5352_v17 }
 0x365   : > { %v1836_v46 = vpop.f32.mrb[46].mxu0  ;;  %5015 = vmatprep.subr.bf16.mxu1 %v8166_v37 }
 0x366   : > { %v7524_v21 = vadd.f32 %v1836_v46, %v1585_v10  ;;  %v4668_v30 = vpop.f32.mrb[47].mxu0  ;;  %v1590_v50 = vpop.f32.mrb[12].mxu1  ;;  %v3206_v10 = vrot.slane %v5364_v62, 1 }
 0x367   : > { %v4619_v48 = vpop.f32.mrb[13].mxu1 }
 0x368   : > { %4978 = vmatmul.mubr.bf16.gmra.mrb[152].mxu0 %v3201_v15  ;;  %v1593_v55 = vpop.f32.mrb[14].mxu1  ;;  %5016 = vmatpush3.bf16.msra.mxu1 %v5353_v11  ;;  %v3207_v11 = vsel %vm1373_vm1, %v3204_v19, %v3206_v10 }
 0x369   : > { %4981 = vmatprep.mubr.msk.bf16.mxu0 %vm8167_vm0, %v8166_v37  ;;  %v4620_v58 = vpop.f32.mrb[15].mxu1  ;;  %5017 = vmatprep.subr.bf16.mxu1 %v8166_v37 }
 0x36b   : > { %v1841_v6 = vpop.f32.mrb[48].mxu0  ;;  %4930 = vmatmul.mubr.bf16.gmra.mrb[120].mxu1 %v8181_v26  ;;  %v5356_v26 = vld [vmem:[#allocation12 + $0x230] sm:$0xff]  }
 0x36c   : > { %v7531_v9 = vadd.f32 %v1841_v6, %v1590_v50  ;;  %v4671_v60 = vpop.f32.mrb[49].mxu0  ;;  %4933 = vmatprep.mubr.msk.bf16.mxu1 %vm8167_vm0, %v8166_v37  ;;  %5018 = vmatpush3.bf16.msra.mxu1 %v5354_v35 }
 0x36d   : > { %v1844_v31 = vpop.f32.mrb[50].mxu0  ;;  %5019 = vmatprep.subr.bf16.mxu1 %v8166_v37 }
 0x36e   : > { %v7536_v56 = vadd.f32 %v1844_v31, %v1593_v55  ;;  %v4672_v25 = vpop.f32.mrb[51].mxu0  ;;  %v1598_v59 = vpop.f32.mrb[16].mxu1  ;;  %v5365_v55 = vld [vmem:[#allocation2 + $0x48] sm:$0xff] }
 0x36f   : > { %v4623_v2 = vpop.f32.mrb[17].mxu1 }
 0x370   : > { %4982 = vmatmul.mubr.bf16.gmra.mrb[156].mxu0 %v3203_v41  ;;  %v1601_v38 = vpop.f32.mrb[18].mxu1  ;;  %5020 = vmatpush3.bf16.msra.mxu1 %v5355_v22  ;;  %v5366_v2 = vld [vmem:[#allocation2 + $0x50] sm:$0xff] }
 0x371   : > { %4985 = vmatprep.mubr.msk.bf16.mxu0 %vm8167_vm0, %v8166_v37  ;;  %v4624_v49 = vpop.f32.mrb[19].mxu1  ;;  %5021 = vmatprep.subr.bf16.mxu1 %v8166_v37 }
 0x373   : > { %v1849_v47 = vpop.f32.mrb[52].mxu0  ;;  %4934 = vmatmul.mubr.bf16.gmra.mrb[124].mxu1 %v8183_v7 }
 0x374   : > { %v7543_v13 = vadd.f32 %v1849_v47, %v1598_v59  ;;  %v4675_v3 = vpop.f32.mrb[53].mxu0  ;;  %4937 = vmatprep.mubr.msk.bf16.mxu1 %vm8167_vm0, %v8166_v37  ;;  %5022 = vmatpush3.bf16.msra.mxu1 %v5356_v26 }
 0x375   : > { %v1852_v32 = vpop.f32.mrb[54].mxu0  ;;  %5023 = vmatprep.subr.bf16.mxu1 %v8166_v37 }
 0x376   : > { %v7548_v18 = vadd.f32 %v1852_v32, %v1601_v38  ;;  %v4676_v23 = vpop.f32.mrb[55].mxu0  ;;  %v1606_v45 = vpop.f32.mrb[20].mxu1  ;;  %v8193_v32 = vshll.u32 %v7194_v43, 16 }
 0x377   : > { %v4627_v57 = vpop.f32.mrb[21].mxu1 }
 0x378   : > { %4986 = vmatmul.mubr.bf16.gmra.mrb[160].mxu0 %v3205_v12  ;;  %v1609_v34 = vpop.f32.mrb[22].mxu1  ;;  %5024 = vmatpush3.bf16.msra.mxu1 %v5357_v33  ;;  %v2979_v33 = vrot.slane %v8193_v32, 1 }
 0x379   : > { %4989 = vmatprep.mubr.msk.bf16.mxu0 %vm8167_vm0, %v8166_v37  ;;  %v4628_v7 = vpop.f32.mrb[23].mxu1 }
 0x37a   : > { %v3212_v7 = vrot.slane %v7194_v43, 1 }
 0x37b   : > { %v1857_v14 = vpop.f32.mrb[56].mxu0  ;;  %4938 = vmatmul.mubr.bf16.gmra.mrb[128].mxu1 %v8185_v63  ;;  %v3208_v63 = vrot.slane %v5365_v55, 1 }
 0x37c   : > { %v7554_v17 = vadd.f32 %v1857_v14, %v1606_v45  ;;  %v4679_v16 = vpop.f32.mrb[57].mxu0  ;;  %4941 = vmatprep.mubr.msk.bf16.mxu1 %vm8167_vm0, %v8166_v37  ;;  %v2895_v45 = vld [vmem:[#allocation2 + $0x60] sm:$0x1] }
 0x37d   : > { %v1860_v54 = vpop.f32.mrb[58].mxu0  ;;  %v3209_v31 = vsel %vm1373_vm1, %v3206_v10, %v3208_v63  ;;  %v2985_v14 = vshll.u32 %v2895_v45, 16 }
 0x37e   : > { %v7559_v39 = vadd.f32 %v1860_v54, %v1609_v34  ;;  %v4680_v44 = vpop.f32.mrb[59].mxu0  ;;  %v1614_v46 = vpop.f32.mrb[24].mxu1  ;;  %v2980_v34 = vsel %vm2629_vm2, %v8191_v40, %v2979_v33 }
 0x37f   : > { %v4631_v30 = vpop.f32.mrb[25].mxu1 }
 0x380   : > { %4990 = vmatmul.mubr.bf16.gmra.mrb[164].mxu0 %v3207_v11  ;;  %v1617_v50 = vpop.f32.mrb[26].mxu1  ;;  %v8194_v30 = vshrl.u32 %v7194_v43, 16 }
 0x381   : > { %4993 = vmatprep.mubr.msk.bf16.mxu0 %vm8167_vm0, %v8166_v37  ;;  %v4632_v15 = vpop.f32.mrb[27].mxu1 }
 0x382   : > { %v2983_v40 = vor.u32 %v8194_v30, %v2979_v33 }
 0x383   : > { %v1865_v48 = vpop.f32.mrb[60].mxu0  ;;  %4942 = vmatmul.mubr.bf16.gmra.mrb[132].mxu1 %v8187_v51  ;;  %v3210_v51 = vrot.slane %v5366_v2, 1 }
 0x384   : > { %v7564_v35 = vadd.f32 %v1865_v48, %v1614_v46  ;;  %v4683_v58 = vpop.f32.mrb[61].mxu0  ;;  %4945 = vmatprep.mubr.msk.bf16.mxu1 %vm8167_vm0, %v8166_v37 }
 0x385   : > { %v1868_v6 = vpop.f32.mrb[62].mxu0  ;;  %v3211_v3 = vsel %vm1373_vm1, %v3208_v63, %v3210_v51  ;;  %v3213_v11 = vsel %vm1373_vm1, %v3210_v51, %v3212_v7 }
 0x386   : > { %v7569_v8 = vadd.f32 %v1868_v6, %v1617_v50  ;;  %v4684_v4 = vpop.f32.mrb[63].mxu0  ;;  %v1622_v60 = vpop.f32.mrb[28].mxu1  ;;  %v2987_v50 = vrot.slane %v2985_v14, 1  ;;  %v3214_v6 = vrot.slane %v2895_v45, 1 }
 0x387   : > { %v4635_v22 = vpop.f32.mrb[29].mxu1 }
 0x388   : > { %4994 = vmatmul.mubr.bf16.gmra.mrb[168].mxu0 %v3209_v31  ;;  %v1625_v25 = vpop.f32.mrb[30].mxu1  ;;  %v2988_v58 = vsel %vm2629_vm2, %v2983_v40, %v2987_v50 }
 0x389   : > { %4997 = vmatprep.mubr.msk.bf16.mxu0 %vm8167_vm0, %v8166_v37  ;;  %v4636_v59 = vpop.f32.mrb[31].mxu1 }
 0x38a   : > { %v3215_v59 = vsel %vm1373_vm1, %v3212_v7, %v3214_v6 }
 0x38b   : > { %v1873_v41 = vpop.f32.mrb[64].mxu0  ;;  %4946 = vmatmul.mubr.bf16.gmra.mrb[136].mxu1 %v8189_v28 }
 0x38c   : > { %v7574_v38 = vadd.f32 %v1873_v41, %v1622_v60  ;;  %v4687_v26 = vpop.f32.mrb[65].mxu0  ;;  %4949 = vmatprep.mubr.msk.bf16.mxu1 %vm8167_vm0, %v8166_v37 }
 0x38d   : > { %v1876_v49 = vpop.f32.mrb[66].mxu0 }
 0x38e   : > { %v7579_v47 = vadd.f32 %v1876_v49, %v1625_v25  ;;  %v4688_v52 = vpop.f32.mrb[67].mxu0  ;;  %v1630_v19 = vpop.f32.mrb[32].mxu1 }
 0x38f   : > { %v4639_v23 = vpop.f32.mrb[33].mxu1 }
 0x390   : > { %4998 = vmatmul.mubr.bf16.gmra.mrb[172].mxu0 %v3211_v3  ;;  %v1633_v12 = vpop.f32.mrb[34].mxu1 }
 0x391   : > { %5001 = vmatprep.mubr.msk.bf16.mxu0 %vm8167_vm0, %v8166_v37  ;;  %v4640_v28 = vpop.f32.mrb[35].mxu1 }
 0x393   : > { %v1881_v57 = vpop.f32.mrb[68].mxu0  ;;  %4950 = vmatmul.mubr.bf16.gmra.mrb[140].mxu1 %v2980_v34 }
 0x394   : > { %v7589_v62 = vadd.f32 %v1881_v57, %v1630_v19  ;;  %v4691_v10 = vpop.f32.mrb[69].mxu0  ;;  %4953 = vmatprep.mubr.msk.bf16.mxu1 %vm8167_vm0, %v8166_v37 }
 0x395   : > { %v1884_v16 = vpop.f32.mrb[70].mxu0 }
 0x396   : > { %v7593_v54 = vadd.f32 %v1884_v16, %v1633_v12  ;;  %v4692_v44 = vpop.f32.mrb[71].mxu0  ;;  %v1638_v46 = vpop.f32.mrb[36].mxu1 }
 0x397   : > { %v4643_v15 = vpop.f32.mrb[37].mxu1 }
 0x398   : > { %5002 = vmatmul.mubr.bf16.gmra.mrb[176].mxu0 %v3213_v11  ;;  %v1641_v48 = vpop.f32.mrb[38].mxu1 }
 0x399   : > { %5005 = vmatprep.mubr.msk.bf16.mxu0 %vm8167_vm0, %v8166_v37  ;;  %v4644_v55 = vpop.f32.mrb[39].mxu1 }
 0x39b   : > { %v1889_v63 = vpop.f32.mrb[72].mxu0  ;;  %4954 = vmatmul.mubr.bf16.gmra.mrb[144].mxu1 %v2988_v58 }
 0x39c   : > { %v7601_v4 = vadd.f32 %v1889_v63, %v1638_v46  ;;  %v4695_v60 = vpop.f32.mrb[73].mxu0  ;;  %5025 = vmatprep.mubr.msk.bf16.mxu1 %vm8167_vm0, %v8166_v37 }
 0x39d   : > { %v1892_v31 = vpop.f32.mrb[74].mxu0 }
 0x39e   : > { %v7605_v43 = vadd.f32 %v1892_v31, %v1641_v48  ;;  %v4696_v22 = vpop.f32.mrb[75].mxu0  ;;  %v2042_v25 = vpop.f32.mrb[40].mxu1 }
 0x39f   : > { %v2113_v41 = vadd.f32 %v2042_v25, %v7505_v61  ;;  %v4715_v2 = vpop.f32.mrb[41].mxu1 }
 0x3a0   : > { %5006 = vmatmul.mubr.bf16.gmra.mrb[180].mxu0 %v3215_v59  ;;  %v2045_v51 = vpop.f32.mrb[42].mxu1 }
 0x3a1   : > { %v2114_v26 = vadd.f32 %v2045_v51, %v7511_v24  ;;  %v4716_v49 = vpop.f32.mrb[43].mxu1 }
 0x3a3   : > { %v2325_v52 = vpop.f32.mrb[76].mxu0  ;;  %5026 = vmatmul.mubr.bf16.vlgmr.msra.gmra.mrb[148].mxu1 %v7232_v20  ;;  %v8195_v20 = vld [vmem:[#allocation53_spill] sm:$0xff] }
 0x3a4   : > { %v7610_v19 = vadd.f32 %v2325_v52, %v2113_v41  ;;  %v4767_v3 = vpop.f32.mrb[77].mxu0  ;;  %5029 = vmatprep.mubr.msk.bf16.mxu1 %vm8167_vm0, %v8166_v37 }
 0x3a5   : > { %v2328_v32 = vpop.f32.mrb[78].mxu0 }
 0x3a6   : > { %v7615_v33 = vadd.f32 %v2328_v32, %v2114_v26  ;;  %v4768_v23 = vpop.f32.mrb[79].mxu0  ;;  %v2050_v61 = vpop.f32.mrb[44].mxu1 }
 0x3a7   : > { %v2115_v45 = vadd.f32 %v2050_v61, %v7519_v29  ;;  %v4719_v12 = vpop.f32.mrb[45].mxu1 }
 0x3a8   : > { %v2053_v28 = vpop.f32.mrb[46].mxu1 }
 0x3a9   : > { %v2116_v24 = vadd.f32 %v2053_v28, %v7524_v21  ;;  %v4720_v57 = vpop.f32.mrb[47].mxu1 }
 0x3ab   : > { %v2333_v34 = vpop.f32.mrb[80].mxu0  ;;  %5030 = vmatmul.mubr.bf16.gmra.mrb[152].mxu1 %v8195_v20 }
 0x3ac   : > { %v7619_v7 = vadd.f32 %v2333_v34, %v2115_v45  ;;  %v4771_v14 = vpop.f32.mrb[81].mxu0  ;;  %5033 = vmatprep.mubr.msk.bf16.mxu1 %vm8167_vm0, %v8166_v37 }
 0x3ad   : > { %v2336_v10 = vpop.f32.mrb[82].mxu0 }
 0x3ae   : > { %v7624_v16 = vadd.f32 %v2336_v10, %v2116_v24  ;;  %v4772_v44 = vpop.f32.mrb[83].mxu0  ;;  %v2058_v46 = vpop.f32.mrb[48].mxu1 }
 0x3af   : > { %v2117_v29 = vadd.f32 %v2058_v46, %v7531_v9  ;;  %v4723_v11 = vpop.f32.mrb[49].mxu1 }
 0x3b0   : > { %v2061_v30 = vpop.f32.mrb[50].mxu1 }
 0x3b1   : > { %v2118_v21 = vadd.f32 %v2061_v30, %v7536_v56  ;;  %v4724_v40 = vpop.f32.mrb[51].mxu1 }
 0x3b3   : > { %v2341_v50 = vpop.f32.mrb[84].mxu0  ;;  %5034 = vmatmul.mubr.bf16.gmra.mrb[156].mxu1 %v7240_v5 }
 0x3b4   : > { %v7628_v15 = vadd.f32 %v2341_v50, %v2117_v29  ;;  %v4775_v48 = vpop.f32.mrb[85].mxu0  ;;  %5037 = vmatprep.mubr.msk.bf16.mxu1 %vm8167_vm0, %v8166_v37 }
 0x3b5   : > { %v2344_v55 = vpop.f32.mrb[86].mxu0 }
 0x3b6   : > { %v7633_v63 = vadd.f32 %v2344_v55, %v2118_v21  ;;  %v4776_v58 = vpop.f32.mrb[87].mxu0  ;;  %v2066_v6 = vpop.f32.mrb[52].mxu1 }
 0x3b7   : > { %v2119_v9 = vadd.f32 %v2066_v6, %v7543_v13  ;;  %v4727_v60 = vpop.f32.mrb[53].mxu1 }
 0x3b8   : > { %v2069_v31 = vpop.f32.mrb[54].mxu1 }
 0x3b9   : > { %v2120_v56 = vadd.f32 %v2069_v31, %v7548_v18  ;;  %v4728_v22 = vpop.f32.mrb[55].mxu1 }
 0x3bb   : > { %v2349_v25 = vpop.f32.mrb[88].mxu0  ;;  %5038 = vmatmul.mubr.bf16.gmra.mrb[160].mxu1 %v7246_v53 }
 0x3bc   : > { %v7637_v59 = vadd.f32 %v2349_v25, %v2119_v9  ;;  %v4779_v41 = vpop.f32.mrb[89].mxu0  ;;  %5041 = vmatprep.mubr.msk.bf16.mxu1 %vm8167_vm0, %v8166_v37 }
 0x3bd   : > { %v2352_v5 = vpop.f32.mrb[90].mxu0 }
 0x3be   : > { %v7642_v2 = vadd.f32 %v2352_v5, %v2120_v56  ;;  %v4780_v51 = vpop.f32.mrb[91].mxu0  ;;  %v2074_v26 = vpop.f32.mrb[56].mxu1 }
 0x3bf   : > { %v2121_v13 = vadd.f32 %v2074_v26, %v7554_v17  ;;  %v4731_v49 = vpop.f32.mrb[57].mxu1 }
 0x3c0   : > { %v2077_v52 = vpop.f32.mrb[58].mxu1 }
 0x3c1   : > { %v2122_v18 = vadd.f32 %v2077_v52, %v7559_v39  ;;  %v4732_v3 = vpop.f32.mrb[59].mxu1 }
 0x3c3   : > { %v2357_v32 = vpop.f32.mrb[92].mxu0  ;;  %5042 = vmatmul.mubr.bf16.gmra.mrb[164].mxu1 %v7254_v42 }
 0x3c4   : > { %v7646_v23 = vadd.f32 %v2357_v32, %v2121_v13  ;;  %v4783_v61 = vpop.f32.mrb[93].mxu0  ;;  %5045 = vmatprep.mubr.msk.bf16.mxu1 %vm8167_vm0, %v8166_v37 }
 0x3c5   : > { %v2360_v53 = vpop.f32.mrb[94].mxu0 }
 0x3c6   : > { %v7651_v45 = vadd.f32 %v2360_v53, %v2122_v18  ;;  %v4784_v12 = vpop.f32.mrb[95].mxu0  ;;  %v2082_v28 = vpop.f32.mrb[60].mxu1 }
 0x3c7   : > { %v2123_v17 = vadd.f32 %v2082_v28, %v7564_v35  ;;  %v4735_v24 = vpop.f32.mrb[61].mxu1 }
 0x3c8   : > { %v2085_v57 = vpop.f32.mrb[62].mxu1 }
 0x3c9   : > { %v2124_v39 = vadd.f32 %v2085_v57, %v7569_v8  ;;  %v4736_v34 = vpop.f32.mrb[63].mxu1 }
 0x3cb   : > { %v2365_v14 = vpop.f32.mrb[96].mxu0  ;;  %5046 = vmatmul.mubr.bf16.gmra.mrb[168].mxu1 %v7261_v1 }
 0x3cc   : > { %v7655_v20 = vadd.f32 %v2365_v14, %v2123_v17  ;;  %v4787_v10 = vpop.f32.mrb[97].mxu0  ;;  %5049 = vmatprep.mubr.msk.bf16.mxu1 %vm8167_vm0, %v8166_v37 }
 0x3cd   : > { %v2368_v42 = vpop.f32.mrb[98].mxu0 }
 0x3ce   : > { %v7660_v44 = vadd.f32 %v2368_v42, %v2124_v39  ;;  %v4788_v46 = vpop.f32.mrb[99].mxu0  ;;  %v2090_v29 = vpop.f32.mrb[64].mxu1 }
 0x3cf   : > { %v2125_v35 = vadd.f32 %v2090_v29, %v7574_v38  ;;  %v4739_v11 = vpop.f32.mrb[65].mxu1 }
 0x3d0   : > { %v2093_v30 = vpop.f32.mrb[66].mxu1 }
 0x3d1   : > { %v2126_v8 = vadd.f32 %v2093_v30, %v7579_v47  ;;  %v4740_v21 = vpop.f32.mrb[67].mxu1 }
 0x3d3   : > { %v2373_v40 = vpop.f32.mrb[100].mxu0  ;;  %5050 = vmatmul.mubr.bf16.gmra.mrb[172].mxu1 %v7266_v36 }
 0x3d4   : > { %v7664_v50 = vadd.f32 %v2373_v40, %v2125_v35  ;;  %v4791_v48 = vpop.f32.mrb[101].mxu0  ;;  %5053 = vmatprep.mubr.msk.bf16.mxu1 %vm8167_vm0, %v8166_v37 }
 0x3d5   : > { %v2376_v1 = vpop.f32.mrb[102].mxu0 }
 0x3d6   : > { %v7669_v55 = vadd.f32 %v2376_v1, %v2126_v8  ;;  %v4792_v58 = vpop.f32.mrb[103].mxu0  ;;  %v2098_v6 = vpop.f32.mrb[68].mxu1 }
 0x3d7   : > { %v2127_v38 = vadd.f32 %v2098_v6, %v7589_v62  ;;  %v4743_v9 = vpop.f32.mrb[69].mxu1 }
 0x3d8   : > { %v2101_v60 = vpop.f32.mrb[70].mxu1 }
 0x3d9   : > { %v2128_v47 = vadd.f32 %v2101_v60, %v7593_v54  ;;  %v4744_v31 = vpop.f32.mrb[71].mxu1 }
 0x3db   : > { %v2381_v56 = vpop.f32.mrb[104].mxu0  ;;  %5054 = vmatmul.mubr.bf16.gmra.mrb[176].mxu1 %v7272_v0 }
 0x3dc   : > { %v7673_v22 = vadd.f32 %v2381_v56, %v2127_v38  ;;  %v4795_v25 = vpop.f32.mrb[105].mxu0  ;;  %5057 = vmatprep.mubr.msk.bf16.mxu1 %vm8167_vm0, %v8166_v37 }
 0x3dd   : > { %v2384_v36 = vpop.f32.mrb[106].mxu0 }
 0x3de   : > { %v7678_v41 = vadd.f32 %v2384_v36, %v2128_v47  ;;  %v4796_v5 = vpop.f32.mrb[107].mxu0  ;;  %v2106_v51 = vpop.f32.mrb[72].mxu1 }
 0x3df   : > { %v2129_v62 = vadd.f32 %v2106_v51, %v7601_v4  ;;  %v4747_v26 = vpop.f32.mrb[73].mxu1 }
 0x3e0   : > { %v2109_v13 = vpop.f32.mrb[74].mxu1 }
 0x3e1   : > { %v2130_v54 = vadd.f32 %v2109_v13, %v7605_v43  ;;  %v4748_v49 = vpop.f32.mrb[75].mxu1 }
 0x3e3   : > { %v2389_v52 = vpop.f32.mrb[108].mxu0  ;;  %5058 = vmatmul.mubr.bf16.gmra.mrb[180].mxu1 %v7430_v27 }
 0x3e4   : > { %v7682_v18 = vadd.f32 %v2389_v52, %v2129_v62  ;;  %v4799_v3 = vpop.f32.mrb[109].mxu0 }
 0x3e5   : > { %v2392_v0 = vpop.f32.mrb[110].mxu0 }
 0x3e6   : > { %v7685_v32 = vadd.f32 %v2392_v0, %v2130_v54  ;;  %v4800_v37 = vpop.f32.mrb[111].mxu0  ;;  %v2513_v61 = vpop.f32.mrb[76].mxu1 }
 0x3e7   : > { %v2584_v53 = vadd.f32 %v2513_v61, %v7610_v19  ;;  %v4819_v12 = vpop.f32.mrb[77].mxu1 }
 0x3e8   : > { %v2516_v4 = vpop.f32.mrb[78].mxu1 }
 0x3e9   : > { %v2585_v28 = vadd.f32 %v2516_v4, %v7615_v33  ;;  %v4820_v17 = vpop.f32.mrb[79].mxu1 }
 0x3eb   : > { %v2797_v43 = vpop.f32.mrb[112].mxu0 }
 0x3ec   : > { %v7689_v24 = vadd.f32 %v2797_v43, %v2584_v53  ;;  %v4871_v57 = vpop.f32.mrb[113].mxu0 }
 0x3ed   : > { %v2800_v39 = vpop.f32.mrb[114].mxu0 }
 0x3ee   : > { %v7691_v34 = vadd.f32 %v2800_v39, %v2585_v28  ;;  %v4872_v27 = vpop.f32.mrb[115].mxu0  ;;  %v2521_v14 = vpop.f32.mrb[80].mxu1 }
 0x3ef   : > { %v2586_v10 = vadd.f32 %v2521_v14, %v7619_v7  ;;  %v4823_v42 = vpop.f32.mrb[81].mxu1 }
 0x3f0   : > { %v2524_v46 = vpop.f32.mrb[82].mxu1 }
 0x3f1   : > { %v2587_v19 = vadd.f32 %v2524_v46, %v7624_v16  ;;  %v4824_v29 = vpop.f32.mrb[83].mxu1 }
 0x3f3   : > { %v2805_v35 = vpop.f32.mrb[116].mxu0 }
 0x3f4   : > { %v7695_v11 = vadd.f32 %v2805_v35, %v2586_v10  ;;  %v4875_v33 = vpop.f32.mrb[117].mxu0 }
 0x3f5   : > { %v2808_v30 = vpop.f32.mrb[118].mxu0 }
 0x3f6   : > { %v7697_v8 = vadd.f32 %v2808_v30, %v2587_v19  ;;  %v4876_v21 = vpop.f32.mrb[119].mxu0  ;;  %v2529_v40 = vpop.f32.mrb[84].mxu1 }
 0x3f7   : > { %v2588_v48 = vadd.f32 %v2529_v40, %v7628_v15  ;;  %v4827_v1 = vpop.f32.mrb[85].mxu1 }
 0x3f8   : > { %v2532_v58 = vpop.f32.mrb[86].mxu1 }
 0x3f9   : > { %v2589_v7 = vadd.f32 %v2532_v58, %v7633_v63  ;;  %v4828_v6 = vpop.f32.mrb[87].mxu1 }
 0x3fb   : > { %v2813_v38 = vpop.f32.mrb[120].mxu0 }
 0x3fc   : > { %v7701_v9 = vadd.f32 %v2813_v38, %v2588_v48  ;;  %v4879_v16 = vpop.f32.mrb[121].mxu0 }
 0x3fd   : > { %v2816_v60 = vpop.f32.mrb[122].mxu0 }
 0x3fe   : > { %v7703_v47 = vadd.f32 %v2816_v60, %v2589_v7  ;;  %v4880_v31 = vpop.f32.mrb[123].mxu0  ;;  %v2537_v56 = vpop.f32.mrb[88].mxu1 }
 0x3ff   : > { %v2590_v25 = vadd.f32 %v2537_v56, %v7637_v59  ;;  %v4831_v36 = vpop.f32.mrb[89].mxu1 }
 0x400   : > { %v2540_v5 = vpop.f32.mrb[90].mxu1 }
 0x401   : > { %v2591_v15 = vadd.f32 %v2540_v5, %v7642_v2  ;;  %v4832_v51 = vpop.f32.mrb[91].mxu1 }
 0x403   : > { %v2821_v62 = vpop.f32.mrb[124].mxu0 }
 0x404   : > { %v7707_v26 = vadd.f32 %v2821_v62, %v2590_v25  ;;  %v4883_v63 = vpop.f32.mrb[125].mxu0 }
 0x405   : > { %v2824_v13 = vpop.f32.mrb[126].mxu0 }
 0x406   : > { %v7709_v54 = vadd.f32 %v2824_v13, %v2591_v15  ;;  %v4884_v49 = vpop.f32.mrb[127].mxu0  ;;  %v2545_v52 = vpop.f32.mrb[92].mxu1 }
 0x407   : > { %v2592_v3 = vadd.f32 %v2545_v52, %v7646_v23  ;;  %v4835_v0 = vpop.f32.mrb[93].mxu1 }
 0x408   : > { %v2548_v37 = vpop.f32.mrb[94].mxu1 }
 0x409   : > { %v2593_v59 = vadd.f32 %v2548_v37, %v7651_v45  ;;  %v4836_v61 = vpop.f32.mrb[95].mxu1 }
 0x40b   : > { %v2829_v53 = vpop.f32.mrb[128].mxu0 }
 0x40c   : > { %v7713_v12 = vadd.f32 %v2829_v53, %v2592_v3  ;;  %v4887_v2 = vpop.f32.mrb[129].mxu0 }
 0x40d   : > { %v2832_v4 = vpop.f32.mrb[130].mxu0 }
 0x40e   : > { %v7715_v28 = vadd.f32 %v2832_v4, %v2593_v59  ;;  %v4888_v17 = vpop.f32.mrb[131].mxu0  ;;  %v2553_v43 = vpop.f32.mrb[96].mxu1 }
 0x40f   : > { %v2594_v57 = vadd.f32 %v2553_v43, %v7655_v20  ;;  %v4839_v39 = vpop.f32.mrb[97].mxu1 }
 0x410   : > { %v2556_v27 = vpop.f32.mrb[98].mxu1 }
 0x411   : > { %v2595_v23 = vadd.f32 %v2556_v27, %v7660_v44  ;;  %v4840_v14 = vpop.f32.mrb[99].mxu1 }
 0x413   : > { %v2837_v10 = vpop.f32.mrb[132].mxu0 }
 0x414   : > { %v7719_v42 = vadd.f32 %v2837_v10, %v2594_v57  ;;  %v4891_v45 = vpop.f32.mrb[133].mxu0 }
 0x415   : > { %v2840_v46 = vpop.f32.mrb[134].mxu0 }
 0x416   : > { %v7721_v19 = vadd.f32 %v2840_v46, %v2595_v23  ;;  %v4892_v29 = vpop.f32.mrb[135].mxu0  ;;  %v2561_v35 = vpop.f32.mrb[100].mxu1 }
 0x417   : > { %v2596_v33 = vadd.f32 %v2561_v35, %v7664_v50  ;;  %v4843_v30 = vpop.f32.mrb[101].mxu1 }
 0x418   : > { %v2564_v21 = vpop.f32.mrb[102].mxu1 }
 0x419   : > { %v2597_v20 = vadd.f32 %v2564_v21, %v7669_v55  ;;  %v4844_v40 = vpop.f32.mrb[103].mxu1 }
 0x41b   : > { %v2845_v48 = vpop.f32.mrb[136].mxu0 }
 0x41c   : > { %v7725_v1 = vadd.f32 %v2845_v48, %v2596_v33  ;;  %v4895_v44 = vpop.f32.mrb[137].mxu0 }
 0x41d   : > { %v2848_v58 = vpop.f32.mrb[138].mxu0 }
 0x41e   : > { %v7727_v7 = vadd.f32 %v2848_v58, %v2597_v20  ;;  %v4896_v6 = vpop.f32.mrb[139].mxu0  ;;  %v2569_v38 = vpop.f32.mrb[104].mxu1 }
 0x41f   : > { %v2598_v16 = vadd.f32 %v2569_v38, %v7673_v22  ;;  %v4847_v60 = vpop.f32.mrb[105].mxu1 }
 0x420   : > { %v2572_v31 = vpop.f32.mrb[106].mxu1 }
 0x421   : > { %v2599_v50 = vadd.f32 %v2572_v31, %v7678_v41  ;;  %v4848_v56 = vpop.f32.mrb[107].mxu1 }
 0x423   : > { %v2853_v25 = vpop.f32.mrb[140].mxu0 }
 0x424   : > { %v7731_v36 = vadd.f32 %v2853_v25, %v2598_v16  ;;  %v4899_v55 = vpop.f32.mrb[141].mxu0 }
 0x425   : > { %v2856_v5 = vpop.f32.mrb[142].mxu0 }
 0x426   : > { %v7733_v15 = vadd.f32 %v2856_v5, %v2599_v50  ;;  %v4900_v51 = vpop.f32.mrb[143].mxu0  ;;  %v2577_v62 = vpop.f32.mrb[108].mxu1 }
 0x427   : > { %v2600_v63 = vadd.f32 %v2577_v62, %v7682_v18  ;;  %v4851_v13 = vpop.f32.mrb[109].mxu1 }
 0x428   : > { %v2580_v49 = vpop.f32.mrb[110].mxu1 }
 0x429   : > { %v2601_v22 = vadd.f32 %v2580_v49, %v7685_v32  ;;  %v4852_v52 = vpop.f32.mrb[111].mxu1 }
 0x42b   : > { %v2861_v3 = vpop.f32.mrb[144].mxu0 }
 0x42c   : > { %v7737_v0 = vadd.f32 %v2861_v3, %v2600_v63  ;;  %v4903_v41 = vpop.f32.mrb[145].mxu0 }
 0x42d   : > { %v2864_v37 = vpop.f32.mrb[146].mxu0 }
 0x42e   : > { %v7739_v59 = vadd.f32 %v2864_v37, %v2601_v22  ;;  %v4904_v61 = vpop.f32.mrb[147].mxu0  ;;  %v3080_v53 = vpop.f32.mrb[112].mxu1 }
 0x42f   : > { %v3151_v2 = vadd.f32 %v3080_v53, %v7689_v24  ;;  %v4923_v4 = vpop.f32.mrb[113].mxu1 }
 0x430   : > { %v3083_v17 = vpop.f32.mrb[114].mxu1 }
 0x431   : > { %v3152_v18 = vadd.f32 %v3083_v17, %v7691_v34  ;;  %v4924_v43 = vpop.f32.mrb[115].mxu1 }
 0x433   : > { %v3307_v57 = vpop.f32.mrb[148].mxu0 }
 0x434   : > { %v7743_v39 = vadd.f32 %v3307_v57, %v3151_v2  ;;  %v4975_v32 = vpop.f32.mrb[149].mxu0 }
 0x435   : > { %v3310_v27 = vpop.f32.mrb[150].mxu0 }
 0x436   : > { %v7745_v23 = vadd.f32 %v3310_v27, %v3152_v18  ;;  %v4976_v14 = vpop.f32.mrb[151].mxu0  ;;  %v3088_v10 = vpop.f32.mrb[116].mxu1 }
 0x437   : > { %v3153_v45 = vadd.f32 %v3088_v10, %v7695_v11  ;;  %v4927_v46 = vpop.f32.mrb[117].mxu1 }
 0x438   : > { %v3091_v29 = vpop.f32.mrb[118].mxu1 }
 0x439   : > { %v3154_v24 = vadd.f32 %v3091_v29, %v7697_v8  ;;  %v4928_v35 = vpop.f32.mrb[119].mxu1 }
 0x43b   : > { %v3315_v33 = vpop.f32.mrb[152].mxu0 }
 0x43c   : > { %v7749_v30 = vadd.f32 %v3315_v33, %v3153_v45  ;;  %v4979_v34 = vpop.f32.mrb[153].mxu0 }
 0x43d   : > { %v3318_v21 = vpop.f32.mrb[154].mxu0 }
 0x43e   : > { %v7751_v20 = vadd.f32 %v3318_v21, %v3154_v24  ;;  %v4980_v40 = vpop.f32.mrb[155].mxu0  ;;  %v3096_v48 = vpop.f32.mrb[120].mxu1 }
 0x43f   : > { %v3155_v44 = vadd.f32 %v3096_v48, %v7701_v9  ;;  %v4931_v58 = vpop.f32.mrb[121].mxu1 }
 0x440   : > { %v3099_v6 = vpop.f32.mrb[122].mxu1 }
 0x441   : > { %v3156_v11 = vadd.f32 %v3099_v6, %v7703_v47  ;;  %v4932_v38 = vpop.f32.mrb[123].mxu1 }
 0x443   : > { %v3323_v16 = vpop.f32.mrb[156].mxu0 }
 0x444   : > { %v7755_v60 = vadd.f32 %v3323_v16, %v3155_v44  ;;  %v4983_v8 = vpop.f32.mrb[157].mxu0 }
 0x445   : > { %v3326_v31 = vpop.f32.mrb[158].mxu0 }
 0x446   : > { %v7757_v50 = vadd.f32 %v3326_v31, %v3156_v11  ;;  %v4984_v56 = vpop.f32.mrb[159].mxu0  ;;  %v3104_v25 = vpop.f32.mrb[124].mxu1 }
 0x447   : > { %v3157_v55 = vadd.f32 %v3104_v25, %v7707_v26  ;;  %v4935_v5 = vpop.f32.mrb[125].mxu1 }
 0x448   : > { %v3107_v51 = vpop.f32.mrb[126].mxu1 }
 0x449   : > { %v3158_v9 = vadd.f32 %v3107_v51, %v7709_v54  ;;  %v4936_v62 = vpop.f32.mrb[127].mxu1 }
 0x44b   : > { %v3331_v63 = vpop.f32.mrb[160].mxu0 }
 0x44c   : > { %v7761_v13 = vadd.f32 %v3331_v63, %v3157_v55  ;;  %v4987_v47 = vpop.f32.mrb[161].mxu0 }
 0x44d   : > { %v3334_v49 = vpop.f32.mrb[162].mxu0 }
 0x44e   : > { %v7763_v22 = vadd.f32 %v3334_v49, %v3158_v9  ;;  %v4988_v52 = vpop.f32.mrb[163].mxu0  ;;  %v3112_v3 = vpop.f32.mrb[128].mxu1 }
 0x44f   : > { %v3159_v41 = vadd.f32 %v3112_v3, %v7713_v12  ;;  %v4939_v37 = vpop.f32.mrb[129].mxu1 }
 0x450   : > { %v3115_v61 = vpop.f32.mrb[130].mxu1 }
 0x451   : > { %v3160_v26 = vadd.f32 %v3115_v61, %v7715_v28  ;;  %v4940_v53 = vpop.f32.mrb[131].mxu1 }
 0x453   : > { %v3339_v2 = vpop.f32.mrb[164].mxu0 }
 0x454   : > { %v7767_v4 = vadd.f32 %v3339_v2, %v3159_v41  ;;  %v4991_v54 = vpop.f32.mrb[165].mxu0 }
 0x455   : > { %v3342_v17 = vpop.f32.mrb[166].mxu0  ;;  %v7795_v54 = vld [vmem:[#allocation14] ss:$0 sm:$0xff] }
 0x456   : > { %v7769_v18 = vadd.f32 %v3342_v17, %v3160_v26  ;;  %v4992_v43 = vpop.f32.mrb[167].mxu0  ;;  %v3120_v57 = vpop.f32.mrb[132].mxu1 }
 0x457   : > { %v3161_v32 = vadd.f32 %v3120_v57, %v7719_v42  ;;  %v4943_v27 = vpop.f32.mrb[133].mxu1 }
 0x458   : > { %v3123_v14 = vpop.f32.mrb[134].mxu1 }
 0x459   : > { %v3162_v12 = vadd.f32 %v3123_v14, %v7721_v19  ;;  %v4944_v10 = vpop.f32.mrb[135].mxu1 }
 0x45b   : > { %v3347_v45 = vpop.f32.mrb[168].mxu0 }
 0x45c   : > { %v7773_v46 = vadd.f32 %v3347_v45, %v3161_v32  ;;  %v4995_v28 = vpop.f32.mrb[169].mxu0  ;;  %v4215_v32 = vld [vmem:[%s6146_s18] sm:$0xff]  }
 0x45d   : > { %v3350_v29 = vpop.f32.mrb[170].mxu0  ;;  %v4216_v10 = vunpack.c.l.bf16 %v4215_v32  ;;  %v4217_v45 = vunpack.c.h.bf16 %v4215_v32 }
 0x45e   : > { %v7775_v24 = vadd.f32 %v3350_v29, %v3162_v12  ;;  %v4996_v35 = vpop.f32.mrb[171].mxu0  ;;  %v3128_v33 = vpop.f32.mrb[136].mxu1 }
 0x45f   : > { %v3163_v34 = vadd.f32 %v3128_v33, %v7725_v1  ;;  %v4947_v21 = vpop.f32.mrb[137].mxu1 }
 0x460   : > { %v3131_v40 = vpop.f32.mrb[138].mxu1 }
 0x461   : > { %v3164_v42 = vadd.f32 %v3131_v40, %v7727_v7  ;;  %v4948_v48 = vpop.f32.mrb[139].mxu1 }
 0x462   : > { %v4295_v48 = vld [vmem:[%s6146_s18 + $0x8] sm:$0xff]  }
 0x463   : > { %v3355_v44 = vpop.f32.mrb[172].mxu0 }
 0x464   : > { %v7779_v58 = vadd.f32 %v3355_v44, %v3163_v34  ;;  %v4999_v19 = vpop.f32.mrb[173].mxu0 }
 0x465   : > { %v3358_v6 = vpop.f32.mrb[174].mxu0 }
 0x466   : > { %v7781_v11 = vadd.f32 %v3358_v6, %v3164_v42  ;;  %v5000_v38 = vpop.f32.mrb[175].mxu0  ;;  %v3136_v16 = vpop.f32.mrb[140].mxu1 }
 0x467   : > { %v3165_v8 = vadd.f32 %v3136_v16, %v7731_v36  ;;  %v4951_v31 = vpop.f32.mrb[141].mxu1 }
 0x468   : > { %v3139_v56 = vpop.f32.mrb[142].mxu1 }
 0x469   : > { %v3166_v1 = vadd.f32 %v3139_v56, %v7733_v15  ;;  %v4952_v25 = vpop.f32.mrb[143].mxu1 }
 0x46b   : > { %v3363_v55 = vpop.f32.mrb[176].mxu0 }
 0x46c   : > { %v7785_v5 = vadd.f32 %v3363_v55, %v3165_v8  ;;  %v5003_v7 = vpop.f32.mrb[177].mxu0  ;;  %v4221_v8 = vunpack.c.h.bf16 %v4295_v48 }
 0x46d   : > { %v3366_v51 = vpop.f32.mrb[178].mxu0 }
 0x46e   : > { %v7787_v9 = vadd.f32 %v3366_v51, %v3166_v1  ;;  %v5004_v62 = vpop.f32.mrb[179].mxu0  ;;  %v3144_v63 = vpop.f32.mrb[144].mxu1 }
 0x46f   : > { %v3167_v47 = vadd.f32 %v3144_v63, %v7737_v0  ;;  %v4955_v49 = vpop.f32.mrb[145].mxu1 }
 0x470   : > { %v3147_v52 = vpop.f32.mrb[146].mxu1 }
 0x471   : > { %v3168_v36 = vadd.f32 %v3147_v52, %v7739_v59  ;;  %v4956_v3 = vpop.f32.mrb[147].mxu1 }
 0x473   : > { %v3371_v41 = vpop.f32.mrb[180].mxu0 }
 0x474   : > { %v7791_v15 = vadd.f32 %v3371_v41, %v3167_v47  ;;  %v5007_v37 = vpop.f32.mrb[181].mxu0  ;;  %v4296_v47 = vld [vmem:[%s6146_s18 + $0x10] sm:$0xff]  }
 0x475   : > { %v3374_v61 = vpop.f32.mrb[182].mxu0  ;;  %v4224_v37 = vunpack.c.l.bf16 %v4296_v47 }
 0x476   : > { %v7793_v26 = vadd.f32 %v3374_v61, %v3168_v36  ;;  %v5008_v53 = vpop.f32.mrb[183].mxu0  ;;  %v3555_v2 = vpop.f32.mrb[148].mxu1  ;;  %v4225_v61 = vunpack.c.h.bf16 %v4296_v47 }
 0x477   : > { %v3626_v17 = vadd.f32 %v3555_v2, %v7743_v39  ;;  %v5027_v0 = vpop.f32.mrb[149].mxu1 }
 0x478   : > { %v3558_v43 = vpop.f32.mrb[150].mxu1 }
 0x479   : > { %v3651_v57 = vadd.f32 %v7795_v54, %v3626_v17  ;;  %v3627_v59 = vadd.f32 %v3558_v43, %v7745_v23  ;;  %v5028_v27 = vpop.f32.mrb[151].mxu1 }
 0x47a   : > { %v4297_v27 = vld [vmem:[%s6146_s18 + $0x18] sm:$0xff]  }
 0x47b   : > { %vm3669_vm12 = vcmp.gt.f32.partialorder %v3651_v57, 0.0  ;;  %v3687_v14 = vmul.f32 0.1, %v3651_v57  ;;  %v3652_v12 = vadd.f32 %v7795_v54, %v3627_v59 }
 0x47d   : > { %v3705_v28 = vsel %vm3669_vm12, %v3651_v57, %v3687_v14  ;;  %vm3670_vm2 = vcmp.gt.f32.partialorder %v3652_v12, 0.0  ;;  %v3688_v29 = vmul.f32 0.1, %v3652_v12 }
 0x47e   : > { %v3563_v39 = vpop.f32.mrb[152].mxu1  ;;  %v3759_v21 = vadd.f32 %v4216_v10, %v3705_v28 }
 0x47f   : > { %v3706_v35 = vsel %vm3670_vm2, %v3652_v12, %v3688_v29  ;;  %v3628_v33 = vadd.f32 %v3563_v39, %v7749_v30  ;;  %v5031_v34 = vpop.f32.mrb[153].mxu1  ;;  %v4220_v30 = vunpack.c.l.bf16 %v4295_v48  ;;  %v4228_v29 = vunpack.c.l.bf16 %v4297_v27 }
 0x480   : > { %v3760_v40 = vadd.f32 %v4217_v45, %v3706_v35  ;;  %v3566_v23 = vpop.f32.mrb[154].mxu1  ;;  %v4229_v39 = vunpack.c.h.bf16 %v4297_v27 }
 0x481   : > { %v3653_v42 = vadd.f32 %v7795_v54, %v3628_v33  ;;  %v3629_v44 = vadd.f32 %v3566_v23, %v7751_v20  ;;  %v5032_v19 = vpop.f32.mrb[155].mxu1 }
 0x482   : > { %v4253_v6 = vpack.c.bf16 %v3760_v40, %v3759_v21 }
 0x483   : > { %vm3671_vm13 = vcmp.gt.f32.partialorder %v3653_v42, 0.0  ;;  %v3689_v38 = vmul.f32 0.1, %v3653_v42  ;;  %v3654_v16 = vadd.f32 %v7795_v54, %v3629_v44  ;;  %v4298_v44 = vld [vmem:[%s6146_s18 + $0x20] sm:$0xff]  }
 0x484   : > { %4254 = vst [vmem:[%s7809_s21] sm:$0xff] %v4253_v6  }
 0x485   : > { %v3707_v31 = vsel %vm3671_vm13, %v3653_v42, %v3689_v38  ;;  %vm3672_vm4 = vcmp.gt.f32.partialorder %v3654_v16, 0.0  ;;  %v3690_v56 = vmul.f32 0.1, %v3654_v16 }
 0x486   : > { %v3571_v1 = vpop.f32.mrb[156].mxu1  ;;  %v3761_v7 = vadd.f32 %v4220_v30, %v3707_v31  ;;  %v4233_v31 = vunpack.c.h.bf16 %v4298_v44 }
 0x487   : > { %v3708_v20 = vsel %vm3672_vm4, %v3654_v16, %v3690_v56  ;;  %v3630_v25 = vadd.f32 %v3571_v1, %v7755_v60  ;;  %v5035_v55 = vpop.f32.mrb[157].mxu1 }
 0x488   : > { %v3762_v51 = vadd.f32 %v4221_v8, %v3708_v20  ;;  %v3574_v62 = vpop.f32.mrb[158].mxu1  ;;  %v4232_v8 = vunpack.c.l.bf16 %v4298_v44 }
 0x489   : > { %v3655_v63 = vadd.f32 %v7795_v54, %v3630_v25  ;;  %v3631_v49 = vadd.f32 %v3574_v62, %v7757_v50  ;;  %v5036_v52 = vpop.f32.mrb[159].mxu1 }
 0x48a   : > { %v4258_v36 = vpack.c.bf16 %v3762_v51, %v3761_v7 }
 0x48b   : > { %vm3673_vm8 = vcmp.gt.f32.partialorder %v3655_v63, 0.0  ;;  %v3691_v3 = vmul.f32 0.1, %v3655_v63  ;;  %v3656_v41 = vadd.f32 %v7795_v54, %v3631_v49 }
 0x48c   : > { %4303 = vst [vmem:[%s7809_s21 + $0x8] sm:$0xff] %v4258_v36  }
 0x48d   : > { %v3709_v60 = vsel %vm3673_vm8, %v3655_v63, %v3691_v3  ;;  %vm3674_vm14 = vcmp.gt.f32.partialorder %v3656_v41, 0.0  ;;  %v3692_v53 = vmul.f32 0.1, %v3656_v41  ;;  %v4299_v63 = vld [vmem:[%s6146_s18 + $0x28] sm:$0xff]  }
 0x48e   : > { %v3579_v2 = vpop.f32.mrb[160].mxu1  ;;  %v3763_v50 = vadd.f32 %v4224_v37, %v3709_v60  ;;  %v4237_v37 = vunpack.c.h.bf16 %v4299_v63 }
 0x48f   : > { %v3710_v17 = vsel %vm3674_vm14, %v3656_v41, %v3692_v53  ;;  %v3632_v0 = vadd.f32 %v3579_v2, %v7761_v13  ;;  %v5039_v43 = vpop.f32.mrb[161].mxu1  ;;  %v4236_v41 = vunpack.c.l.bf16 %v4299_v63 }
 0x490   : > { %v3764_v57 = vadd.f32 %v4225_v61, %v3710_v17  ;;  %v3582_v32 = vpop.f32.mrb[162].mxu1 }
 0x491   : > { %v3657_v59 = vadd.f32 %v7795_v54, %v3632_v0  ;;  %v3633_v14 = vadd.f32 %v3582_v32, %v7763_v22  ;;  %v5040_v12 = vpop.f32.mrb[163].mxu1 }
 0x492   : > { %v4263_v10 = vpack.c.bf16 %v3764_v57, %v3763_v50  ;;  %v4300_v57 = vld [vmem:[%s6146_s18 + $0x30] sm:$0xff]  }
 0x493   : > { %vm3675_vm15 = vcmp.gt.f32.partialorder %v3657_v59, 0.0  ;;  %v3693_v45 = vmul.f32 0.1, %v3657_v59  ;;  %v3658_v28 = vadd.f32 %v7795_v54, %v3633_v14 }
 0x494   : > { %4304 = vst [vmem:[%s7809_s21 + $0x10] sm:$0xff] %v4263_v10   ;;  %v4240_v10 = vunpack.c.l.bf16 %v4300_v57 }
 0x495   : > { %v3711_v13 = vsel %vm3675_vm15, %v3657_v59, %v3693_v45  ;;  %vm3676_vm6 = vcmp.gt.f32.partialorder %v3658_v28, 0.0  ;;  %v3694_v35 = vmul.f32 0.1, %v3658_v28  ;;  %v4241_v45 = vunpack.c.h.bf16 %v4300_v57 }
 0x496   : > { %v3587_v33 = vpop.f32.mrb[164].mxu1  ;;  %v3765_v22 = vadd.f32 %v4228_v29, %v3711_v13 }
 0x497   : > { %v3712_v34 = vsel %vm3676_vm6, %v3658_v28, %v3694_v35  ;;  %v3634_v21 = vadd.f32 %v3587_v33, %v7767_v4  ;;  %v5043_v40 = vpop.f32.mrb[165].mxu1 }
 0x498   : > { %v3766_v23 = vadd.f32 %v4229_v39, %v3712_v34  ;;  %v3590_v42 = vpop.f32.mrb[166].mxu1  ;;  %v4301_v40 = vld [vmem:[%s6146_s18 + $0x38] sm:$0xff]  }
 0x499   : > { %v3659_v48 = vadd.f32 %v7795_v54, %v3634_v21  ;;  %v3635_v19 = vadd.f32 %v3590_v42, %v7769_v18  ;;  %v5044_v6 = vpop.f32.mrb[167].mxu1 }
 0x49a   : > { %v4268_v38 = vpack.c.bf16 %v3766_v23, %v3765_v22 }
 0x49b   : > { %vm3677_vm3 = vcmp.gt.f32.partialorder %v3659_v48, 0.0  ;;  %v3695_v16 = vmul.f32 0.1, %v3659_v48  ;;  %v3660_v30 = vadd.f32 %v7795_v54, %v3635_v19  ;;  %v4245_v19 = vunpack.c.h.bf16 %v4301_v40 }
 0x49c   : > { %4305 = vst [vmem:[%s7809_s21 + $0x18] sm:$0xff] %v4268_v38  }
 0x49d   : > { %v3713_v4 = vsel %vm3677_vm3, %v3659_v48, %v3695_v16  ;;  %vm3678_vm10 = vcmp.gt.f32.partialorder %v3660_v30, 0.0  ;;  %v3696_v56 = vmul.f32 0.1, %v3660_v30 }
 0x49e   : > { %v3595_v1 = vpop.f32.mrb[168].mxu1  ;;  %v3767_v18 = vadd.f32 %v4232_v8, %v3713_v4 }
 0x49f   : > { %v3714_v20 = vsel %vm3678_vm10, %v3660_v30, %v3696_v56  ;;  %v3636_v25 = vadd.f32 %v3595_v1, %v7773_v46  ;;  %v5047_v55 = vpop.f32.mrb[169].mxu1 }
 0x4a0   : > { %v3768_v7 = vadd.f32 %v4233_v31, %v3714_v20  ;;  %v3598_v51 = vpop.f32.mrb[170].mxu1  ;;  %v4302_v20 = vld [vmem:[%s6146_s18 + $0x40] sm:$0xff]   ;;  %s3868_s18 = scalar_lea.sflag [#allocation5], %s6140_s15 }
 0x4a1   : > { %v3661_v62 = vadd.f32 %v7795_v54, %v3636_v25  ;;  %v3637_v47 = vadd.f32 %v3598_v51, %v7775_v24  ;;  %v5048_v49 = vpop.f32.mrb[171].mxu1 }
 0x4a2   : > { %v4273_v52 = vpack.c.bf16 %v3768_v7, %v3767_v18 }
 0x4a3   : > { %vm3679_vm9 = vcmp.gt.f32.partialorder %v3661_v62, 0.0  ;;  %v3697_v36 = vmul.f32 0.1, %v3661_v62  ;;  %v3662_v3 = vadd.f32 %v7795_v54, %v3637_v47 }
 0x4a4   : > { %4306 = vst [vmem:[%s7809_s21 + $0x20] sm:$0xff] %v4273_v52  }
 0x4a5   : > { %v3715_v46 = vsel %vm3679_vm9, %v3661_v62, %v3697_v36  ;;  %vm3680_vm1 = vcmp.gt.f32.partialorder %v3662_v3, 0.0  ;;  %v3698_v61 = vmul.f32 0.1, %v3662_v3  ;;  %v4249_v62 = vunpack.c.h.bf16 %v4302_v20 }
 0x4a6   : > { %v3603_v60 = vpop.f32.mrb[172].mxu1  ;;  %v3769_v24 = vadd.f32 %v4236_v41, %v3715_v46 }
 0x4a7   : > { %v3716_v53 = vsel %vm3680_vm1, %v3662_v3, %v3698_v61  ;;  %v3638_v2 = vadd.f32 %v3603_v60, %v7779_v58  ;;  %v5051_v17 = vpop.f32.mrb[173].mxu1 }
 0x4a8   : > { %v3770_v0 = vadd.f32 %v4237_v37, %v3716_v53  ;;  %v3606_v43 = vpop.f32.mrb[174].mxu1 }
 0x4a9   : > { %v3663_v50 = vadd.f32 %v7795_v54, %v3638_v2  ;;  %v3639_v32 = vadd.f32 %v3606_v43, %v7781_v11  ;;  %v5052_v59 = vpop.f32.mrb[175].mxu1 }
 0x4aa   : > { %v4278_v27 = vpack.c.bf16 %v3770_v0, %v3769_v24 }
 0x4ab   : > { %vm3681_vm5 = vcmp.gt.f32.partialorder %v3663_v50, 0.0  ;;  %v3699_v14 = vmul.f32 0.1, %v3663_v50  ;;  %v3664_v12 = vadd.f32 %v7795_v54, %v3639_v32 }
 0x4ac   : > { %4307 = vst [vmem:[%s7809_s21 + $0x28] sm:$0xff] %v4278_v27  }
 0x4ad   : > { %v3717_v58 = vsel %vm3681_vm5, %v3663_v50, %v3699_v14  ;;  %vm3682_vm0 = vcmp.gt.f32.partialorder %v3664_v12, 0.0  ;;  %v3700_v28 = vmul.f32 0.1, %v3664_v12 }
 0x4ae   : > { %v3611_v29 = vpop.f32.mrb[176].mxu1  ;;  %v3771_v11 = vadd.f32 %v4240_v10, %v3717_v58 }
 0x4af   : > { %v3718_v39 = vsel %vm3682_vm0, %v3664_v12, %v3700_v28  ;;  %v3640_v13 = vadd.f32 %v3611_v29, %v7785_v5  ;;  %v5055_v35 = vpop.f32.mrb[177].mxu1  ;;  %v4244_v5 = vunpack.c.l.bf16 %v4301_v40 }
 0x4b0   : > { %v3772_v33 = vadd.f32 %v4241_v45, %v3718_v39  ;;  %v3614_v34 = vpop.f32.mrb[178].mxu1 }
 0x4b1   : > { %v3665_v21 = vadd.f32 %v7795_v54, %v3640_v13  ;;  %v3641_v22 = vadd.f32 %v3614_v34, %v7787_v9  ;;  %v5056_v23 = vpop.f32.mrb[179].mxu1 }
 0x4b2   : > { %v4283_v42 = vpack.c.bf16 %v3772_v33, %v3771_v11 }
 0x4b3   : > { %vm3683_vm7 = vcmp.gt.f32.partialorder %v3665_v21, 0.0  ;;  %v3701_v48 = vmul.f32 0.1, %v3665_v21  ;;  %v3666_v44 = vadd.f32 %v7795_v54, %v3641_v22 }
 0x4b4   : > { %4308 = vst [vmem:[%s7809_s21 + $0x30] sm:$0xff] %v4283_v42  }
 0x4b5   : > { %v3719_v6 = vsel %vm3683_vm7, %v3665_v21, %v3701_v48  ;;  %vm3684_vm11 = vcmp.gt.f32.partialorder %v3666_v44, 0.0  ;;  %v3702_v38 = vmul.f32 0.1, %v3666_v44 }
 0x4b6   : > { %v3619_v16 = vpop.f32.mrb[180].mxu1  ;;  %v3773_v31 = vadd.f32 %v4244_v5, %v3719_v6 }
 0x4b7   : > { %v3720_v30 = vsel %vm3684_vm11, %v3666_v44, %v3702_v38  ;;  %v3642_v9 = vadd.f32 %v3619_v16, %v7791_v15  ;;  %v5059_v8 = vpop.f32.mrb[181].mxu1  ;;  %v4248_v15 = vunpack.c.l.bf16 %v4302_v20 }
 0x4b8   : > { %v3774_v4 = vadd.f32 %v4245_v19, %v3720_v30  ;;  %v3622_v56 = vpop.f32.mrb[182].mxu1 }
 0x4b9   : > { %v3667_v1 = vadd.f32 %v7795_v54, %v3642_v9  ;;  %v3643_v25 = vadd.f32 %v3622_v56, %v7793_v26  ;;  %v5060_v55 = vpop.f32.mrb[183].mxu1 }
 0x4ba   : > { %v4288_v18 = vpack.c.bf16 %v3774_v4, %v3773_v31 }
 0x4bb   : > { %vm3685_vm12 = vcmp.gt.f32.partialorder %v3667_v1, 0.0  ;;  %v3703_v7 = vmul.f32 0.1, %v3667_v1  ;;  %v3668_v51 = vadd.f32 %v7795_v54, %v3643_v25 }
 0x4bc   : > { %4309 = vst [vmem:[%s7809_s21 + $0x38] sm:$0xff] %v4288_v18  }
 0x4bd   : > { %v3721_v63 = vsel %vm3685_vm12, %v3667_v1, %v3703_v7  ;;  %vm3686_vm2 = vcmp.gt.f32.partialorder %v3668_v51, 0.0  ;;  %v3704_v47 = vmul.f32 0.1, %v3668_v51 }
 0x4be   : > { %v3775_v26 = vadd.f32 %v4248_v15, %v3721_v63 }
 0x4bf   : > { %v3722_v49 = vsel %vm3686_vm2, %v3668_v51, %v3704_v47 }
 0x4c0   : > { %v3776_v52 = vadd.f32 %v4249_v62, %v3722_v49 }
 0x4c2   : > { %v4293_v54 = vpack.c.bf16 %v3776_v52, %v3775_v26 }
 0x4c4   : > { %4310 = vst [vmem:[%s7809_s21 + $0x40] sm:$0xff] %v4293_v54  }
 0x4c5   : > { %5582 = shalt.err (!%p5579_p6)
}
 0x4c6   : > { %s5583_s7 = scalar_lea.hbm %s7862_s19, 1152  ;;  %s5587_s14 = scalar_lea.hbm %s8197_s5, 4608 }
 0x4c7   : > { %p5584_p5 = scmp.ne.s32.totalorder %s7862_s19, %s5583_s7  ;;  %p5588_p12 = scmp.lt.u32.totalorder %s7862_s19, %s8197_s5 }
 0x4c8   : > { %p5589_p13 = scmp.lt.u32.totalorder %s5587_s14, %s5583_s7  ;;  %p5591_p9 = scmp.lt.u32.totalorder %s5583_s7, %s7862_s19 }
 0x4c9   : > { %p5585_p7 = pnand %p5584_p5, %p8198_p8 }
 0x4ca   : > { %p5590_p4 = por %p5589_p13, %p5588_p12 }
 0x4cb   : > { %p5586_p11 = pneg %p5585_p7 }
 0x4cc   : > { %p5592_p2 = por %p5591_p9, %p5590_p4 }
 0x4ce   : > { %p5593_p1 = pnand %p5592_p2, %p5586_p11 }
 0x4d0   : > { %5596 = shalt.err (!%p5593_p1)
}
 0x4d1   : > { %s5717_s22 = smov 64   ;;  %s5718_s21 = smov 4  }
 0x4d2   : > { %5128 = dma.vmem_to_hbm [thread:$0]  (%p8198_p8), %s7857_s24, 1152, %s7862_s19, %s3868_s18, %s5717_s22, %s5717_s22, %s5718_s21  }
 0x4d3 PF: > { %s8199_s23 = sld [smem:[#allocation23_spill]]  ;;  %s8200_s6 = sld [smem:[#allocation34_spill]] }
 0x4d4   : > { %p5166_p10 = scmp.ge.s32.totalorder %s5703_s11, 2 }
 0x4d9   : > { %s3898_s29 = sand.u32 1, %s8199_s23   ;;  %p8201_p3 = scmp.ne.s32.totalorder %s8200_s6, 0 }
 0x4da   : > { %s3899_s27 = scalar_lea.sflag [#allocation5], %s3898_s29 }
 0x4db   : > { %p5154_p0 = pnand %p5166_p10, %p8201_p3 }
 0x4dd   : > { %5658 = dma.done.wait (!%p5154_p0), %s3899_s27, 1152  }
 0x4de   : > { %5660 = vsyncadd (!%p5154_p0), %s3899_s27, 4294966144  ;;  %s28_s11 = sadd.s32 1, %s5703_s11   ;;  %s8202_s24 = sld [smem:[#allocation21_spill]] }
 0x4df   : > { %p25_p6 = scmp.ge.s32.totalorder %s28_s11, 6   ;;  %s8203_s25 = sld [smem:[#allocation22_spill]] }
 0x4e0   : > { %s8204_s26 = sld [smem:[#allocation31_spill]]  ;;  %s8205_s13 = sld [smem:[#allocation24_spill]] }
 0x4e1   : > { %s8206_s29 = sld [smem:[#allocation33_spill]]  ;;  %s8207_s15 = sld [smem:[#allocation28_spill]] }
 0x4e2   : > { %s8208_s20 = sld [smem:[#allocation29_spill]]  ;;  %s8209_s27 = smov %s5679_s28 }
 0x4e3   : > { %s8211_s30 = smov %s5695_s9  ;;  %s8212_s8 = smov %s5699_s10 }
 0x4e4   :  { %27 = sbr.rel (!%p25_p6) target bundleno = 21 (0x15), region = 141 }
 0x4e6   : > { %s8210_s28 = smov %s8205_s13 }
 0x4e7   : > { %s8213_s9 = smov %s8207_s15 }
 0x4e8   : > { %s8214_s10 = smov %s8208_s20 }
 0x4eb   :  { %3904 = vsyncpa [#allocation4], 1 }
 0x4ec   :  { %3906 = vsyncpa [#allocation4 + $0x1], 1 }
 0x4ed   :  { %3907 = vsyncpa [#allocation7], 1 }
 0x4ee   :  { %3909 = vsyncpa [#allocation7 + $0x1], 1 }
 0x4ef   :  { %3910 = vsyncpa [#allocation10], 1 }
 0x4f0   :  { %3911 = vsyncpa [#allocation13], 1 }
 0x4f1   :  { %3912 = vsyncpa [#allocation5], 1 }
 0x4f2   :  { %3914 = vsyncpa [#allocation5 + $0x1], 1 }

</bundles_post_ra>
